<compile_context>
chip_gen: v7x
topology: tpu7x:2x2x1
jax: 0.10.0
libtpu: 0.0.40
codegen_flags: <defaults>
</compile_context>

<pallas_src>
from functools import partial

import jax
import jax.numpy as jnp
from jax import lax
from jax.experimental import pallas as pl
from jax.experimental.pallas import tpu as pltpu


def _round_up(a, m):
    return -(-a // m) * m


def _pad_cols(a, n, value=0.0):
    if a.shape[-1] == n:
        return a
    pad = [(0, 0)] * (a.ndim - 1) + [(0, n - a.shape[-1])]
    return jnp.pad(a, pad, constant_values=value)


def _pad_rows(a, n, value=0.0):
    if a.shape[0] == n:
        return a
    pad = [(0, n - a.shape[0])] + [(0, 0)] * (a.ndim - 1)
    return jnp.pad(a, pad, constant_values=value)


# ----------------------------------------------------------------------------
# Single fused Pallas kernel: encoder + decoder + prototype distances + logits
# ----------------------------------------------------------------------------
def _fused_forward_kernel(x_ref,
                          w1_ref, b1_ref, w2_ref, b2_ref, w3_ref, b3_ref,
                          d1_ref, c1_ref, d2_ref, c2_ref, d3_ref, c3_ref,
                          pT_ref, psq_ref, cw_ref, cb_ref,
                          enc_ref, dec_ref, dist_ref, logit_ref):
    def dense(h, w_ref, b_ref):
        # bf16 x bf16 MXU matmul with f32 accumulation, then f32 bias + sigmoid.
        y = jnp.dot(h.astype(jnp.bfloat16), w_ref[...],
                    preferred_element_type=jnp.float32) + b_ref[...]
        return jax.nn.sigmoid(y)

    # ---- Encoder: three (conv-as-matmul) + sigmoid layers
    h = dense(x_ref[...], w1_ref, b1_ref)
    h = dense(h, w2_ref, b2_ref)
    encoded = dense(h, w3_ref, b3_ref)        # (tb, LAT_PAD); padded cols ~ 0
    enc_ref[...] = encoded

    # ---- Decoder: three (conv-transpose-as-matmul) + sigmoid layers
    d = dense(encoded, d1_ref, c1_ref)
    d = dense(d, d2_ref, c2_ref)
    dec_ref[...] = dense(d, d3_ref, c3_ref)

    # ---- Hierarchical prototype distances: ||e||^2 - 2 e.p + ||p||^2
    #      (f32 path; ||p||^2 precomputed at lowering time; clamp FP error)
    e2 = jnp.sum(encoded * encoded, axis=1, keepdims=True)            # (tb, 1)
    cross = jnp.dot(encoded, pT_ref[...],
                    preferred_element_type=jnp.float32)               # (tb, P_pad)
    dist = jnp.maximum(e2 - 2.0 * cross + psq_ref[...], 0.0)
    dist_ref[...] = dist

    # ---- Classifier: distances -> logits (padded prototype rows of cls_w are 0)
    logit_ref[...] = (jnp.dot(dist, cw_ref[...],
                              preferred_element_type=jnp.float32) + cb_ref[...])


# ----------------------------------------------------------------------------
# Parameter lowering: conv / conv-transpose -> dense matmul slabs (done once)
# ----------------------------------------------------------------------------
def _conv_as_matrix(w, b, stride, pad, in_chw):
    """Dense matrix M s.t. flatten(conv2d(x)) = flatten(x) @ M, plus flat bias."""
    C, H, W = in_chw
    n = C * H * W
    eye = jnp.eye(n, dtype=jnp.float32).reshape(n, C, H, W)
    out = lax.conv_general_dilated(
        eye, w, window_strides=(stride, stride),
        padding=[(pad, pad), (pad, pad)],
        dimension_numbers=("NCHW", "OIHW", "NCHW"))
    _, C_out, OH, OW = out.shape
    mat = out.reshape(n, C_out * OH * OW)
    bias = jnp.repeat(b, OH * OW).reshape(1, C_out * OH * OW)
    return mat, bias, (C_out, OH, OW)


def _convT_as_matrix(w, b, stride, pad, out_pad, in_chw):
    """Same, for ConvTranspose2d (weight layout (C_in, C_out, k, k))."""
    C, H, W = in_chw
    n = C * H * W
    k = w.shape[2]
    lo = k - 1 - pad
    hi = k - 1 - pad + out_pad
    w_conv = jnp.flip(w, axis=(2, 3)).transpose(1, 0, 2, 3)   # (C_out, C_in, k, k)
    eye = jnp.eye(n, dtype=jnp.float32).reshape(n, C, H, W)
    out = lax.conv_general_dilated(
        eye, w_conv, window_strides=(1, 1),
        padding=[(lo, hi), (lo, hi)],
        lhs_dilation=(stride, stride),
        dimension_numbers=("NCHW", "OIHW", "NCHW"))
    _, C_out, OH, OW = out.shape
    mat = out.reshape(n, C_out * OH * OW)
    bias = jnp.repeat(b, OH * OW).reshape(1, C_out * OH * OW)
    return mat, bias, (C_out, OH, OW)


def lower_params(params, in_chw=(1, 16, 16)):
    """One-time, parameter-only lowering; keeps the per-forward path Pallas-only.

    Returns (lowered_tensors, meta) where meta carries the true (un-padded)
    latent / prototype / class counts as Python ints.
    """
    chw = in_chw
    enc = []
    for (w, b) in params["enc"]:
        mat, bias, chw = _conv_as_matrix(w, b, stride=2, pad=1, in_chw=chw)
        enc.append([mat, bias])
    dec = []
    for (w, b) in params["dec"]:
        mat, bias, chw = _convT_as_matrix(w, b, stride=2, pad=1, out_pad=1, in_chw=chw)
        dec.append([mat, bias])

    latent = enc[-1][0].shape[1]
    lat_pad = _round_up(latent, 128)
    # Lane-pad latent: zero weight cols + large-negative bias -> sigmoid() == ~0
    # on padded columns, so they contribute nothing downstream.
    enc[-1][0] = _pad_cols(enc[-1][0], lat_pad, 0.0)
    enc[-1][1] = _pad_cols(enc[-1][1], lat_pad, -30.0)
    dec[0][0] = _pad_rows(dec[0][0], lat_pad, 0.0)

    protos = jnp.concatenate([params["protos"], params["sub_protos"]], axis=0)
    n_protos = protos.shape[0]
    n_classes = params["cls_w"].shape[1]
    p_pad = _round_up(n_protos, 128)
    c_pad = _round_up(n_classes, 128)

    protos_p = _pad_rows(_pad_cols(protos, lat_pad), p_pad)        # (p_pad, lat_pad)
    cls_w = _pad_rows(_pad_cols(params["cls_w"], c_pad), p_pad)    # (p_pad, c_pad)
    cls_b = _pad_cols(params["cls_b"].reshape(1, -1), c_pad)       # (1, c_pad)

    lowered = {
        # Large conv slabs in bf16 (f32 accumulation happens inside the kernel).
        "enc": [(m.astype(jnp.bfloat16), b) for (m, b) in enc],
        "dec": [(m.astype(jnp.bfloat16), b) for (m, b) in dec],
        # Prototype / classifier path stays f32 (accuracy-sensitive, tiny).
        "protos_T": protos_p.T,                                     # (lat_pad, p_pad)
        "protos_sq": jnp.sum(protos_p * protos_p, axis=1)[None, :], # (1, p_pad)
        "cls_w": cls_w,
        "cls_b": cls_b,
    }
    meta = {"latent_size": latent, "n_protos": n_protos, "n_classes": n_classes}
    return lowered, meta


# ----------------------------------------------------------------------------
# Forward pass: one pallas_call, batch-tiled grid, weights VMEM-resident
# ----------------------------------------------------------------------------
def hierarchy_model_forward(lowered, x, *, latent_size, n_protos, n_classes):
    B, C, H, W = x.shape
    x_flat = x.reshape(B, C * H * W)

    (w1, b1), (w2, b2), (w3, b3) = lowered["enc"]
    (d1, c1), (d2, c2), (d3, c3) = lowered["dec"]
    pT, psq = lowered["protos_T"], lowered["protos_sq"]
    cw, cb = lowered["cls_w"], lowered["cls_b"]

    lat_pad = w3.shape[1]
    out_flat = d3.shape[1]
    p_pad = pT.shape[1]
    c_pad = cw.shape[1]

    # Batch row-tiling: multiple of 8 sublanes; for B >= 16 aim for grid >= 2 so
    # the "parallel" axis can shard across v7x's two TensorCores; cap at 512 rows
    # to stay inside v7x's VMEM budget.
    B8 = _round_up(B, 8)
    if B8 < 16:
        tb = 8
    else:
        tb = min(512, _round_up(B8 // 2, 8))
    Bp = _round_up(B, tb)
    xp = x_flat if Bp == B else jnp.pad(x_flat, ((0, Bp - B), (0, 0)))

    row_spec = lambda n: pl.BlockSpec((tb, n), lambda i: (i, 0))
    # Index-invariant operands: whole array resident in VMEM, single-buffered.
    vmem_spec = pl.BlockSpec(memory_space=pltpu.MemorySpace.VMEM)
    weights = (w1, b1, w2, b2, w3, b3, d1, c1, d2, c2, d3, c3, pT, psq, cw, cb)

    encoded, decoded_flat, distances, logits = pl.pallas_call(
        _fused_forward_kernel,
        grid=(Bp // tb,),
        in_specs=[row_spec(x_flat.shape[1])] + [vmem_spec] * len(weights),
        out_specs=(row_spec(lat_pad), row_spec(out_flat),
                   row_spec(p_pad), row_spec(c_pad)),
        out_shape=(
            jax.ShapeDtypeStruct((Bp, lat_pad), jnp.float32),
            jax.ShapeDtypeStruct((Bp, out_flat), jnp.float32),
            jax.ShapeDtypeStruct((Bp, p_pad), jnp.float32),
            jax.ShapeDtypeStruct((Bp, c_pad), jnp.float32),
        ),
        compiler_params=pltpu.CompilerParams(
            dimension_semantics=("parallel",),     # shards batch across v7x's 2 TCs
            vmem_limit_bytes=48 * 1024 * 1024),
    )(xp, *weights)

    # Slice off batch padding and lane padding (padded rows/cols carry garbage).
    encoded = encoded[:B, :latent_size]
    decoded = decoded_flat[:B].reshape(B, C, H, W)
    distances = distances[:B, :n_protos]
    logits = logits[:B, :n_classes]
    return encoded, decoded, (distances, logits)


# ----------------------------------------------------------------------------
# Parameters + pure-JAX reference (for correctness check only)
# ----------------------------------------------------------------------------
def init_params(key, n_prototypes, latent_size, n_classes, n_sub_prototypes,
                in_ch=1, hidden_ch=16):
    assert latent_size % 4 == 0, "latent maps to (latent_size//4) x 2 x 2"
    latent_ch = latent_size // 4
    ks = jax.random.split(key, 15)

    def w(k, shape, scale=0.1):
        return jax.random.normal(k, shape, jnp.float32) * scale

    return {
        # ConvEncoder: three stride-2 3x3 convs (sigmoid), 16x16 -> 2x2
        "enc": [
            (w(ks[0], (hidden_ch, in_ch, 3, 3)),     w(ks[1], (hidden_ch,))),
            (w(ks[2], (hidden_ch, hidden_ch, 3, 3)), w(ks[3], (hidden_ch,))),
            (w(ks[4], (latent_ch, hidden_ch, 3, 3)), w(ks[5], (latent_ch,))),
        ],
        # ConvDecoder: three stride-2 3x3 conv-transposes (sigmoid), 2x2 -> 16x16
        "dec": [
            (w(ks[6], (latent_ch, hidden_ch, 3, 3)),  w(ks[7], (hidden_ch,))),
            (w(ks[8], (hidden_ch, hidden_ch, 3, 3)),  w(ks[9], (hidden_ch,))),
            (w(ks[10], (hidden_ch, in_ch, 3, 3)),     w(ks[11], (in_ch,))),
        ],
        "protos": jax.random.uniform(ks[12], (n_prototypes, latent_size), jnp.float32),
        "sub_protos": jax.random.uniform(
            ks[13], (n_prototypes * n_sub_prototypes, latent_size), jnp.float32),
        "cls_w": w(ks[14], (n_prototypes * (1 + n_sub_prototypes), n_classes)),
        "cls_b": jnp.zeros((n_classes,), jnp.float32),
    }


def reference_forward(params, x):
    """Pure-JAX (XLA) f32 reference with identical semantics, for validation."""
    def conv(x, w, b, stride, pad):
        y = lax.conv_general_dilated(x, w, (stride, stride), [(pad, pad)] * 2,
                                     dimension_numbers=("NCHW", "OIHW", "NCHW"))
        return jax.nn.sigmoid(y + b[None, :, None, None])

    def convT(x, w, b, stride, pad, out_pad):
        k = w.shape[2]
        lo, hi = k - 1 - pad, k - 1 - pad + out_pad
        w_conv = jnp.flip(w, (2, 3)).transpose(1, 0, 2, 3)
        y = lax.conv_general_dilated(x, w_conv, (1, 1), [(lo, hi)] * 2,
                                     lhs_dilation=(stride, stride),
                                     dimension_numbers=("NCHW", "OIHW", "NCHW"))
        return jax.nn.sigmoid(y + b[None, :, None, None])

    B = x.shape[0]
    h = x
    for (w, b) in params["enc"]:
        h = conv(h, w, b, 2, 1)
    encoded = h.reshape(B, -1)
    d = encoded.reshape(h.shape)
    for (w, b) in params["dec"]:
        d = convT(d, w, b, 2, 1, 1)
    protos = jnp.concatenate([params["protos"], params["sub_protos"]], 0)
    diff = encoded[:, None, :] - protos[None, :, :]         # direct (e - p)^2 form
    dist = jnp.sum(diff * diff, axis=-1)
    logits = dist @ params["cls_w"] + params["cls_b"]
    return encoded, d, (dist, logits)


# ----------------------------------------------------------------------------
if __name__ == "__main__":
    n_prototypes, latent_size, n_classes, n_sub_prototypes = 5, 40, 3, 2

    key = jax.random.PRNGKey(0)
    pkey, xkey = jax.random.split(key)
    params = init_params(pkey, n_prototypes, latent_size, n_classes, n_sub_prototypes)
    lowered, meta = lower_params(params)          # one-time param lowering (+ bf16 cast)

    x = jax.random.normal(xkey, (2, 1, 16, 16), jnp.float32)   # NCHW

    fwd = jax.jit(partial(hierarchy_model_forward, **meta))
    encoded, decoded, (distances, logits) = fwd(lowered, x)
    jax.block_until_ready((encoded, decoded, distances, logits))

    n_protos_total = n_prototypes * (1 + n_sub_prototypes)
    assert encoded.shape == (2, latent_size)
    assert decoded.shape == x.shape
    assert distances.shape == (2, n_protos_total)
    assert logits.shape == (2, n_classes)

    # Validate the fused Pallas kernel (bf16 slabs, f32 accumulation) against the
    # pure-f32 JAX reference that uses the direct (e - p)^2 distance form.
    r_enc, r_dec, (r_dist, r_logits) = reference_forward(params, x)
    for name, a, b in [("encoded", encoded, r_enc), ("decoded", decoded, r_dec),
                       ("distances", distances, r_dist), ("logits", logits, r_logits)]:
        assert bool(jnp.allclose(a, b, atol=5e-2, rtol=5e-2)), (
            f"{name} mismatch: max abs err {float(jnp.max(jnp.abs(a - b)))}")

    print("KERNEL_OK")
</pallas_src>

<mosaic_0001>
module attributes {stable_mosaic.version = 11 : i64} {
  func.func @_fused_forward_kernel(%arg0: i32, %arg1: memref<8x256xf32, #tpu.memory_space<vmem>>, %arg2: memref<256x1024xbf16, #tpu.memory_space<vmem>>, %arg3: memref<1x1024xf32, #tpu.memory_space<vmem>>, %arg4: memref<1024x256xbf16, #tpu.memory_space<vmem>>, %arg5: memref<1x256xf32, #tpu.memory_space<vmem>>, %arg6: memref<256x128xbf16, #tpu.memory_space<vmem>>, %arg7: memref<1x128xf32, #tpu.memory_space<vmem>>, %arg8: memref<128x256xbf16, #tpu.memory_space<vmem>>, %arg9: memref<1x256xf32, #tpu.memory_space<vmem>>, %arg10: memref<256x1024xbf16, #tpu.memory_space<vmem>>, %arg11: memref<1x1024xf32, #tpu.memory_space<vmem>>, %arg12: memref<1024x256xbf16, #tpu.memory_space<vmem>>, %arg13: memref<1x256xf32, #tpu.memory_space<vmem>>, %arg14: memref<128x128xf32, #tpu.memory_space<vmem>>, %arg15: memref<1x128xf32, #tpu.memory_space<vmem>>, %arg16: memref<128x128xf32, #tpu.memory_space<vmem>>, %arg17: memref<1x128xf32, #tpu.memory_space<vmem>>, %arg18: memref<8x128xf32, #tpu.memory_space<vmem>>, %arg19: memref<8x256xf32, #tpu.memory_space<vmem>>, %arg20: memref<8x128xf32, #tpu.memory_space<vmem>>, %arg21: memref<8x128xf32, #tpu.memory_space<vmem>>) attributes {dimension_semantics = [#tpu.dimension_semantics<parallel>], iteration_bounds = array<i64: 1>, scalar_prefetch = 0 : i64, scratch_operands = 0 : i64, tpu.core_type = #tpu.core_type<tc>, window_params = [{transform_indices = @transform_0, window_bounds = array<i64: 8, 256>}, {pipeline_mode = #tpu.pipeline_mode<synchronous>, transform_indices = @transform_1, window_bounds = array<i64: 256, 1024>}, {pipeline_mode = #tpu.pipeline_mode<synchronous>, transform_indices = @transform_2, window_bounds = array<i64: 1, 1024>}, {pipeline_mode = #tpu.pipeline_mode<synchronous>, transform_indices = @transform_3, window_bounds = array<i64: 1024, 256>}, {pipeline_mode = #tpu.pipeline_mode<synchronous>, transform_indices = @transform_4, window_bounds = array<i64: 1, 256>}, {pipeline_mode = #tpu.pipeline_mode<synchronous>, transform_indices = @transform_5, window_bounds = array<i64: 256, 128>}, {pipeline_mode = #tpu.pipeline_mode<synchronous>, transform_indices = @transform_6, window_bounds = array<i64: 1, 128>}, {pipeline_mode = #tpu.pipeline_mode<synchronous>, transform_indices = @transform_7, window_bounds = array<i64: 128, 256>}, {pipeline_mode = #tpu.pipeline_mode<synchronous>, transform_indices = @transform_8, window_bounds = array<i64: 1, 256>}, {pipeline_mode = #tpu.pipeline_mode<synchronous>, transform_indices = @transform_9, window_bounds = array<i64: 256, 1024>}, {pipeline_mode = #tpu.pipeline_mode<synchronous>, transform_indices = @transform_10, window_bounds = array<i64: 1, 1024>}, {pipeline_mode = #tpu.pipeline_mode<synchronous>, transform_indices = @transform_11, window_bounds = array<i64: 1024, 256>}, {pipeline_mode = #tpu.pipeline_mode<synchronous>, transform_indices = @transform_12, window_bounds = array<i64: 1, 256>}, {pipeline_mode = #tpu.pipeline_mode<synchronous>, transform_indices = @transform_13, window_bounds = array<i64: 128, 128>}, {pipeline_mode = #tpu.pipeline_mode<synchronous>, transform_indices = @transform_14, window_bounds = array<i64: 1, 128>}, {pipeline_mode = #tpu.pipeline_mode<synchronous>, transform_indices = @transform_15, window_bounds = array<i64: 128, 128>}, {pipeline_mode = #tpu.pipeline_mode<synchronous>, transform_indices = @transform_16, window_bounds = array<i64: 1, 128>}, {transform_indices = @transform_17, window_bounds = array<i64: 8, 128>}, {transform_indices = @transform_18, window_bounds = array<i64: 8, 256>}, {transform_indices = @transform_19, window_bounds = array<i64: 8, 128>}, {transform_indices = @transform_20, window_bounds = array<i64: 8, 128>}]} {
    %c0 = arith.constant 0 : index
    %c0_0 = arith.constant 0 : index
    %0 = vector.load %arg1[%c0, %c0_0] : memref<8x256xf32, #tpu.memory_space<vmem>>, vector<8x256xf32>
    %1 = arith.truncf %0 : vector<8x256xf32> to vector<8x256xbf16>
    %c0_1 = arith.constant 0 : index
    %c0_2 = arith.constant 0 : index
    %2 = vector.load %arg2[%c0_1, %c0_2] : memref<256x1024xbf16, #tpu.memory_space<vmem>>, vector<256x1024xbf16>
    %cst = arith.constant dense<0.000000e+00> : vector<8x1024xf32>
    %3 = tpu.matmul %1, %2, %cst {dimension_numbers = #tpu.dot_dimension_numbers<[1], [0], [0], [1], [0, 0, 1, 1], [], []>} : vector<8x256xbf16>, vector<256x1024xbf16>, vector<8x1024xf32> -> vector<8x1024xf32>
    %c0_3 = arith.constant 0 : index
    %c0_4 = arith.constant 0 : index
    %4 = vector.load %arg3[%c0_3, %c0_4] : memref<1x1024xf32, #tpu.memory_space<vmem>>, vector<1x1024xf32>
    %5 = vector.broadcast %4 : vector<1x1024xf32> to vector<8x1024xf32>
    %6 = arith.addf %3, %5 : vector<8x1024xf32>
    %7 = arith.negf %6 : vector<8x1024xf32>
    %8 = math.exp %7 : vector<8x1024xf32>
    %cst_5 = arith.constant 1.000000e+00 : f32
    %9 = vector.broadcast %cst_5 : f32 to vector<8x1024xf32>
    %10 = arith.addf %9, %8 : vector<8x1024xf32>
    %11 = arith.divf %9, %10 : vector<8x1024xf32>
    %12 = arith.truncf %11 : vector<8x1024xf32> to vector<8x1024xbf16>
    %c0_6 = arith.constant 0 : index
    %c0_7 = arith.constant 0 : index
    %13 = vector.load %arg4[%c0_6, %c0_7] : memref<1024x256xbf16, #tpu.memory_space<vmem>>, vector<1024x256xbf16>
    %cst_8 = arith.constant dense<0.000000e+00> : vector<8x256xf32>
    %14 = tpu.matmul %12, %13, %cst_8 {dimension_numbers = #tpu.dot_dimension_numbers<[1], [0], [0], [1], [0, 0, 1, 1], [], []>} : vector<8x1024xbf16>, vector<1024x256xbf16>, vector<8x256xf32> -> vector<8x256xf32>
    %c0_9 = arith.constant 0 : index
    %c0_10 = arith.constant 0 : index
    %15 = vector.load %arg5[%c0_9, %c0_10] : memref<1x256xf32, #tpu.memory_space<vmem>>, vector<1x256xf32>
    %16 = vector.broadcast %15 : vector<1x256xf32> to vector<8x256xf32>
    %17 = arith.addf %14, %16 : vector<8x256xf32>
    %18 = arith.negf %17 : vector<8x256xf32>
    %19 = math.exp %18 : vector<8x256xf32>
    %cst_11 = arith.constant 1.000000e+00 : f32
    %20 = vector.broadcast %cst_11 : f32 to vector<8x256xf32>
    %21 = arith.addf %20, %19 : vector<8x256xf32>
    %22 = arith.divf %20, %21 : vector<8x256xf32>
    %23 = arith.truncf %22 : vector<8x256xf32> to vector<8x256xbf16>
    %c0_12 = arith.constant 0 : index
    %c0_13 = arith.constant 0 : index
    %24 = vector.load %arg6[%c0_12, %c0_13] : memref<256x128xbf16, #tpu.memory_space<vmem>>, vector<256x128xbf16>
    %cst_14 = arith.constant dense<0.000000e+00> : vector<8x128xf32>
    %25 = tpu.matmul %23, %24, %cst_14 {dimension_numbers = #tpu.dot_dimension_numbers<[1], [0], [0], [1], [0, 0, 1, 1], [], []>} : vector<8x256xbf16>, vector<256x128xbf16>, vector<8x128xf32> -> vector<8x128xf32>
    %c0_15 = arith.constant 0 : index
    %c0_16 = arith.constant 0 : index
    %26 = vector.load %arg7[%c0_15, %c0_16] : memref<1x128xf32, #tpu.memory_space<vmem>>, vector<1x128xf32>
    %27 = vector.broadcast %26 : vector<1x128xf32> to vector<8x128xf32>
    %28 = arith.addf %25, %27 : vector<8x128xf32>
    %29 = arith.negf %28 : vector<8x128xf32>
    %30 = math.exp %29 : vector<8x128xf32>
    %cst_17 = arith.constant 1.000000e+00 : f32
    %31 = vector.broadcast %cst_17 : f32 to vector<8x128xf32>
    %32 = arith.addf %31, %30 : vector<8x128xf32>
    %33 = arith.divf %31, %32 : vector<8x128xf32>
    %c0_18 = arith.constant 0 : index
    %c0_19 = arith.constant 0 : index
    %34 = vector.load %arg18[%c0_18, %c0_19] : memref<8x128xf32, #tpu.memory_space<vmem>>, vector<8x128xf32>
    tpu.vector_store %arg18[%c0_18, %c0_19], %33 {strides = array<i32>} : memref<8x128xf32, #tpu.memory_space<vmem>>, vector<8x128xf32>,
    %35 = arith.truncf %33 : vector<8x128xf32> to vector<8x128xbf16>
    %c0_20 = arith.constant 0 : index
    %c0_21 = arith.constant 0 : index
    %36 = vector.load %arg8[%c0_20, %c0_21] : memref<128x256xbf16, #tpu.memory_space<vmem>>, vector<128x256xbf16>
    %cst_22 = arith.constant dense<0.000000e+00> : vector<8x256xf32>
    %37 = tpu.matmul %35, %36, %cst_22 {dimension_numbers = #tpu.dot_dimension_numbers<[1], [0], [0], [1], [0, 0, 1, 1], [], []>} : vector<8x128xbf16>, vector<128x256xbf16>, vector<8x256xf32> -> vector<8x256xf32>
    %c0_23 = arith.constant 0 : index
    %c0_24 = arith.constant 0 : index
    %38 = vector.load %arg9[%c0_23, %c0_24] : memref<1x256xf32, #tpu.memory_space<vmem>>, vector<1x256xf32>
    %39 = vector.broadcast %38 : vector<1x256xf32> to vector<8x256xf32>
    %40 = arith.addf %37, %39 : vector<8x256xf32>
    %41 = arith.negf %40 : vector<8x256xf32>
    %42 = math.exp %41 : vector<8x256xf32>
    %cst_25 = arith.constant 1.000000e+00 : f32
    %43 = vector.broadcast %cst_25 : f32 to vector<8x256xf32>
    %44 = arith.addf %43, %42 : vector<8x256xf32>
    %45 = arith.divf %43, %44 : vector<8x256xf32>
    %46 = arith.truncf %45 : vector<8x256xf32> to vector<8x256xbf16>
    %c0_26 = arith.constant 0 : index
    %c0_27 = arith.constant 0 : index
    %47 = vector.load %arg10[%c0_26, %c0_27] : memref<256x1024xbf16, #tpu.memory_space<vmem>>, vector<256x1024xbf16>
    %cst_28 = arith.constant dense<0.000000e+00> : vector<8x1024xf32>
    %48 = tpu.matmul %46, %47, %cst_28 {dimension_numbers = #tpu.dot_dimension_numbers<[1], [0], [0], [1], [0, 0, 1, 1], [], []>} : vector<8x256xbf16>, vector<256x1024xbf16>, vector<8x1024xf32> -> vector<8x1024xf32>
    %c0_29 = arith.constant 0 : index
    %c0_30 = arith.constant 0 : index
    %49 = vector.load %arg11[%c0_29, %c0_30] : memref<1x1024xf32, #tpu.memory_space<vmem>>, vector<1x1024xf32>
    %50 = vector.broadcast %49 : vector<1x1024xf32> to vector<8x1024xf32>
    %51 = arith.addf %48, %50 : vector<8x1024xf32>
    %52 = arith.negf %51 : vector<8x1024xf32>
    %53 = math.exp %52 : vector<8x1024xf32>
    %cst_31 = arith.constant 1.000000e+00 : f32
    %54 = vector.broadcast %cst_31 : f32 to vector<8x1024xf32>
    %55 = arith.addf %54, %53 : vector<8x1024xf32>
    %56 = arith.divf %54, %55 : vector<8x1024xf32>
    %57 = arith.truncf %56 : vector<8x1024xf32> to vector<8x1024xbf16>
    %c0_32 = arith.constant 0 : index
    %c0_33 = arith.constant 0 : index
    %58 = vector.load %arg12[%c0_32, %c0_33] : memref<1024x256xbf16, #tpu.memory_space<vmem>>, vector<1024x256xbf16>
    %cst_34 = arith.constant dense<0.000000e+00> : vector<8x256xf32>
    %59 = tpu.matmul %57, %58, %cst_34 {dimension_numbers = #tpu.dot_dimension_numbers<[1], [0], [0], [1], [0, 0, 1, 1], [], []>} : vector<8x1024xbf16>, vector<1024x256xbf16>, vector<8x256xf32> -> vector<8x256xf32>
    %c0_35 = arith.constant 0 : index
    %c0_36 = arith.constant 0 : index
    %60 = vector.load %arg13[%c0_35, %c0_36] : memref<1x256xf32, #tpu.memory_space<vmem>>, vector<1x256xf32>
    %61 = vector.broadcast %60 : vector<1x256xf32> to vector<8x256xf32>
    %62 = arith.addf %59, %61 : vector<8x256xf32>
    %63 = arith.negf %62 : vector<8x256xf32>
    %64 = math.exp %63 : vector<8x256xf32>
    %cst_37 = arith.constant 1.000000e+00 : f32
    %65 = vector.broadcast %cst_37 : f32 to vector<8x256xf32>
    %66 = arith.addf %65, %64 : vector<8x256xf32>
    %67 = arith.divf %65, %66 : vector<8x256xf32>
    %c0_38 = arith.constant 0 : index
    %c0_39 = arith.constant 0 : index
    %68 = vector.load %arg19[%c0_38, %c0_39] : memref<8x256xf32, #tpu.memory_space<vmem>>, vector<8x256xf32>
    tpu.vector_store %arg19[%c0_38, %c0_39], %67 {strides = array<i32>} : memref<8x256xf32, #tpu.memory_space<vmem>>, vector<8x256xf32>,
    %69 = arith.mulf %33, %33 : vector<8x128xf32>
    %cst_40 = arith.constant dense<0.000000e+00> : vector<8xf32>
    %70 = vector.multi_reduction <add>, %69, %cst_40 [1] : vector<8x128xf32> to vector<8xf32>
    %71 = vector.shape_cast %70 : vector<8xf32> to vector<8x1xf32>
    %c0_41 = arith.constant 0 : index
    %c0_42 = arith.constant 0 : index
    %72 = vector.load %arg14[%c0_41, %c0_42] : memref<128x128xf32, #tpu.memory_space<vmem>>, vector<128x128xf32>
    %cst_43 = arith.constant dense<0.000000e+00> : vector<8x128xf32>
    %73 = tpu.matmul %33, %72, %cst_43 {dimension_numbers = #tpu.dot_dimension_numbers<[1], [0], [0], [1], [0, 0, 1, 1], [], []>} : vector<8x128xf32>, vector<128x128xf32>, vector<8x128xf32> -> vector<8x128xf32>
    %cst_44 = arith.constant 2.000000e+00 : f32
    %74 = vector.broadcast %cst_44 : f32 to vector<8x128xf32>
    %75 = arith.mulf %74, %73 : vector<8x128xf32>
    %76 = vector.broadcast %71 : vector<8x1xf32> to vector<8x128xf32>
    %77 = arith.subf %76, %75 : vector<8x128xf32>
    %c0_45 = arith.constant 0 : index
    %c0_46 = arith.constant 0 : index
    %78 = vector.load %arg15[%c0_45, %c0_46] : memref<1x128xf32, #tpu.memory_space<vmem>>, vector<1x128xf32>
    %79 = vector.broadcast %78 : vector<1x128xf32> to vector<8x128xf32>
    %80 = arith.addf %77, %79 : vector<8x128xf32>
    %cst_47 = arith.constant 0.000000e+00 : f32
    %81 = vector.broadcast %cst_47 : f32 to vector<8x128xf32>
    %82 = arith.maximumf %80, %81 : vector<8x128xf32>
    %c0_48 = arith.constant 0 : index
    %c0_49 = arith.constant 0 : index
    %83 = vector.load %arg20[%c0_48, %c0_49] : memref<8x128xf32, #tpu.memory_space<vmem>>, vector<8x128xf32>
    tpu.vector_store %arg20[%c0_48, %c0_49], %82 {strides = array<i32>} : memref<8x128xf32, #tpu.memory_space<vmem>>, vector<8x128xf32>,
    %c0_50 = arith.constant 0 : index
    %c0_51 = arith.constant 0 : index
    %84 = vector.load %arg16[%c0_50, %c0_51] : memref<128x128xf32, #tpu.memory_space<vmem>>, vector<128x128xf32>
    %cst_52 = arith.constant dense<0.000000e+00> : vector<8x128xf32>
    %85 = tpu.matmul %82, %84, %cst_52 {dimension_numbers = #tpu.dot_dimension_numbers<[1], [0], [0], [1], [0, 0, 1, 1], [], []>} : vector<8x128xf32>, vector<128x128xf32>, vector<8x128xf32> -> vector<8x128xf32>
    %c0_53 = arith.constant 0 : index
    %c0_54 = arith.constant 0 : index
    %86 = vector.load %arg17[%c0_53, %c0_54] : memref<1x128xf32, #tpu.memory_space<vmem>>, vector<1x128xf32>
    %87 = vector.broadcast %86 : vector<1x128xf32> to vector<8x128xf32>
    %88 = arith.addf %85, %87 : vector<8x128xf32>
    %c0_55 = arith.constant 0 : index
    %c0_56 = arith.constant 0 : index
    %89 = vector.load %arg21[%c0_55, %c0_56] : memref<8x128xf32, #tpu.memory_space<vmem>>, vector<8x128xf32>
    tpu.vector_store %arg21[%c0_55, %c0_56], %88 {strides = array<i32>} : memref<8x128xf32, #tpu.memory_space<vmem>>, vector<8x128xf32>,
    return
  }
  func.func @transform_0(%arg0: i32) -> (i32, i32) {
    %c0_i32 = arith.constant 0 : i32
    %c0_i32_0 = arith.constant 0 : i32
    return %arg0, %c0_i32 : i32, i32
  }
  func.func @transform_1(%arg0: i32) -> (i32, i32) {
    %c0_i32 = arith.constant 0 : i32
    %c0_i32_0 = arith.constant 0 : i32
    %c0_i32_1 = arith.constant 0 : i32
    return %c0_i32, %c0_i32_0 : i32, i32
  }
  func.func @transform_2(%arg0: i32) -> (i32, i32) {
    %c0_i32 = arith.constant 0 : i32
    %c0_i32_0 = arith.constant 0 : i32
    %c0_i32_1 = arith.constant 0 : i32
    return %c0_i32, %c0_i32_0 : i32, i32
  }
  func.func @transform_3(%arg0: i32) -> (i32, i32) {
    %c0_i32 = arith.constant 0 : i32
    %c0_i32_0 = arith.constant 0 : i32
    %c0_i32_1 = arith.constant 0 : i32
    return %c0_i32, %c0_i32_0 : i32, i32
  }
  func.func @transform_4(%arg0: i32) -> (i32, i32) {
    %c0_i32 = arith.constant 0 : i32
    %c0_i32_0 = arith.constant 0 : i32
    %c0_i32_1 = arith.constant 0 : i32
    return %c0_i32, %c0_i32_0 : i32, i32
  }
  func.func @transform_5(%arg0: i32) -> (i32, i32) {
    %c0_i32 = arith.constant 0 : i32
    %c0_i32_0 = arith.constant 0 : i32
    %c0_i32_1 = arith.constant 0 : i32
    return %c0_i32, %c0_i32_0 : i32, i32
  }
  func.func @transform_6(%arg0: i32) -> (i32, i32) {
    %c0_i32 = arith.constant 0 : i32
    %c0_i32_0 = arith.constant 0 : i32
    %c0_i32_1 = arith.constant 0 : i32
    return %c0_i32, %c0_i32_0 : i32, i32
  }
  func.func @transform_7(%arg0: i32) -> (i32, i32) {
    %c0_i32 = arith.constant 0 : i32
    %c0_i32_0 = arith.constant 0 : i32
    %c0_i32_1 = arith.constant 0 : i32
    return %c0_i32, %c0_i32_0 : i32, i32
  }
  func.func @transform_8(%arg0: i32) -> (i32, i32) {
    %c0_i32 = arith.constant 0 : i32
    %c0_i32_0 = arith.constant 0 : i32
    %c0_i32_1 = arith.constant 0 : i32
    return %c0_i32, %c0_i32_0 : i32, i32
  }
  func.func @transform_9(%arg0: i32) -> (i32, i32) {
    %c0_i32 = arith.constant 0 : i32
    %c0_i32_0 = arith.constant 0 : i32
    %c0_i32_1 = arith.constant 0 : i32
    return %c0_i32, %c0_i32_0 : i32, i32
  }
  func.func @transform_10(%arg0: i32) -> (i32, i32) {
    %c0_i32 = arith.constant 0 : i32
    %c0_i32_0 = arith.constant 0 : i32
    %c0_i32_1 = arith.constant 0 : i32
    return %c0_i32, %c0_i32_0 : i32, i32
  }
  func.func @transform_11(%arg0: i32) -> (i32, i32) {
    %c0_i32 = arith.constant 0 : i32
    %c0_i32_0 = arith.constant 0 : i32
    %c0_i32_1 = arith.constant 0 : i32
    return %c0_i32, %c0_i32_0 : i32, i32
  }
  func.func @transform_12(%arg0: i32) -> (i32, i32) {
    %c0_i32 = arith.constant 0 : i32
    %c0_i32_0 = arith.constant 0 : i32
    %c0_i32_1 = arith.constant 0 : i32
    return %c0_i32, %c0_i32_0 : i32, i32
  }
  func.func @transform_13(%arg0: i32) -> (i32, i32) {
    %c0_i32 = arith.constant 0 : i32
    %c0_i32_0 = arith.constant 0 : i32
    %c0_i32_1 = arith.constant 0 : i32
    return %c0_i32, %c0_i32_0 : i32, i32
  }
  func.func @transform_14(%arg0: i32) -> (i32, i32) {
    %c0_i32 = arith.constant 0 : i32
    %c0_i32_0 = arith.constant 0 : i32
    %c0_i32_1 = arith.constant 0 : i32
    return %c0_i32, %c0_i32_0 : i32, i32
  }
  func.func @transform_15(%arg0: i32) -> (i32, i32) {
    %c0_i32 = arith.constant 0 : i32
    %c0_i32_0 = arith.constant 0 : i32
    %c0_i32_1 = arith.constant 0 : i32
    return %c0_i32, %c0_i32_0 : i32, i32
  }
  func.func @transform_16(%arg0: i32) -> (i32, i32) {
    %c0_i32 = arith.constant 0 : i32
    %c0_i32_0 = arith.constant 0 : i32
    %c0_i32_1 = arith.constant 0 : i32
    return %c0_i32, %c0_i32_0 : i32, i32
  }
  func.func @transform_17(%arg0: i32) -> (i32, i32) {
    %c0_i32 = arith.constant 0 : i32
    %c0_i32_0 = arith.constant 0 : i32
    return %arg0, %c0_i32 : i32, i32
  }
  func.func @transform_18(%arg0: i32) -> (i32, i32) {
    %c0_i32 = arith.constant 0 : i32
    %c0_i32_0 = arith.constant 0 : i32
    return %arg0, %c0_i32 : i32, i32
  }
  func.func @transform_19(%arg0: i32) -> (i32, i32) {
    %c0_i32 = arith.constant 0 : i32
    %c0_i32_0 = arith.constant 0 : i32
    return %arg0, %c0_i32 : i32, i32
  }
  func.func @transform_20(%arg0: i32) -> (i32, i32) {
    %c0_i32 = arith.constant 0 : i32
    %c0_i32_0 = arith.constant 0 : i32
    return %arg0, %c0_i32 : i32, i32
  }
}

</mosaic_0001>

<bundles_post_ra>
// kernel: hierarchy_model_forward.1
= control target key start
LH: loop header
LB: loop body
LE: loop exit
PB: predicated region body
PF: predicated region fallthrough
CT: control target
= control target key end

     0   :  { %s6621_s0 = inlined_call_operand.vmem [shape: f32[8,256], index: 0, kind: input, shape index: {}]   ;;  %s6622_s1 = inlined_call_operand.hbm [shape: bf16[256,1024], index: 1, kind: input, shape index: {}]   ;;  %s6623_s2 = inlined_call_operand.vmem [shape: f32[1,1024], index: 2, kind: input, shape index: {}]   ;;  %s6624_s3 = inlined_call_operand.hbm [shape: bf16[1024,256], index: 3, kind: input, shape index: {}]   ;;  %s6625_s4 = inlined_call_operand.vmem [shape: f32[1,256], index: 4, kind: input, shape index: {}]   ;;  %s6626_s5 = inlined_call_operand.hbm [shape: bf16[256,128], index: 5, kind: input, shape index: {}]   ;;  %s6627_s6 = inlined_call_operand.vmem [shape: f32[1,128], index: 6, kind: input, shape index: {}]   ;;  %s6628_s7 = inlined_call_operand.hbm [shape: bf16[128,256], index: 7, kind: input, shape index: {}]   ;;  %s6629_s8 = inlined_call_operand.vmem [shape: f32[1,256], index: 8, kind: input, shape index: {}]   ;;  %s6630_s9 = inlined_call_operand.hbm [shape: bf16[256,1024], index: 9, kind: input, shape index: {}]   ;;  %s6631_s10 = inlined_call_operand.vmem [shape: f32[1,1024], index: 10, kind: input, shape index: {}]   ;;  %s6632_s11 = inlined_call_operand.hbm [shape: bf16[1024,256], index: 11, kind: input, shape index: {}]   ;;  %s6633_s12 = inlined_call_operand.vmem [shape: f32[1,256], index: 12, kind: input, shape index: {}]   ;;  %s6634_s13 = inlined_call_operand.hbm [shape: f32[128,128], index: 13, kind: input, shape index: {}]   ;;  %s6635_s14 = inlined_call_operand.vmem [shape: f32[1,128], index: 14, kind: input, shape index: {}]   ;;  %s6636_s15 = inlined_call_operand.hbm [shape: f32[128,128], index: 15, kind: input, shape index: {}]   ;;  %s6637_s16 = inlined_call_operand.vmem [shape: f32[1,128], index: 16, kind: input, shape index: {}]   ;;  %s6638_s17 = inlined_call_operand.vmem [shape: f32[8,128], index: 17, kind: output, shape index: {0}]   ;;  %s6639_s18 = inlined_call_operand.vmem [shape: f32[8,256], index: 18, kind: output, shape index: {1}]   ;;  %s6640_s19 = inlined_call_operand.vmem [shape: f32[8,128], index: 19, kind: output, shape index: {2}]   ;;  %s6641_s20 = inlined_call_operand.vmem [shape: f32[8,128], index: 20, kind: output, shape index: {3}]  }
   0x1   :  { %6648 = sst [smem:[#allocation20_spill]] %s6621_s0 }
   0x2   :  { %6649 = sst [smem:[#allocation21_spill]] %s6622_s1 }
   0x3   :  { %6650 = sst [smem:[#allocation22_spill]] %s6623_s2 }
   0x4   :  { %6651 = sst [smem:[#allocation23_spill]] %s6624_s3 }
   0x5   :  { %6652 = sst [smem:[#allocation24_spill]] %s6625_s4 }
   0x6   :  { %6653 = sst [smem:[#allocation25_spill]] %s6633_s12 }
   0x7   :  { %6654 = sst [smem:[#allocation26_spill]] %s6639_s18 }
   0x8   :  { %26 = vsyncpa [#allocation3], 0 }
   0x9   :  { %27 = vsyncpa [#allocation5], 0 }
   0xa   :  { %28 = vsyncpa [#allocation8], 0 }
   0xb   :  { %29 = vsyncpa [#allocation11], 0 }
   0xc   :  { %30 = vsyncpa [#allocation14], 0  ;;  %s6204_s1 = smov [#allocation4]   ;;  %s6655_s2 = sld [smem:[#allocation23_spill]] }
   0xd   :  { %s52_s22 = sshll.u32 %s6204_s1, 4  ;;  %s53_s22 = int_to_ptr.vmem [resolvable:$true] %s52_s22 }
  0x12   :  { %s6018_s25 = scalar_lea.hbm %s6655_s2, 16384 }
  0x13   :  { %p6019_p0 = scmp.ne.s32.totalorder %s6655_s2, %s6018_s25  ;;  %p6022_p1 = scmp.lt.u32.totalorder %s6018_s25, %s6655_s2 }
  0x15   :  { %p6024_p2 = pnand %p6022_p1, %p6019_p0 }
  0x17   :  { %6027 = shalt.err (!%p6024_p2)
}
  0x18   :  { %s6028_s4 = scalar_lea.vmem %s53_s22, 16384  ;;  %p6033_p4 = scmp.lt.s32.totalorder %s53_s22, %s53_s22 }
  0x19   :  { %p6029_p3 = scmp.ne.s32.totalorder %s53_s22, %s6028_s4  ;;  %p6034_p5 = scmp.lt.s32.totalorder %s6028_s4, %s6028_s4 }
  0x1b   :  { %p6035_p6 = por %p6034_p5, %p6033_p4 }
  0x1d   :  { %p6036_p7 = pnand %p6035_p6, %p6029_p3 }
  0x1f   :  { %6039 = shalt.err (!%p6036_p7)
}
  0x20   :  { %s6646_s29 = smov 128   ;;  %s6206_s30 = smov 8  }
  0x21   :  { %58 = dma.hbm_to_vmem [thread:$0]  %s6655_s2, 16384, %s53_s22, [#allocation5], %s6646_s29, %s6646_s29, %s6206_s30  }
  0x22   :  { %s6207_s1 = smov [#allocation7]   ;;  %s6208_s24 = smov [#allocation10]  }
  0x23   :  { %s80_s23 = sshll.u32 %s6207_s1, 4  ;;  %s108_s25 = sshll.u32 %s6208_s24, 4  ;;  %s81_s23 = int_to_ptr.vmem [resolvable:$true] %s80_s23  ;;  %s109_s25 = int_to_ptr.vmem [resolvable:$true] %s108_s25 }
  0x24   :  { %s6040_s27 = scalar_lea.hbm %s6628_s7, 2048 }
  0x25   :  { %p6041_p8 = scmp.ne.s32.totalorder %s6628_s7, %s6040_s27  ;;  %p6044_p9 = scmp.lt.u32.totalorder %s6040_s27, %s6628_s7 }
  0x27   :  { %p6046_p10 = pnand %p6044_p9, %p6041_p8 }
  0x29   :  { %6049 = shalt.err (!%p6046_p10)
}
  0x2a   :  { %s6050_s22 = scalar_lea.vmem %s81_s23, 2048  ;;  %p6055_p12 = scmp.lt.s32.totalorder %s81_s23, %s81_s23 }
  0x2b   :  { %p6051_p11 = scmp.ne.s32.totalorder %s81_s23, %s6050_s22  ;;  %p6056_p13 = scmp.lt.s32.totalorder %s6050_s22, %s6050_s22 }
  0x2d   :  { %p6057_p0 = por %p6056_p13, %p6055_p12 }
  0x2f   :  { %p6058_p1 = pnand %p6057_p0, %p6051_p11 }
  0x31   :  { %6061 = shalt.err (!%p6058_p1)
}
  0x32   :  { %86 = dma.hbm_to_vmem [thread:$0]  %s6628_s7, 2048, %s81_s23, [#allocation8], %s6646_s29, %s6646_s29, %s6206_s30  }
  0x33   :  { %s6062_s18 = scalar_lea.hbm %s6632_s11, 16384 }
  0x34   :  { %p6063_p2 = scmp.ne.s32.totalorder %s6632_s11, %s6062_s18  ;;  %p6066_p3 = scmp.lt.u32.totalorder %s6062_s18, %s6632_s11 }
  0x36   :  { %p6068_p4 = pnand %p6066_p3, %p6063_p2 }
  0x38   :  { %6071 = shalt.err (!%p6068_p4)
}
  0x39   :  { %s6072_s27 = scalar_lea.vmem %s109_s25, 16384  ;;  %p6077_p6 = scmp.lt.s32.totalorder %s109_s25, %s109_s25 }
  0x3a   :  { %p6073_p5 = scmp.ne.s32.totalorder %s109_s25, %s6072_s27  ;;  %p6078_p7 = scmp.lt.s32.totalorder %s6072_s27, %s6072_s27 }
  0x3c   :  { %p6079_p8 = por %p6078_p7, %p6077_p6 }
  0x3e   :  { %p6080_p9 = pnand %p6079_p8, %p6073_p5 }
  0x40   :  { %6083 = shalt.err (!%p6080_p9)
}
  0x41   :  { %114 = dma.hbm_to_vmem [thread:$0]  %s6632_s11, 16384, %s109_s25, [#allocation11], %s6646_s29, %s6646_s29, %s6206_s30  }
  0x42   :  { %s6209_s28 = smov [#allocation2]   ;;  %s6656_s0 = sld [smem:[#allocation21_spill]] }
  0x43   :  { %s38_s4 = sshll.u32 %s6209_s28, 4  ;;  %s39_s4 = int_to_ptr.vmem [resolvable:$true] %s38_s4 }
  0x48   :  { %s6084_s21 = scalar_lea.hbm %s6656_s0, 16384 }
  0x49   :  { %p6085_p10 = scmp.ne.s32.totalorder %s6656_s0, %s6084_s21  ;;  %p6088_p11 = scmp.lt.u32.totalorder %s6084_s21, %s6656_s0 }
  0x4b   :  { %p6090_p12 = pnand %p6088_p11, %p6085_p10 }
  0x4d   :  { %6093 = shalt.err (!%p6090_p12)
}
  0x4e   :  { %s6094_s3 = scalar_lea.vmem %s39_s4, 16384  ;;  %p6099_p0 = scmp.lt.s32.totalorder %s39_s4, %s39_s4 }
  0x4f   :  { %p6095_p13 = scmp.ne.s32.totalorder %s39_s4, %s6094_s3  ;;  %p6100_p1 = scmp.lt.s32.totalorder %s6094_s3, %s6094_s3 }
  0x51   :  { %p6101_p2 = por %p6100_p1, %p6099_p0 }
  0x53   :  { %p6102_p3 = pnand %p6101_p2, %p6095_p13 }
  0x55   :  { %6105 = shalt.err (!%p6102_p3)
}
  0x56   :  { %s6210_s11 = smov 512   ;;  %s6211_s25 = smov 32  }
  0x57   :  { %44 = dma.hbm_to_vmem [thread:$0]  %s6656_s0, 16384, %s39_s4, [#allocation3], %s6210_s11, %s6210_s11, %s6211_s25  }
  0x58   :  { %s6212_s7 = smov [#allocation6]   ;;  %s6106_s2 = scalar_lea.hbm %s6626_s5, 2048 }
  0x59   :  { %s66_s23 = sshll.u32 %s6212_s7, 4  ;;  %p6107_p4 = scmp.ne.s32.totalorder %s6626_s5, %s6106_s2  ;;  %s67_s23 = int_to_ptr.vmem [resolvable:$true] %s66_s23 }
  0x5a   :  { %p6110_p5 = scmp.lt.u32.totalorder %s6106_s2, %s6626_s5 }
  0x5c   :  { %p6112_p6 = pnand %p6110_p5, %p6107_p4 }
  0x5e   :  { %6115 = shalt.err (!%p6112_p6)
}
  0x5f   :  { %s6116_s24 = scalar_lea.vmem %s67_s23, 2048  ;;  %p6121_p8 = scmp.lt.s32.totalorder %s67_s23, %s67_s23 }
  0x60   :  { %p6117_p7 = scmp.ne.s32.totalorder %s67_s23, %s6116_s24  ;;  %p6122_p9 = scmp.lt.s32.totalorder %s6116_s24, %s6116_s24 }
  0x62   :  { %p6123_p10 = por %p6122_p9, %p6121_p8 }
  0x64   :  { %p6124_p11 = pnand %p6123_p10, %p6117_p7 }
  0x66   :  { %6127 = shalt.err (!%p6124_p11)
}
  0x67   :  { %s6213_s4 = smov 64   ;;  %s6214_s0 = smov 4  }
  0x68   :  { %72 = dma.hbm_to_vmem [thread:$0]  %s6626_s5, 2048, %s67_s23, [#allocation5], %s6213_s4, %s6213_s4, %s6214_s0  }
  0x69   :  { %s6215_s27 = smov [#allocation9]   ;;  %s6216_s28 = smov [#allocation12]  }
  0x6a   :  { %s94_s7 = sshll.u32 %s6215_s27, 4  ;;  %s122_s22 = sshll.u32 %s6216_s28, 4  ;;  %s95_s7 = int_to_ptr.vmem [resolvable:$true] %s94_s7  ;;  %s123_s22 = int_to_ptr.vmem [resolvable:$true] %s122_s22 }
  0x6b   :  { %s6128_s12 = scalar_lea.hbm %s6630_s9, 16384 }
  0x6c   :  { %p6129_p12 = scmp.ne.s32.totalorder %s6630_s9, %s6128_s12  ;;  %p6132_p13 = scmp.lt.u32.totalorder %s6128_s12, %s6630_s9 }
  0x6e   :  { %p6134_p0 = pnand %p6132_p13, %p6129_p12 }
  0x70   :  { %6137 = shalt.err (!%p6134_p0)
}
  0x71   :  { %s6138_s5 = scalar_lea.vmem %s95_s7, 16384  ;;  %p6143_p2 = scmp.lt.s32.totalorder %s95_s7, %s95_s7 }
  0x72   :  { %p6139_p1 = scmp.ne.s32.totalorder %s95_s7, %s6138_s5  ;;  %p6144_p3 = scmp.lt.s32.totalorder %s6138_s5, %s6138_s5 }
  0x74   :  { %p6145_p4 = por %p6144_p3, %p6143_p2 }
  0x76   :  { %p6146_p5 = pnand %p6145_p4, %p6139_p1 }
  0x78   :  { %6149 = shalt.err (!%p6146_p5)
}
  0x79   :  { %100 = dma.hbm_to_vmem [thread:$0]  %s6630_s9, 16384, %s95_s7, [#allocation8], %s6210_s11, %s6210_s11, %s6211_s25  }
  0x7a   :  { %s6150_s3 = scalar_lea.hbm %s6634_s13, 2048 }
  0x7b   :  { %p6151_p6 = scmp.ne.s32.totalorder %s6634_s13, %s6150_s3  ;;  %p6154_p7 = scmp.lt.u32.totalorder %s6150_s3, %s6634_s13 }
  0x7d   :  { %p6156_p8 = pnand %p6154_p7, %p6151_p6 }
  0x7f   :  { %6159 = shalt.err (!%p6156_p8)
}
  0x80   :  { %s6160_s21 = scalar_lea.vmem %s123_s22, 2048  ;;  %p6165_p10 = scmp.lt.s32.totalorder %s123_s22, %s123_s22 }
  0x81   :  { %p6161_p9 = scmp.ne.s32.totalorder %s123_s22, %s6160_s21  ;;  %p6166_p11 = scmp.lt.s32.totalorder %s6160_s21, %s6160_s21 }
  0x83   :  { %p6167_p12 = por %p6166_p11, %p6165_p10 }
  0x85   :  { %p6168_p13 = pnand %p6167_p12, %p6161_p9 }
  0x87   :  { %6171 = shalt.err (!%p6168_p13)
}
  0x88   :  { %s6657_s9 = smov 128   ;;  %s6217_s7 = smov [#allocation13]  }
  0x89   :  { %128 = dma.hbm_to_vmem [thread:$0]  %s6634_s13, 2048, %s123_s22, [#allocation11], %s6657_s9, %s6657_s9, %s6206_s30  }
  0x8a   :  { %s136_s12 = sshll.u32 %s6217_s7, 4  ;;  %s6172_s24 = scalar_lea.hbm %s6636_s15, 2048  ;;  %s137_s12 = int_to_ptr.vmem [resolvable:$true] %s136_s12 }
  0x8b   :  { %p6173_p0 = scmp.ne.s32.totalorder %s6636_s15, %s6172_s24  ;;  %p6176_p1 = scmp.lt.u32.totalorder %s6172_s24, %s6636_s15 }
  0x8d   :  { %p6178_p2 = pnand %p6176_p1, %p6173_p0 }
  0x8f   :  { %6181 = shalt.err (!%p6178_p2)
}
  0x90   :  { %s6182_s29 = scalar_lea.vmem %s137_s12, 2048  ;;  %p6187_p4 = scmp.lt.s32.totalorder %s137_s12, %s137_s12 }
  0x91   :  { %p6183_p3 = scmp.ne.s32.totalorder %s137_s12, %s6182_s29  ;;  %p6188_p5 = scmp.lt.s32.totalorder %s6182_s29, %s6182_s29 }
  0x93   :  { %p6189_p6 = por %p6188_p5, %p6187_p4 }
  0x95   :  { %p6190_p7 = pnand %p6189_p6, %p6183_p3 }
  0x97   :  { %6193 = shalt.err (!%p6190_p7)
}
  0x98   :  { %142 = dma.hbm_to_vmem [thread:$0]  %s6636_s15, 2048, %s137_s12, [#allocation14], %s6657_s9, %s6657_s9, %s6206_s30  }
  0x99   :  { %6194 = dma.done.wait [#allocation3], 16384  }
  0x9a   :  { %6195 = vsyncadd [#allocation3], 4294950912 }
  0x9b   :  { %6196 = dma.done.wait [#allocation5], 18432  }
  0x9c   :  { %6197 = vsyncadd [#allocation5], 4294948864 }
  0x9d   :  { %6198 = dma.done.wait [#allocation8], 18432  }
  0x9e   :  { %6199 = vsyncadd [#allocation8], 4294948864 }
  0x9f   :  { %6200 = dma.done.wait [#allocation11], 18432  }
  0xa0   :  { %6201 = vsyncadd [#allocation11], 4294948864 }
  0xa1   :  { %6202 = dma.done.wait [#allocation14], 2048  }
  0xa2   :  { %6203 = vsyncadd [#allocation14], 4294965248  ;;  %v174_v0 = vld [vmem:[#allocation2] sm:$0xff]  ;;  %s6658_s3 = sld [smem:[#allocation20_spill]]  ;;  %s6659_s21 = sld [smem:[#allocation22_spill]]  ;;  %vm6220_vm0 = vmmov 0  }
  0xa3   :  { %v178_v1 = vld [vmem:[#allocation2 + $0x20] sm:$0xff]  ;;  %s6660_s25 = sld [smem:[#allocation24_spill]]  ;;  %s6661_s15 = sld [smem:[#allocation25_spill]] }
  0xa4   :  { %v182_v2 = vld [vmem:[#allocation2 + $0x40] sm:$0xff]  ;;  %v4713_v3 = vcombine.high %v174_v0, %v178_v1  ;;  %v4712_v4 = vcombine.low %v174_v0, %v178_v1  ;;  %v175_v0 = vld [vmem:[#allocation2 + $0x8] sm:$0xff]  ;;  %s6662_s30 = sld [smem:[#allocation26_spill]] }
  0xa5   :  { %v186_v5 = vld [vmem:[#allocation2 + $0x60] sm:$0xff]  ;;  %v179_v1 = vld [vmem:[#allocation2 + $0x28] sm:$0xff] }
  0xa6   :  { %v4721_v6 = vcombine.high %v182_v2, %v186_v5  ;;  %v190_v7 = vld [vmem:[#allocation2 + $0x80] sm:$0xff]  ;;  %984 = vmatprep.subr.bf16.mxu0 %v4713_v3  ;;  %v4720_v9 = vcombine.low %v182_v2, %v186_v5  ;;  %v183_v5 = vld [vmem:[#allocation2 + $0x48] sm:$0xff] }
  0xa7   :  { %v194_v8 = vld [vmem:[#allocation2 + $0xa0] sm:$0xff]  ;;  %985 = vmatpush1.bf16.msra.mxu0 %v4712_v4 }
  0xa8   :  { %986 = vmatprep.subr.bf16.mxu0 %v4721_v6  ;;  %v4729_v10 = vcombine.high %v190_v7, %v194_v8  ;;  %v198_v11 = vld [vmem:[#allocation2 + $0xc0] sm:$0xff]  ;;  %v4728_v13 = vcombine.low %v190_v7, %v194_v8  ;;  %v171_v17 = vld [vmem:[%s6658_s3 + $0x8] sm:$0xff]  ;;  %v177_v7 = vld [vmem:[#allocation2 + $0x18] sm:$0xff]  ;;  %v4715_v8 = vcombine.high %v175_v0, %v179_v1 }
  0xa9   :  { %v202_v12 = vld [vmem:[#allocation2 + $0xe0] sm:$0xff]  ;;  %v6447_v18 = vpack.c.bf16 %v171_v17, %v171_v17  ;;  %v187_v6 = vld [vmem:[#allocation2 + $0x68] sm:$0xff]  ;;  %v189_v17 = vld [vmem:[#allocation2 + $0x78] sm:$0xff] }
  0xaa   :  { %v4737_v14 = vcombine.high %v198_v11, %v202_v12  ;;  %v206_v15 = vld [vmem:[#allocation2 + $0x100] sm:$0xff]  ;;  %v4736_v19 = vcombine.low %v198_v11, %v202_v12 }
  0xab   :  { %987 = vmatpush1.bf16.msra.mxu0 %v4720_v9  ;;  %v210_v16 = vld [vmem:[#allocation2 + $0x120] sm:$0xff]  ;;  %1016 = vmatprep.mubr.bf16.mxu0 %v6447_v18  ;;  %v181_v9 = vld [vmem:[#allocation2 + $0x38] sm:$0xff] }
  0xac   :  { %988 = vmatprep.subr.bf16.mxu0 %v4729_v10  ;;  %v4745_v20 = vcombine.high %v206_v15, %v210_v16  ;;  %v214_v21 = vld [vmem:[#allocation2 + $0x140] sm:$0xff]  ;;  %1139 = vmatprep.mubr.bf16.mxu1 %v6447_v18  ;;  %v4744_v23 = vcombine.low %v206_v15, %v210_v16  ;;  %v4719_v10 = vcombine.high %v177_v7, %v181_v9  ;;  %v195_v15 = vld [vmem:[#allocation2 + $0xa8] sm:$0xff]  ;;  %v185_v16 = vld [vmem:[#allocation2 + $0x58] sm:$0xff] }
  0xad   :  { %v218_v22 = vld [vmem:[#allocation2 + $0x160] sm:$0xff]  ;;  %v4718_v11 = vcombine.low %v177_v7, %v181_v9  ;;  %v253_v9 = vld [vmem:[#allocation2 + $0x278] sm:$0xff] }
  0xae   :  { %v4753_v24 = vcombine.high %v214_v21, %v218_v22  ;;  %v222_v25 = vld [vmem:[#allocation2 + $0x180] sm:$0xff]  ;;  %v4752_v27 = vcombine.low %v214_v21, %v218_v22  ;;  %1107 = vmatprep.subr.bf16.mxu1 %v4719_v10  ;;  %v4726_v21 = vcombine.low %v185_v16, %v189_v17  ;;  %v193_v22 = vld [vmem:[#allocation2 + $0x98] sm:$0xff] }
  0xaf   :  { %989 = vmatpush1.bf16.msra.mxu0 %v4728_v13  ;;  %v226_v26 = vld [vmem:[#allocation2 + $0x1a0] sm:$0xff]  ;;  %v4714_v13 = vcombine.low %v175_v0, %v179_v1  ;;  %1108 = vmatpush1.bf16.msra.mxu1 %v4718_v11  ;;  %v241_v0 = vld [vmem:[#allocation2 + $0x218] sm:$0xff] }
  0xb0   :  { %990 = vmatprep.subr.bf16.mxu0 %v4737_v14  ;;  %v4761_v28 = vcombine.high %v222_v25, %v226_v26  ;;  %v230_v29 = vld [vmem:[#allocation2 + $0x1c0] sm:$0xff]  ;;  %v4760_v31 = vcombine.low %v222_v25, %v226_v26  ;;  %v191_v14 = vld [vmem:[#allocation2 + $0x88] sm:$0xff]  ;;  %v4722_v25 = vcombine.low %v183_v5, %v187_v6  ;;  %v245_v1 = vld [vmem:[#allocation2 + $0x238] sm:$0xff] }
  0xb1   :  { %v234_v30 = vld [vmem:[#allocation2 + $0x1e0] sm:$0xff]  ;;  %v4783_v10 = vcombine.high %v241_v0, %v245_v1 }
  0xb2   :  { %v4769_v32 = vcombine.high %v230_v29, %v234_v30  ;;  %v238_v33 = vld [vmem:[#allocation2 + $0x200] sm:$0xff]  ;;  %v4768_v35 = vcombine.low %v230_v29, %v234_v30  ;;  %v199_v30 = vld [vmem:[#allocation2 + $0xc8] sm:$0xff] }
  0xb3   :  { %991 = vmatpush1.bf16.msra.mxu0 %v4736_v19  ;;  %v242_v34 = vld [vmem:[#allocation2 + $0x220] sm:$0xff]  ;;  %v4723_v19 = vcombine.high %v183_v5, %v187_v6  ;;  %v243_v5 = vld [vmem:[#allocation2 + $0x228] sm:$0xff] }
  0xb4   :  { %992 = vmatprep.subr.bf16.mxu0 %v4745_v20  ;;  %v246_v36 = vld [vmem:[#allocation2 + $0x240] sm:$0xff]  ;;  %v4777_v38 = vcombine.high %v238_v33, %v242_v34  ;;  %v4776_v39 = vcombine.low %v238_v33, %v242_v34  ;;  %v4727_v20 = vcombine.high %v185_v16, %v189_v17  ;;  %v209_v33 = vld [vmem:[#allocation2 + $0x118] sm:$0xff]  ;;  %v4782_v16 = vcombine.low %v241_v0, %v245_v1 }
  0xb5   :  { %v250_v37 = vld [vmem:[#allocation2 + $0x260] sm:$0xff]  ;;  %v213_v34 = vld [vmem:[#allocation2 + $0x138] sm:$0xff] }
  0xb6   :  { %v254_v40 = vld [vmem:[#allocation2 + $0x280] sm:$0xff]  ;;  %v4785_v42 = vcombine.high %v246_v36, %v250_v37  ;;  %v4784_v43 = vcombine.low %v246_v36, %v250_v37  ;;  %1109 = vmatprep.subr.bf16.mxu1 %v4727_v20  ;;  %v257_v17 = vld [vmem:[#allocation2 + $0x298] sm:$0xff] }
  0xb7   :  { %993 = vmatpush1.bf16.msra.mxu0 %v4744_v23  ;;  %v258_v41 = vld [vmem:[#allocation2 + $0x2a0] sm:$0xff]  ;;  %v197_v23 = vld [vmem:[#allocation2 + $0xb8] sm:$0xff]  ;;  %1110 = vmatpush1.bf16.msra.mxu1 %v4726_v21 }
  0xb8   :  { %994 = vmatprep.subr.bf16.mxu0 %v4753_v24  ;;  %v262_v44 = vld [vmem:[#allocation2 + $0x2c0] sm:$0xff]  ;;  %v4793_v46 = vcombine.high %v254_v40, %v258_v41  ;;  %v4792_v47 = vcombine.low %v254_v40, %v258_v41  ;;  %v201_v24 = vld [vmem:[#allocation2 + $0xd8] sm:$0xff]  ;;  %v4735_v26 = vcombine.high %v193_v22, %v197_v23  ;;  %v4734_v29 = vcombine.low %v193_v22, %v197_v23  ;;  %v255_v22 = vld [vmem:[#allocation2 + $0x288] sm:$0xff] }
  0xb9   :  { %v266_v45 = vld [vmem:[#allocation2 + $0x2e0] sm:$0xff]  ;;  %v4751_v40 = vcombine.high %v209_v33, %v213_v34  ;;  %v217_v41 = vld [vmem:[#allocation2 + $0x158] sm:$0xff]  ;;  %v259_v23 = vld [vmem:[#allocation2 + $0x2a8] sm:$0xff] }
  0xba   :  { %v270_v48 = vld [vmem:[#allocation2 + $0x300] sm:$0xff]  ;;  %v4801_v50 = vcombine.high %v262_v44, %v266_v45  ;;  %v4800_v51 = vcombine.low %v262_v44, %v266_v45  ;;  %1111 = vmatprep.subr.bf16.mxu1 %v4735_v26  ;;  %v215_v45 = vld [vmem:[#allocation2 + $0x148] sm:$0xff]  ;;  %v265_v26 = vld [vmem:[#allocation2 + $0x2d8] sm:$0xff] }
  0xbb   :  { %995 = vmatpush1.bf16.msra.mxu0 %v4752_v27  ;;  %v274_v49 = vld [vmem:[#allocation2 + $0x320] sm:$0xff]  ;;  %v205_v27 = vld [vmem:[#allocation2 + $0xf8] sm:$0xff]  ;;  %1112 = vmatpush1.bf16.msra.mxu1 %v4734_v29 }
  0xbc   :  { %996 = vmatprep.subr.bf16.mxu0 %v4761_v28  ;;  %v278_v52 = vld [vmem:[#allocation2 + $0x340] sm:$0xff]  ;;  %v4809_v54 = vcombine.high %v270_v48, %v274_v49  ;;  %v4808_v55 = vcombine.low %v270_v48, %v274_v49  ;;  %v4731_v28 = vcombine.high %v191_v14, %v195_v15  ;;  %v4742_v37 = vcombine.low %v201_v24, %v205_v27  ;;  %v225_v49 = vld [vmem:[#allocation2 + $0x198] sm:$0xff] }
  0xbd   :  { %v282_v53 = vld [vmem:[#allocation2 + $0x360] sm:$0xff] }
  0xbe   :  { %v286_v56 = vld [vmem:[#allocation2 + $0x380] sm:$0xff]  ;;  %v4817_v58 = vcombine.high %v278_v52, %v282_v53  ;;  %v4816_v59 = vcombine.low %v278_v52, %v282_v53  ;;  %v223_v52 = vld [vmem:[#allocation2 + $0x188] sm:$0xff] }
  0xbf   :  { %997 = vmatpush1.bf16.msra.mxu0 %v4760_v31  ;;  %v290_v57 = vld [vmem:[#allocation2 + $0x3a0] sm:$0xff]  ;;  %v203_v31 = vld [vmem:[#allocation2 + $0xe8] sm:$0xff] }
  0xc0   :  { %998 = vmatprep.subr.bf16.mxu0 %v4769_v32  ;;  %v294_v60 = vld [vmem:[#allocation2 + $0x3c0] sm:$0xff]  ;;  %v4825_v62 = vcombine.high %v286_v56, %v290_v57  ;;  %v4824_v63 = vcombine.low %v286_v56, %v290_v57  ;;  %v4743_v32 = vcombine.high %v201_v24, %v205_v27  ;;  %v4739_v36 = vcombine.high %v199_v30, %v203_v31  ;;  %v227_v53 = vld [vmem:[#allocation2 + $0x1a8] sm:$0xff]  ;;  %v233_v56 = vld [vmem:[#allocation2 + $0x1d8] sm:$0xff] }
  0xc1   :  { %v298_v61 = vld [vmem:[#allocation2 + $0x3e0] sm:$0xff]  ;;  %v237_v57 = vld [vmem:[#allocation2 + $0x1f8] sm:$0xff] }
  0xc2   :  { %v4833_v2 = vcombine.high %v294_v60, %v298_v61  ;;  %v170_v3 = vld [vmem:[%s6658_s3] sm:$0xff]  ;;  %v4832_v4 = vcombine.low %v294_v60, %v298_v61  ;;  %1113 = vmatprep.subr.bf16.mxu1 %v4743_v32  ;;  %v231_v60 = vld [vmem:[#allocation2 + $0x1c8] sm:$0xff]  ;;  %v4774_v7 = vcombine.low %v233_v56, %v237_v57  ;;  %v269_v27 = vld [vmem:[#allocation2 + $0x2f8] sm:$0xff]  ;;  %v4795_v32 = vcombine.high %v255_v22, %v259_v23 }
  0xc3   :  { %999 = vmatpush1.bf16.msra.mxu0 %v4768_v35  ;;  %v6454_v12 = vpack.c.bf16 %v170_v3, %v170_v3  ;;  %v4730_v35 = vcombine.low %v191_v14, %v195_v15  ;;  %1114 = vmatpush1.bf16.msra.mxu1 %v4742_v37  ;;  %v235_v61 = vld [vmem:[#allocation2 + $0x1e8] sm:$0xff]  ;;  %v4762_v3 = vcombine.low %v223_v52, %v227_v53 }
  0xc4   :  { %1000 = vmatprep.subr.bf16.mxu0 %v4777_v38  ;;  %v207_v38 = vld [vmem:[#allocation2 + $0x108] sm:$0xff]  ;;  %1115 = vmatprep.subr.bf16.mxu1 %v4751_v40  ;;  %v4771_v6 = vcombine.high %v231_v60, %v235_v61  ;;  %v4770_v11 = vcombine.low %v231_v60, %v235_v61  ;;  %v4794_v37 = vcombine.low %v255_v22, %v259_v23  ;;  %v208_v23 = vld [vmem:[#allocation2 + $0x110] sm:$0xff] }
  0xc5   :  { %v251_v14 = vld [vmem:[#allocation2 + $0x268] sm:$0xff] }
  0xc7   :  { %1001 = vmatpush1.bf16.msra.mxu0 %v4776_v39  ;;  %v211_v39 = vld [vmem:[#allocation2 + $0x128] sm:$0xff] }
  0xc8   :  { %1002 = vmatprep.subr.bf16.mxu0 %v4785_v42  ;;  %v221_v42 = vld [vmem:[#allocation2 + $0x178] sm:$0xff]  ;;  %v4747_v44 = vcombine.high %v207_v38, %v211_v39 }
  0xc9   :  { %v4759_v48 = vcombine.high %v217_v41, %v221_v42 }
  0xcb   :  { %1003 = vmatpush1.bf16.msra.mxu0 %v4784_v43  ;;  %v4738_v43 = vcombine.low %v199_v30, %v203_v31  ;;  %v263_v30 = vld [vmem:[#allocation2 + $0x2c8] sm:$0xff] }
  0xcc   :  { %1004 = vmatprep.subr.bf16.mxu0 %v4793_v46  ;;  %v4750_v46 = vcombine.low %v209_v33, %v213_v34  ;;  %v267_v31 = vld [vmem:[#allocation2 + $0x2e8] sm:$0xff]  ;;  %v273_v34 = vld [vmem:[#allocation2 + $0x318] sm:$0xff] }
  0xcd   :  { %v4803_v40 = vcombine.high %v263_v30, %v267_v31 }
  0xce   :  { %1116 = vmatpush1.bf16.msra.mxu1 %v4750_v46  ;;  %v279_v46 = vld [vmem:[#allocation2 + $0x348] sm:$0xff] }
  0xcf   :  { %1005 = vmatpush1.bf16.msra.mxu0 %v4792_v47  ;;  %v219_v47 = vld [vmem:[#allocation2 + $0x168] sm:$0xff]  ;;  %1117 = vmatprep.subr.bf16.mxu1 %v4759_v48 }
  0xd0   :  { %1006 = vmatprep.subr.bf16.mxu0 %v4801_v50  ;;  %v229_v50 = vld [vmem:[#allocation2 + $0x1b8] sm:$0xff] }
  0xd3   :  { %1007 = vmatpush1.bf16.msra.mxu0 %v4800_v51  ;;  %v4746_v51 = vcombine.low %v207_v38, %v211_v39  ;;  %v271_v38 = vld [vmem:[#allocation2 + $0x308] sm:$0xff] }
  0xd4   :  { %1008 = vmatprep.subr.bf16.mxu0 %v4809_v54  ;;  %v4755_v54 = vcombine.high %v215_v45, %v219_v47  ;;  %v275_v39 = vld [vmem:[#allocation2 + $0x328] sm:$0xff] }
  0xd5   :  { %v4811_v48 = vcombine.high %v271_v38, %v275_v39 }
  0xd7   :  { %1009 = vmatpush1.bf16.msra.mxu0 %v4808_v55  ;;  %v4758_v55 = vcombine.low %v217_v41, %v221_v42  ;;  %v4806_v41 = vcombine.low %v265_v26, %v269_v27  ;;  %v281_v42 = vld [vmem:[#allocation2 + $0x358] sm:$0xff] }
  0xd8   :  { %1010 = vmatprep.subr.bf16.mxu0 %v4817_v58  ;;  %v4767_v58 = vcombine.high %v225_v49, %v229_v50 }
  0xd9   :  { %1118 = vmatpush1.bf16.msra.mxu1 %v4758_v55  ;;  %v291_v55 = vld [vmem:[#allocation2 + $0x3a8] sm:$0xff] }
  0xda   :  { %1119 = vmatprep.subr.bf16.mxu1 %v4767_v58  ;;  %v297_v58 = vld [vmem:[#allocation2 + $0x3d8] sm:$0xff] }
  0xdb   :  { %1011 = vmatpush1.bf16.msra.mxu0 %v4816_v59  ;;  %v4754_v59 = vcombine.low %v215_v45, %v219_v47  ;;  %v4802_v45 = vcombine.low %v263_v30, %v267_v31  ;;  %v283_v47 = vld [vmem:[#allocation2 + $0x368] sm:$0xff]  ;;  %v224_v31 = vld [vmem:[#allocation2 + $0x190] sm:$0xff] }
  0xdc   :  { %1012 = vmatprep.subr.bf16.mxu0 %v4825_v62  ;;  %v4763_v62 = vcombine.high %v223_v52, %v227_v53  ;;  %v4810_v53 = vcombine.low %v271_v38, %v275_v39  ;;  %v4818_v61 = vcombine.low %v279_v46, %v283_v47  ;;  %v240_v39 = vld [vmem:[#allocation2 + $0x210] sm:$0xff] }
  0xdf   :  { %1013 = vmatpush1.bf16.msra.mxu0 %v4824_v63  ;;  %v4766_v63 = vcombine.low %v225_v49, %v229_v50  ;;  %v289_v50 = vld [vmem:[#allocation2 + $0x398] sm:$0xff] }
  0xe0   :  { %1014 = vmatprep.subr.bf16.mxu0 %v4833_v2  ;;  %v4775_v2 = vcombine.high %v233_v56, %v237_v57  ;;  %v4819_v56 = vcombine.high %v279_v46, %v283_v47  ;;  %v256_v47 = vld [vmem:[#allocation2 + $0x290] sm:$0xff] }
  0xe1   :  { %1120 = vmatpush1.bf16.msra.mxu1 %v4766_v63  ;;  %v299_v63 = vld [vmem:[#allocation2 + $0x3e8] sm:$0xff] }
  0xe2   :  { %1121 = vmatprep.subr.bf16.mxu1 %v4775_v2 }
  0xe3   :  { %1015 = vmatpush1.bf16.msra.mxu0 %v4832_v4  ;;  %v239_v4 = vld [vmem:[#allocation2 + $0x208] sm:$0xff] }
  0xe4   :  { %1025 = vmatprep.subr.bf16.mxu0 %v4715_v8  ;;  %v249_v8 = vld [vmem:[#allocation2 + $0x258] sm:$0xff]  ;;  %v4779_v15 = vcombine.high %v239_v4, %v243_v5  ;;  %v4778_v21 = vcombine.low %v239_v4, %v243_v5  ;;  %v176_v4 = vld [vmem:[#allocation2 + $0x10] sm:$0xff] }
  0xe5   :  { %1122 = vmatpush1.bf16.msra.mxu1 %v4774_v7  ;;  %v4791_v20 = vcombine.high %v249_v8, %v253_v9  ;;  %v180_v5 = vld [vmem:[#allocation2 + $0x30] sm:$0xff] }
  0xe6   :  { %1017 = vmatmul.mubr.bf16.vlgmr.msra.gmra.mrb[0].mxu0 %v6454_v12  ;;  %1123 = vmatprep.subr.bf16.mxu1 %v4783_v10  ;;  %v188_v10 = vld [vmem:[#allocation2 + $0x70] sm:$0xff] }
  0xe7   :  { %1026 = vmatpush1.bf16.msra.mxu0 %v4714_v13  ;;  %1057 = vmatprep.mubr.bf16.mxu0 %v6447_v18  ;;  %v247_v13 = vld [vmem:[#allocation2 + $0x248] sm:$0xff] }
  0xe8   :  { %1027 = vmatprep.subr.bf16.mxu0 %v4723_v19  ;;  %v261_v19 = vld [vmem:[#allocation2 + $0x2b8] sm:$0xff]  ;;  %v4787_v24 = vcombine.high %v247_v13, %v251_v14  ;;  %v4786_v29 = vcombine.low %v247_v13, %v251_v14  ;;  %v4716_v13 = vcombine.low %v176_v4, %v180_v5  ;;  %v192_v14 = vld [vmem:[#allocation2 + $0x90] sm:$0xff] }
  0xe9   :  { %1124 = vmatpush1.bf16.msra.mxu1 %v4782_v16  ;;  %v4798_v33 = vcombine.low %v257_v17, %v261_v19 }
  0xea   :  { %1125 = vmatprep.subr.bf16.mxu1 %v4791_v20  ;;  %v204_v20 = vld [vmem:[#allocation2 + $0xf0] sm:$0xff] }
  0xeb   :  { %1028 = vmatpush1.bf16.msra.mxu0 %v4722_v25  ;;  %v4790_v25 = vcombine.low %v249_v8, %v253_v9  ;;  %v184_v9 = vld [vmem:[#allocation2 + $0x50] sm:$0xff] }
  0xec   :  { %1029 = vmatprep.subr.bf16.mxu0 %v4731_v28  ;;  %v4799_v28 = vcombine.high %v257_v17, %v261_v19  ;;  %v4725_v16 = vcombine.high %v184_v9, %v188_v10  ;;  %v4724_v17 = vcombine.low %v184_v9, %v188_v10  ;;  %v200_v19 = vld [vmem:[#allocation2 + $0xd0] sm:$0xff]  ;;  %v5502_v9 = vld [vmem:[#allocation4] ss:$8 sps:$4 sm:$0xff]  }
  0xed   :  { %1126 = vmatpush1.bf16.msra.mxu1 %v4790_v25  ;;  %v4741_v25 = vcombine.high %v200_v19, %v204_v20  ;;  %v5507_v10 = vld [vmem:[#allocation4 + $0x14] ss:$8 sps:$4 sm:$0xff]  }
  0xee   :  { %1127 = vmatprep.subr.bf16.mxu1 %v4799_v28  ;;  %v220_v28 = vld [vmem:[#allocation2 + $0x170] sm:$0xff] }
  0xef   :  { %1030 = vmatpush1.bf16.msra.mxu0 %v4730_v35  ;;  %v277_v35 = vld [vmem:[#allocation2 + $0x338] sm:$0xff] }
  0xf0   :  { %1031 = vmatprep.subr.bf16.mxu0 %v4739_v36  ;;  %v4807_v36 = vcombine.high %v265_v26, %v269_v27  ;;  %v4814_v49 = vcombine.low %v273_v34, %v277_v35  ;;  %v4740_v26 = vcombine.low %v200_v19, %v204_v20  ;;  %v216_v27 = vld [vmem:[#allocation2 + $0x150] sm:$0xff]  ;;  %v5514_v19 = vld [vmem:[#allocation4 + $0x40] ss:$8 sps:$4 sm:$0xff]  }
  0xf1   :  { %1128 = vmatpush1.bf16.msra.mxu1 %v4798_v33  ;;  %v4756_v33 = vcombine.low %v216_v27, %v220_v28  ;;  %v5519_v20 = vld [vmem:[#allocation4 + $0x54] ss:$8 sps:$4 sm:$0xff]  }
  0xf2   :  { %1129 = vmatprep.subr.bf16.mxu1 %v4807_v36  ;;  %v236_v36 = vld [vmem:[#allocation2 + $0x1f0] sm:$0xff] }
  0xf3   :  { %1032 = vmatpush1.bf16.msra.mxu0 %v4738_v43  ;;  %v285_v43 = vld [vmem:[#allocation2 + $0x378] sm:$0xff] }
  0xf4   :  { %1033 = vmatprep.subr.bf16.mxu0 %v4747_v44  ;;  %v4815_v44 = vcombine.high %v273_v34, %v277_v35  ;;  %v4823_v52 = vcombine.high %v281_v42, %v285_v43  ;;  %v4822_v57 = vcombine.low %v281_v42, %v285_v43  ;;  %v232_v34 = vld [vmem:[#allocation2 + $0x1d0] sm:$0xff] }
  0xf5   :  { %1130 = vmatpush1.bf16.msra.mxu1 %v4806_v41  ;;  %v4773_v38 = vcombine.high %v232_v34, %v236_v36  ;;  %v4772_v41 = vcombine.low %v232_v34, %v236_v36  ;;  %v248_v43 = vld [vmem:[#allocation2 + $0x250] sm:$0xff]  ;;  %v5546_v36 = vld [vmem:[#allocation4 + $0xe4] ss:$8 sps:$4 sm:$0xff]  }
  0xf6   :  { %1131 = vmatprep.subr.bf16.mxu1 %v4815_v44  ;;  %v252_v44 = vld [vmem:[#allocation2 + $0x270] sm:$0xff] }
  0xf7   :  { %1034 = vmatpush1.bf16.msra.mxu0 %v4746_v51  ;;  %v293_v51 = vld [vmem:[#allocation2 + $0x3b8] sm:$0xff]  ;;  %v4789_v46 = vcombine.high %v248_v43, %v252_v44 }
  0xf8   :  { %1035 = vmatprep.subr.bf16.mxu0 %v4755_v54  ;;  %v287_v54 = vld [vmem:[#allocation2 + $0x388] sm:$0xff]  ;;  %v4831_v60 = vcombine.high %v289_v50, %v293_v51  ;;  %v4830_v1 = vcombine.low %v289_v50, %v293_v51  ;;  %v264_v51 = vld [vmem:[#allocation2 + $0x2d0] sm:$0xff] }
  0xf9   :  { %1132 = vmatpush1.bf16.msra.mxu1 %v4814_v49  ;;  %v4827_v0 = vcombine.high %v287_v54, %v291_v55  ;;  %v4788_v49 = vcombine.low %v248_v43, %v252_v44  ;;  %v5543_v34 = vld [vmem:[#allocation4 + $0xd4] ss:$8 sps:$4 sm:$0xff]   ;;  %v6470_v44 = vld [vmem:[%s6659_s21] sm:$0xff] }
  0xfa   :  { %1133 = vmatprep.subr.bf16.mxu1 %v4823_v52  ;;  %v268_v52 = vld [vmem:[#allocation2 + $0x2f0] sm:$0xff] }
  0xfb   :  { %1036 = vmatpush1.bf16.msra.mxu0 %v4754_v59  ;;  %v301_v59 = vld [vmem:[#allocation2 + $0x3f8] sm:$0xff] }
  0xfc   :  { %1037 = vmatprep.subr.bf16.mxu0 %v4763_v62  ;;  %v295_v62 = vld [vmem:[#allocation2 + $0x3c8] sm:$0xff]  ;;  %v4839_v2 = vcombine.high %v297_v58, %v301_v59  ;;  %v4838_v7 = vcombine.low %v297_v58, %v301_v59  ;;  %v280_v59 = vld [vmem:[#allocation2 + $0x350] sm:$0xff] }
  0xfd   :  { %1134 = vmatpush1.bf16.msra.mxu1 %v4822_v57  ;;  %v4834_v8 = vcombine.low %v295_v62, %v299_v63  ;;  %v4804_v57 = vcombine.low %v264_v51, %v268_v52 }
  0xfe   :  { %1135 = vmatprep.subr.bf16.mxu1 %v4831_v60  ;;  %v284_v60 = vld [vmem:[#allocation2 + $0x370] sm:$0xff] }
  0xff   :  { %1038 = vmatpush1.bf16.msra.mxu0 %v4762_v3  ;;  %v4826_v3 = vcombine.low %v287_v54, %v291_v55  ;;  %v4805_v54 = vcombine.high %v264_v51, %v268_v52  ;;  %v272_v55 = vld [vmem:[#allocation2 + $0x310] sm:$0xff] }
 0x100   :  { %1039 = vmatprep.subr.bf16.mxu0 %v4771_v6  ;;  %v4835_v6 = vcombine.high %v295_v62, %v299_v63  ;;  %v4821_v62 = vcombine.high %v280_v59, %v284_v60  ;;  %v288_v63 = vld [vmem:[#allocation2 + $0x390] sm:$0xff] }
 0x101   :  { %1136 = vmatpush1.bf16.msra.mxu1 %v4830_v1  ;;  %v4820_v1 = vcombine.low %v280_v59, %v284_v60 }
 0x102   :  { %1137 = vmatprep.subr.bf16.mxu1 %v4839_v2 }
 0x103   :  { %1040 = vmatpush1.bf16.msra.mxu0 %v4770_v11  ;;  %v4717_v11 = vcombine.high %v176_v4, %v180_v5  ;;  %v300_v4 = vld [vmem:[#allocation2 + $0x3f0] sm:$0xff] }
 0x104   :  { %1041 = vmatprep.subr.bf16.mxu0 %v4779_v15  ;;  %v196_v15 = vld [vmem:[#allocation2 + $0xb0] sm:$0xff] }
 0x105   :  { %1138 = vmatpush1.bf16.msra.mxu1 %v4838_v7  ;;  %v4732_v22 = vcombine.low %v192_v14, %v196_v15 }
 0x107   :  { %1042 = vmatpush1.bf16.msra.mxu0 %v4778_v21  ;;  %v4733_v21 = vcombine.high %v192_v14, %v196_v15  ;;  %v5508_v14 = vld [vmem:[#allocation4 + $0x20] ss:$8 sps:$4 sm:$0xff]   ;;  %v5513_v15 = vld [vmem:[#allocation4 + $0x34] ss:$8 sps:$4 sm:$0xff]  }
 0x108   :  { %1043 = vmatprep.subr.bf16.mxu0 %v4787_v24  ;;  %1140 = vmatmul.mubr.bf16.vlgmr.msra.gmra.mrb[0].mxu1 %v6454_v12  ;;  %v212_v24 = vld [vmem:[#allocation2 + $0x130] sm:$0xff] }
 0x109   :  { %v4748_v30 = vcombine.low %v208_v23, %v212_v24 }
 0x10b   :  { %1044 = vmatpush1.bf16.msra.mxu0 %v4786_v29  ;;  %v4749_v29 = vcombine.high %v208_v23, %v212_v24  ;;  %v5525_v23 = vld [vmem:[#allocation4 + $0x74] ss:$8 sps:$4 sm:$0xff]   ;;  %v5523_v24 = vld [vmem:[#allocation4 + $0x70] ss:$8 sps:$4 sm:$0xff]  }
 0x10c   :  { %1045 = vmatprep.subr.bf16.mxu0 %v4795_v32  ;;  %v228_v32 = vld [vmem:[#allocation2 + $0x1b0] sm:$0xff] }
 0x10d   :  { %v4765_v35 = vcombine.high %v224_v31, %v228_v32 }
 0x10f   :  { %1046 = vmatpush1.bf16.msra.mxu0 %v4794_v37  ;;  %v4764_v37 = vcombine.low %v224_v31, %v228_v32  ;;  %v5537_v31 = vld [vmem:[#allocation4 + $0xb4] ss:$8 sps:$4 sm:$0xff]   ;;  %v5535_v32 = vld [vmem:[#allocation4 + $0xb0] ss:$8 sps:$4 sm:$0xff]  }
 0x110   :  { %1047 = vmatprep.subr.bf16.mxu0 %v4803_v40  ;;  %v244_v40 = vld [vmem:[#allocation2 + $0x230] sm:$0xff] }
 0x111   :  { %v4781_v42 = vcombine.high %v240_v39, %v244_v40 }
 0x113   :  { %1048 = vmatpush1.bf16.msra.mxu0 %v4802_v45  ;;  %v4780_v45 = vcombine.low %v240_v39, %v244_v40  ;;  %v5547_v39 = vld [vmem:[#allocation4 + $0xf0] ss:$8 sps:$4 sm:$0xff]   ;;  %v5552_v40 = vld [vmem:[#allocation4 + $0x104] ss:$8 sps:$4 sm:$0xff]  }
 0x114   :  { %1049 = vmatprep.subr.bf16.mxu0 %v4811_v48  ;;  %v260_v48 = vld [vmem:[#allocation2 + $0x2b0] sm:$0xff] }
 0x115   :  { %v4797_v50 = vcombine.high %v256_v47, %v260_v48 }
 0x117   :  { %1050 = vmatpush1.bf16.msra.mxu0 %v4810_v53  ;;  %v4796_v53 = vcombine.low %v256_v47, %v260_v48 }
 0x118   :  { %1051 = vmatprep.subr.bf16.mxu0 %v4819_v56  ;;  %v276_v56 = vld [vmem:[#allocation2 + $0x330] sm:$0xff] }
 0x119   :  { %v4813_v58 = vcombine.high %v272_v55, %v276_v56 }
 0x11b   :  { %1052 = vmatpush1.bf16.msra.mxu0 %v4818_v61  ;;  %v4812_v61 = vcombine.low %v272_v55, %v276_v56 }
 0x11c   :  { %1053 = vmatprep.subr.bf16.mxu0 %v4827_v0  ;;  %v292_v0 = vld [vmem:[#allocation2 + $0x3b0] sm:$0xff] }
 0x11d   :  { %v4829_v2 = vcombine.high %v288_v63, %v292_v0  ;;  %v4828_v5 = vcombine.low %v288_v63, %v292_v0  ;;  %v5550_v63 = vld [vmem:[#allocation4 + $0x100] ss:$8 sps:$4 sm:$0xff]  }
 0x11f   :  { %1054 = vmatpush1.bf16.msra.mxu0 %v4826_v3  ;;  %v296_v3 = vld [vmem:[#allocation2 + $0x3d0] sm:$0xff] }
 0x120   :  { %1055 = vmatprep.subr.bf16.mxu0 %v4835_v6  ;;  %v4837_v6 = vcombine.high %v296_v3, %v300_v4  ;;  %v4836_v7 = vcombine.low %v296_v3, %v300_v4  ;;  %v5558_v3 = vld [vmem:[#allocation4 + $0x124] ss:$8 sps:$4 sm:$0xff]   ;;  %v5556_v4 = vld [vmem:[#allocation4 + $0x120] ss:$8 sps:$4 sm:$0xff]  }
 0x123   :  { %1056 = vmatpush1.bf16.msra.mxu0 %v4834_v8  ;;  %v5504_v8 = vld [vmem:[#allocation4 + $0x4] ss:$8 sps:$4 sm:$0xff]  }
 0x124   :  { %1066 = vmatprep.subr.bf16.mxu0 %v4717_v11  ;;  %v5505_v11 = vld [vmem:[#allocation4 + $0x10] ss:$8 sps:$4 sm:$0xff]  }
 0x126   :  { %1058 = vmatmul.mubr.bf16.vlgmr.msra.gmra.mrb[4].mxu0 %v6454_v12 }
 0x127   :  { %1067 = vmatpush1.bf16.msra.mxu0 %v4716_v13  ;;  %1098 = vmatprep.mubr.bf16.mxu0 %v6447_v18  ;;  %v4757_v18 = vcombine.high %v216_v27, %v220_v28  ;;  %v5510_v13 = vld [vmem:[#allocation4 + $0x24] ss:$8 sps:$4 sm:$0xff]   ;;  %v5531_v27 = vld [vmem:[#allocation4 + $0x94] ss:$8 sps:$4 sm:$0xff]   ;;  %v5529_v28 = vld [vmem:[#allocation4 + $0x90] ss:$8 sps:$4 sm:$0xff]  }
 0x128   :  { %1068 = vmatprep.subr.bf16.mxu0 %v4725_v16  ;;  %v5511_v16 = vld [vmem:[#allocation4 + $0x30] ss:$8 sps:$4 sm:$0xff]  }
 0x12b   :  { %1069 = vmatpush1.bf16.msra.mxu0 %v4724_v17  ;;  %v5516_v17 = vld [vmem:[#allocation4 + $0x44] ss:$8 sps:$4 sm:$0xff]  }
 0x12c   :  { %1070 = vmatprep.subr.bf16.mxu0 %v4733_v21  ;;  %v5517_v21 = vld [vmem:[#allocation4 + $0x50] ss:$8 sps:$4 sm:$0xff]  }
 0x12f   :  { %1071 = vmatpush1.bf16.msra.mxu0 %v4732_v22  ;;  %v5520_v22 = vld [vmem:[#allocation4 + $0x60] ss:$8 sps:$4 sm:$0xff]  }
 0x130   :  { %1072 = vmatprep.subr.bf16.mxu0 %v4741_v25  ;;  %v5528_v25 = vld [vmem:[#allocation4 + $0x84] ss:$8 sps:$4 sm:$0xff]  }
 0x133   :  { %1073 = vmatpush1.bf16.msra.mxu0 %v4740_v26  ;;  %v5526_v26 = vld [vmem:[#allocation4 + $0x80] ss:$8 sps:$4 sm:$0xff]  }
 0x134   :  { %1074 = vmatprep.subr.bf16.mxu0 %v4749_v29  ;;  %v5534_v29 = vld [vmem:[#allocation4 + $0xa4] ss:$8 sps:$4 sm:$0xff]  }
 0x137   :  { %1075 = vmatpush1.bf16.msra.mxu0 %v4748_v30  ;;  %v5532_v30 = vld [vmem:[#allocation4 + $0xa0] ss:$8 sps:$4 sm:$0xff]  }
 0x138   :  { %1076 = vmatprep.subr.bf16.mxu0 %v4757_v18  ;;  %v5540_v18 = vld [vmem:[#allocation4 + $0xc4] ss:$8 sps:$4 sm:$0xff]  }
 0x13b   :  { %1077 = vmatpush1.bf16.msra.mxu0 %v4756_v33  ;;  %v5538_v33 = vld [vmem:[#allocation4 + $0xc0] ss:$8 sps:$4 sm:$0xff]  }
 0x13c   :  { %1078 = vmatprep.subr.bf16.mxu0 %v4765_v35  ;;  %v5541_v35 = vld [vmem:[#allocation4 + $0xd0] ss:$8 sps:$4 sm:$0xff]  }
 0x13f   :  { %1079 = vmatpush1.bf16.msra.mxu0 %v4764_v37  ;;  %v5544_v37 = vld [vmem:[#allocation4 + $0xe0] ss:$8 sps:$4 sm:$0xff]  }
 0x140   :  { %1080 = vmatprep.subr.bf16.mxu0 %v4773_v38  ;;  %v5549_v38 = vld [vmem:[#allocation4 + $0xf4] ss:$8 sps:$4 sm:$0xff]  }
 0x143   :  { %1081 = vmatpush1.bf16.msra.mxu0 %v4772_v41  ;;  %v304_v41 = vlaneseq }
 0x144   :  { %1082 = vmatprep.subr.bf16.mxu0 %v4781_v42 }
 0x145   :  { %v6462_v42 = vshrl.u32 %v304_v41, 7 }
 0x147   :  { %1083 = vmatpush1.bf16.msra.mxu0 %v4780_v45  ;;  %v6465_v43 = vsub.s32 0, %v6462_v42  ;;  %v6473_v45 = vsub.s32 1, %v6462_v42 }
 0x148   :  { %1084 = vmatprep.subr.bf16.mxu0 %v4789_v46 }
 0x149   :  { %v307_v46 = vrot.slane %v6470_v44, %v6465_v43  ;;  %v311_v47 = vrot.slane %v6470_v44, %v6473_v45 }
 0x14b   :  { %1085 = vmatpush1.bf16.msra.mxu0 %v4788_v49 }
 0x14c   :  { %1086 = vmatprep.subr.bf16.mxu0 %v4797_v50 }
 0x14f   :  { %1087 = vmatpush1.bf16.msra.mxu0 %v4796_v53 }
 0x150   :  { %1088 = vmatprep.subr.bf16.mxu0 %v4805_v54 }
 0x153   :  { %1089 = vmatpush1.bf16.msra.mxu0 %v4804_v57 }
 0x154   :  { %1090 = vmatprep.subr.bf16.mxu0 %v4813_v58 }
 0x157   :  { %1091 = vmatpush1.bf16.msra.mxu0 %v4812_v61 }
 0x158   :  { %1092 = vmatprep.subr.bf16.mxu0 %v4821_v62 }
 0x15b   :  { %1093 = vmatpush1.bf16.msra.mxu0 %v4820_v1  ;;  %v5555_v1 = vld [vmem:[#allocation4 + $0x114] ss:$8 sps:$4 sm:$0xff]  }
 0x15c   :  { %1094 = vmatprep.subr.bf16.mxu0 %v4829_v2  ;;  %v5553_v2 = vld [vmem:[#allocation4 + $0x110] ss:$8 sps:$4 sm:$0xff]  }
 0x15f   :  { %1095 = vmatpush1.bf16.msra.mxu0 %v4828_v5  ;;  %v5561_v5 = vld [vmem:[#allocation4 + $0x134] ss:$8 sps:$4 sm:$0xff]  }
 0x160   :  { %1096 = vmatprep.subr.bf16.mxu0 %v4837_v6  ;;  %v5559_v6 = vld [vmem:[#allocation4 + $0x130] ss:$8 sps:$4 sm:$0xff]  }
 0x163   :  { %1097 = vmatpush1.bf16.msra.mxu0 %v4836_v7  ;;  %v5564_v7 = vld [vmem:[#allocation4 + $0x144] ss:$8 sps:$4 sm:$0xff]  }
 0x164   :  { %1984 = vmatprep.subr.bf16.mxu0 %v5504_v8  ;;  %v5562_v8 = vld [vmem:[#allocation4 + $0x140] ss:$8 sps:$4 sm:$0xff]  }
 0x166   :  { %1099 = vmatmul.mubr.bf16.vlgmr.msra.gmra.mrb[8].mxu0 %v6454_v12  ;;  %v5522_v12 = vld [vmem:[#allocation4 + $0x64] ss:$8 sps:$4 sm:$0xff]  }
 0x167   :  { %1985 = vmatpush1.bf16.msra.mxu0 %v5502_v9  ;;  %v5567_v9 = vld [vmem:[#allocation4 + $0x154] ss:$8 sps:$4 sm:$0xff]  }
 0x168   :  { %1986 = vmatprep.subr.bf16.mxu0 %v5507_v10  ;;  %v5565_v10 = vld [vmem:[#allocation4 + $0x150] ss:$8 sps:$4 sm:$0xff]  }
 0x16b   :  { %1987 = vmatpush1.bf16.msra.mxu0 %v5505_v11  ;;  %v5570_v11 = vld [vmem:[#allocation4 + $0x164] ss:$8 sps:$4 sm:$0xff]  }
 0x16c   :  { %1988 = vmatprep.subr.bf16.mxu0 %v5510_v13  ;;  %v5568_v13 = vld [vmem:[#allocation4 + $0x160] ss:$8 sps:$4 sm:$0xff]  }
 0x16f   :  { %1989 = vmatpush1.bf16.msra.mxu0 %v5508_v14  ;;  %v5573_v14 = vld [vmem:[#allocation4 + $0x174] ss:$8 sps:$4 sm:$0xff]  }
 0x170   :  { %1990 = vmatprep.subr.bf16.mxu0 %v5513_v15  ;;  %v314_v15 = vsub.s32 2, %v6462_v42 }
 0x173   :  { %1991 = vmatpush1.bf16.msra.mxu0 %v5511_v16  ;;  %v5571_v16 = vld [vmem:[#allocation4 + $0x170] ss:$8 sps:$4 sm:$0xff]  }
 0x174   :  { %1992 = vmatprep.subr.bf16.mxu0 %v5516_v17  ;;  %v318_v17 = vsub.s32 3, %v6462_v42 }
 0x177   :  { %1993 = vmatpush1.bf16.msra.mxu0 %v5514_v19  ;;  %v5576_v19 = vld [vmem:[#allocation4 + $0x184] ss:$8 sps:$4 sm:$0xff]  }
 0x178   :  { %1994 = vmatprep.subr.bf16.mxu0 %v5519_v20  ;;  %v315_v20 = vrot.slane %v6470_v44, %v314_v15 }
 0x17b   :  { %1995 = vmatpush1.bf16.msra.mxu0 %v5517_v21 }
 0x17c   :  { %1996 = vmatprep.subr.bf16.mxu0 %v5522_v12  ;;  %v5574_v12 = vld [vmem:[#allocation4 + $0x180] ss:$8 sps:$4 sm:$0xff]  }
 0x17f   :  { %1997 = vmatpush1.bf16.msra.mxu0 %v5520_v22  ;;  %v319_v22 = vrot.slane %v6470_v44, %v318_v17 }
 0x180   :  { %1998 = vmatprep.subr.bf16.mxu0 %v5525_v23 }
 0x183   :  { %1999 = vmatpush1.bf16.msra.mxu0 %v5523_v24  ;;  %v5579_v24 = vld [vmem:[#allocation4 + $0x194] ss:$8 sps:$4 sm:$0xff]  }
 0x184   :  { %2000 = vmatprep.subr.bf16.mxu0 %v5528_v25 }
 0x187   :  { %2001 = vmatpush1.bf16.msra.mxu0 %v5526_v26 }
 0x188   :  { %2002 = vmatprep.subr.bf16.mxu0 %v5531_v27 }
 0x18b   :  { %2003 = vmatpush1.bf16.msra.mxu0 %v5529_v28 }
 0x18c   :  { %2004 = vmatprep.subr.bf16.mxu0 %v5534_v29 }
 0x18f   :  { %2005 = vmatpush1.bf16.msra.mxu0 %v5532_v30 }
 0x190   :  { %2006 = vmatprep.subr.bf16.mxu0 %v5537_v31 }
 0x193   :  { %2007 = vmatpush1.bf16.msra.mxu0 %v5535_v32  ;;  %v5577_v32 = vld [vmem:[#allocation4 + $0x190] ss:$8 sps:$4 sm:$0xff]  }
 0x194   :  { %2008 = vmatprep.subr.bf16.mxu0 %v5540_v18 }
 0x197   :  { %2009 = vmatpush1.bf16.msra.mxu0 %v5538_v33 }
 0x198   :  { %2010 = vmatprep.subr.bf16.mxu0 %v5543_v34  ;;  %v5582_v34 = vld [vmem:[#allocation4 + $0x1a4] ss:$8 sps:$4 sm:$0xff]  }
 0x19b   :  { %2011 = vmatpush1.bf16.msra.mxu0 %v5541_v35 }
 0x19c   :  { %2012 = vmatprep.subr.bf16.mxu0 %v5546_v36  ;;  %v5580_v36 = vld [vmem:[#allocation4 + $0x1a0] ss:$8 sps:$4 sm:$0xff]  }
 0x19f   :  { %2013 = vmatpush1.bf16.msra.mxu0 %v5544_v37  ;;  %v5585_v37 = vld [vmem:[#allocation4 + $0x1b4] ss:$8 sps:$4 sm:$0xff]  }
 0x1a0   :  { %2014 = vmatprep.subr.bf16.mxu0 %v5549_v38  ;;  %v5583_v38 = vld [vmem:[#allocation4 + $0x1b0] ss:$8 sps:$4 sm:$0xff]  }
 0x1a3   :  { %2015 = vmatpush1.bf16.msra.mxu0 %v5547_v39  ;;  %v5588_v39 = vld [vmem:[#allocation4 + $0x1c4] ss:$8 sps:$4 sm:$0xff]  }
 0x1a4   :  { %2025 = vmatprep.subr.bf16.mxu0 %v5552_v40  ;;  %v5586_v40 = vld [vmem:[#allocation4 + $0x1c0] ss:$8 sps:$4 sm:$0xff]  }
 0x1b9   :  { %v1018_v48 = vpop.f32.mrb[0].mxu0 }
 0x1ba   :  { %v1019_v49 = vadd.f32 %v1018_v48, %v307_v46  ;;  %v1020_v50 = vpop.f32.mrb[1].mxu0  ;;  %v5591_v46 = vld [vmem:[#allocation4 + $0x1d4] ss:$8 sps:$4 sm:$0xff]  }
 0x1bb   :  { %v1021_v51 = vadd.f32 %v1020_v50, %v311_v47  ;;  %v1022_v52 = vpop.f32.mrb[2].mxu0  ;;  %v5589_v50 = vld [vmem:[#allocation4 + $0x1d0] ss:$8 sps:$4 sm:$0xff]  }
 0x1bc   :  { %v4840_v53 = vmul.f32 -1.442695, %v1019_v49  ;;  %v1023_v54 = vpop.f32.mrb[3].mxu0  ;;  %v5592_v52 = vld [vmem:[#allocation4 + $0x1e0] ss:$8 sps:$4 sm:$0xff]  }
 0x1bd   :  { %v4841_v55 = vmul.f32 -1.442695, %v1021_v51  ;;  %v5594_v51 = vld [vmem:[#allocation4 + $0x1e4] ss:$8 sps:$4 sm:$0xff]   ;;  %v5595_v54 = vld [vmem:[#allocation4 + $0x1f0] ss:$8 sps:$4 sm:$0xff]  }
 0x1be   :  { %5926 = vpow2.f32 %v4840_v53  ;;  %v5597_v53 = vld [vmem:[#allocation4 + $0x1f4] ss:$8 sps:$4 sm:$0xff]  }
 0x1bf   :  { %5928 = vpow2.f32 %v4841_v55  ;;  %v5600_v55 = vld [vmem:[#allocation4 + $0x204] ss:$8 sps:$4 sm:$0xff]  }
 0x1c8   :  { %v5927_v56 = vpop.eup %5926 }
 0x1c9   :  { %v5929_v57 = vpop.eup %5928  ;;  %v1172_v58 = vadd.f32 1.0, %v5927_v56 }
 0x1ca   :  { %v1173_v59 = vadd.f32 1.0, %v5929_v57 }
 0x1cb   :  { %5930 = vrcp.f32 %v1172_v58 }
 0x1cc   :  { %5932 = vrcp.f32 %v1173_v59  ;;  %v5598_v59 = vld [vmem:[#allocation4 + $0x200] ss:$8 sps:$4 sm:$0xff]  }
 0x1d5   :  { %v5931_v60 = vpop.eup %5930 }
 0x1d6   :  { %v5933_v61 = vpop.eup %5932  ;;  %v1196_v0 = vpack.c.bf16 %v5931_v60, %v5931_v60 }
 0x1d7   :  { %v1197_v62 = vpack.c.bf16 %v5933_v61, %v5933_v61  ;;  %v5603_v61 = vld [vmem:[#allocation4 + $0x214] ss:$8 sps:$4 sm:$0xff]  }
 0x1d9   :  { %2016 = vmatprep.mubr.bf16.mxu0 %v1197_v62  ;;  %v5601_v62 = vld [vmem:[#allocation4 + $0x210] ss:$8 sps:$4 sm:$0xff]  }
 0x1da   :  { %2017 = vmatmul.mubr.bf16.vlgmr.msra.gmra.mrb[12].mxu0 %v1196_v0  ;;  %v5604_v0 = vld [vmem:[#allocation4 + $0x220] ss:$8 sps:$4 sm:$0xff]  }
 0x1db   :  { %2026 = vmatpush1.bf16.msra.mxu0 %v5550_v63  ;;  %v6484_v21 = vpop.f32.mrb[0].mxu1  ;;  %v5606_v63 = vld [vmem:[#allocation4 + $0x224] ss:$8 sps:$4 sm:$0xff]  }
 0x1dc   :  { %2027 = vmatprep.subr.bf16.mxu0 %v5555_v1  ;;  %v6489_v23 = vpop.f32.mrb[1].mxu1  ;;  %v5609_v1 = vld [vmem:[#allocation4 + $0x234] ss:$8 sps:$4 sm:$0xff]  }
 0x1dd   :  { %v1145_v25 = vpop.f32.mrb[2].mxu1 }
 0x1de   :  { %v1146_v27 = vpop.f32.mrb[3].mxu1 }
 0x1df   :  { %2028 = vmatpush1.bf16.msra.mxu0 %v5553_v2  ;;  %v5607_v2 = vld [vmem:[#allocation4 + $0x230] ss:$8 sps:$4 sm:$0xff]  }
 0x1e0   :  { %2029 = vmatprep.subr.bf16.mxu0 %v5558_v3  ;;  %v5612_v3 = vld [vmem:[#allocation4 + $0x244] ss:$8 sps:$4 sm:$0xff]  }
 0x1e3   :  { %2030 = vmatpush1.bf16.msra.mxu0 %v5556_v4  ;;  %v5610_v4 = vld [vmem:[#allocation4 + $0x240] ss:$8 sps:$4 sm:$0xff]  }
 0x1e4   :  { %2031 = vmatprep.subr.bf16.mxu0 %v5561_v5  ;;  %v5615_v5 = vld [vmem:[#allocation4 + $0x254] ss:$8 sps:$4 sm:$0xff]  }
 0x1e7   :  { %2032 = vmatpush1.bf16.msra.mxu0 %v5559_v6  ;;  %v334_v6 = vsub.s32 7, %v6462_v42 }
 0x1e8   :  { %2033 = vmatprep.subr.bf16.mxu0 %v5564_v7  ;;  %v5613_v7 = vld [vmem:[#allocation4 + $0x250] ss:$8 sps:$4 sm:$0xff]  }
 0x1eb   :  { %2034 = vmatpush1.bf16.msra.mxu0 %v5562_v8  ;;  %v5618_v8 = vld [vmem:[#allocation4 + $0x264] ss:$8 sps:$4 sm:$0xff]  }
 0x1ec   :  { %2035 = vmatprep.subr.bf16.mxu0 %v5567_v9  ;;  %v335_v9 = vrot.slane %v6470_v44, %v334_v6 }
 0x1ef   :  { %2036 = vmatpush1.bf16.msra.mxu0 %v5565_v10  ;;  %v5616_v10 = vld [vmem:[#allocation4 + $0x260] ss:$8 sps:$4 sm:$0xff]  }
 0x1f0   :  { %2037 = vmatprep.subr.bf16.mxu0 %v5570_v11  ;;  %v5621_v11 = vld [vmem:[#allocation4 + $0x274] ss:$8 sps:$4 sm:$0xff]  }
 0x1f3   :  { %2038 = vmatpush1.bf16.msra.mxu0 %v5568_v13  ;;  %v1144_v13 = vadd.f32 %v6489_v23, %v335_v9  ;;  %v5627_v23 = vld [vmem:[#allocation4 + $0x294] ss:$8 sps:$4 sm:$0xff]  }
 0x1f4   :  { %2039 = vmatprep.subr.bf16.mxu0 %v5573_v14  ;;  %v322_v14 = vsub.s32 4, %v6462_v42  ;;  %v5663_v9 = vld [vmem:[#allocation4 + $0x354] ss:$8 sps:$4 sm:$0xff]  }
 0x1f7   :  { %2040 = vmatpush1.bf16.msra.mxu0 %v5571_v16  ;;  %v5619_v16 = vld [vmem:[#allocation4 + $0x270] ss:$8 sps:$4 sm:$0xff]  }
 0x1f8   :  { %2041 = vmatprep.subr.bf16.mxu0 %v5576_v19  ;;  %v326_v19 = vsub.s32 5, %v6462_v42 }
 0x1f9   :  { %v1059_v26 = vpop.f32.mrb[4].mxu0 }
 0x1fa   :  { %v1060_v28 = vadd.f32 %v1059_v26, %v315_v20  ;;  %v1061_v29 = vpop.f32.mrb[5].mxu0  ;;  %v5624_v20 = vld [vmem:[#allocation4 + $0x284] ss:$8 sps:$4 sm:$0xff]   ;;  %v327_v25 = vrot.slane %v6470_v44, %v326_v19 }
 0x1fb   :  { %v1062_v30 = vadd.f32 %v1061_v29, %v319_v22  ;;  %2042 = vmatpush1.bf16.msra.mxu0 %v5574_v12  ;;  %v1063_v31 = vpop.f32.mrb[6].mxu0  ;;  %v4847_v12 = vmul.f32 -1.442695, %v1144_v13  ;;  %v323_v22 = vrot.slane %v6470_v44, %v322_v14  ;;  %v5666_v13 = vld [vmem:[#allocation4 + $0x364] ss:$8 sps:$4 sm:$0xff]  }
 0x1fc   :  { %v4842_v18 = vmul.f32 -1.442695, %v1060_v28  ;;  %v1064_v33 = vpop.f32.mrb[7].mxu0  ;;  %2043 = vmatprep.subr.bf16.mxu0 %v5579_v24  ;;  %v5622_v24 = vld [vmem:[#allocation4 + $0x280] ss:$8 sps:$4 sm:$0xff]  }
 0x1fd   :  { %v4843_v35 = vmul.f32 -1.442695, %v1062_v30  ;;  %v5625_v31 = vld [vmem:[#allocation4 + $0x290] ss:$8 sps:$4 sm:$0xff]   ;;  %v5630_v33 = vld [vmem:[#allocation4 + $0x2a4] ss:$8 sps:$4 sm:$0xff]  }
 0x1fe   :  { %5934 = vpow2.f32 %v4842_v18 }
 0x1ff   :  { %5936 = vpow2.f32 %v4843_v35  ;;  %2044 = vmatpush1.bf16.msra.mxu0 %v5577_v32  ;;  %v5628_v35 = vld [vmem:[#allocation4 + $0x2a0] ss:$8 sps:$4 sm:$0xff]  }
 0x200   :  { %2045 = vmatprep.subr.bf16.mxu0 %v5582_v34 }
 0x203   :  { %2046 = vmatpush1.bf16.msra.mxu0 %v5580_v36  ;;  %v5633_v36 = vld [vmem:[#allocation4 + $0x2b4] ss:$8 sps:$4 sm:$0xff]  }
 0x204   :  { %2047 = vmatprep.subr.bf16.mxu0 %v5585_v37 }
 0x207   :  { %2048 = vmatpush1.bf16.msra.mxu0 %v5583_v38  ;;  %v5631_v38 = vld [vmem:[#allocation4 + $0x2b0] ss:$8 sps:$4 sm:$0xff]  }
 0x208   :  { %v5935_v41 = vpop.eup %5934  ;;  %2049 = vmatprep.subr.bf16.mxu0 %v5588_v39  ;;  %v5636_v39 = vld [vmem:[#allocation4 + $0x2c4] ss:$8 sps:$4 sm:$0xff]  }
 0x209   :  { %v5937_v47 = vpop.eup %5936  ;;  %v1174_v48 = vadd.f32 1.0, %v5935_v41  ;;  %v5634_v41 = vld [vmem:[#allocation4 + $0x2c0] ss:$8 sps:$4 sm:$0xff]  }
 0x20a   :  { %v1175_v49 = vadd.f32 1.0, %v5937_v47  ;;  %v5639_v47 = vld [vmem:[#allocation4 + $0x2d4] ss:$8 sps:$4 sm:$0xff]  }
 0x20b   :  { %5938 = vrcp.f32 %v1174_v48  ;;  %2050 = vmatpush1.bf16.msra.mxu0 %v5586_v40 }
 0x20c   :  { %5940 = vrcp.f32 %v1175_v49  ;;  %2051 = vmatprep.subr.bf16.mxu0 %v5591_v46 }
 0x20d   :  { %5942 = vpow2.f32 %v4847_v12  ;;  %v5669_v12 = vld [vmem:[#allocation4 + $0x374] ss:$8 sps:$4 sm:$0xff]  }
 0x20f   :  { %2052 = vmatpush1.bf16.msra.mxu0 %v5589_v50 }
 0x210   :  { %2053 = vmatprep.subr.bf16.mxu0 %v5594_v51  ;;  %v5637_v51 = vld [vmem:[#allocation4 + $0x2d0] ss:$8 sps:$4 sm:$0xff]  }
 0x213   :  { %2054 = vmatpush1.bf16.msra.mxu0 %v5592_v52  ;;  %v5642_v52 = vld [vmem:[#allocation4 + $0x2e4] ss:$8 sps:$4 sm:$0xff]  }
 0x214   :  { %2055 = vmatprep.subr.bf16.mxu0 %v5597_v53  ;;  %v5640_v53 = vld [vmem:[#allocation4 + $0x2e0] ss:$8 sps:$4 sm:$0xff]  }
 0x215   :  { %v5939_v56 = vpop.eup %5938 }
 0x216   :  { %v5941_v57 = vpop.eup %5940  ;;  %v1198_v60 = vpack.c.bf16 %v5939_v56, %v5939_v56 }
 0x217   :  { %2056 = vmatpush1.bf16.msra.mxu0 %v5595_v54  ;;  %v1199_v58 = vpack.c.bf16 %v5941_v57, %v5941_v57  ;;  %v5943_v37 = vpop.eup %5942  ;;  %v5645_v54 = vld [vmem:[#allocation4 + $0x2f4] ss:$8 sps:$4 sm:$0xff]   ;;  %v5648_v57 = vld [vmem:[#allocation4 + $0x304] ss:$8 sps:$4 sm:$0xff]  }
 0x218   :  { %2066 = vmatprep.subr.bf16.mxu0 %v5600_v55  ;;  %v1179_v40 = vadd.f32 1.0, %v5943_v37  ;;  %v5643_v55 = vld [vmem:[#allocation4 + $0x2f0] ss:$8 sps:$4 sm:$0xff]   ;;  %v5688_v37 = vld [vmem:[#allocation4 + $0x3e0] ss:$8 sps:$4 sm:$0xff]  }
 0x219   :  { %2057 = vmatprep.mubr.bf16.mxu0 %v1199_v58 }
 0x21a   :  { %2058 = vmatmul.mubr.bf16.vlgmr.msra.gmra.mrb[12].mxu0 %v1198_v60 }
 0x21b   :  { %2067 = vmatpush1.bf16.msra.mxu0 %v5598_v59 }
 0x21c   :  { %2068 = vmatprep.subr.bf16.mxu0 %v5603_v61  ;;  %v5646_v61 = vld [vmem:[#allocation4 + $0x300] ss:$8 sps:$4 sm:$0xff]  }
 0x21f   :  { %2069 = vmatpush1.bf16.msra.mxu0 %v5601_v62 }
 0x220   :  { %2070 = vmatprep.subr.bf16.mxu0 %v5606_v63 }
 0x223   :  { %2071 = vmatpush1.bf16.msra.mxu0 %v5604_v0  ;;  %v5651_v0 = vld [vmem:[#allocation4 + $0x314] ss:$8 sps:$4 sm:$0xff]  }
 0x224   :  { %2072 = vmatprep.subr.bf16.mxu0 %v5609_v1  ;;  %v5649_v1 = vld [vmem:[#allocation4 + $0x310] ss:$8 sps:$4 sm:$0xff]  }
 0x227   :  { %2073 = vmatpush1.bf16.msra.mxu0 %v5607_v2  ;;  %v5654_v2 = vld [vmem:[#allocation4 + $0x324] ss:$8 sps:$4 sm:$0xff]  }
 0x228   :  { %2074 = vmatprep.subr.bf16.mxu0 %v5612_v3  ;;  %v5652_v3 = vld [vmem:[#allocation4 + $0x320] ss:$8 sps:$4 sm:$0xff]  }
 0x22b   :  { %2075 = vmatpush1.bf16.msra.mxu0 %v5610_v4  ;;  %v5657_v4 = vld [vmem:[#allocation4 + $0x334] ss:$8 sps:$4 sm:$0xff]  }
 0x22c   :  { %2076 = vmatprep.subr.bf16.mxu0 %v5615_v5  ;;  %v5655_v5 = vld [vmem:[#allocation4 + $0x330] ss:$8 sps:$4 sm:$0xff]  }
 0x22f   :  { %2077 = vmatpush1.bf16.msra.mxu0 %v5613_v7  ;;  %v5660_v7 = vld [vmem:[#allocation4 + $0x344] ss:$8 sps:$4 sm:$0xff]  }
 0x230   :  { %2078 = vmatprep.subr.bf16.mxu0 %v5618_v8  ;;  %v5658_v8 = vld [vmem:[#allocation4 + $0x340] ss:$8 sps:$4 sm:$0xff]  }
 0x233   :  { %2079 = vmatpush1.bf16.msra.mxu0 %v5616_v10  ;;  %v330_v10 = vsub.s32 6, %v6462_v42  ;;  %v5905_v42 = vld [vmem:[#allocation10 + $0x390] ss:$8 sps:$4 sm:$0xff]  }
 0x234   :  { %2080 = vmatprep.subr.bf16.mxu0 %v5621_v11  ;;  %v5661_v11 = vld [vmem:[#allocation4 + $0x350] ss:$8 sps:$4 sm:$0xff]  }
 0x237   :  { %2081 = vmatpush1.bf16.msra.mxu0 %v5619_v16  ;;  %v331_v16 = vrot.slane %v6470_v44, %v330_v10  ;;  %v5678_v44 = vld [vmem:[#allocation4 + $0x3a4] ss:$8 sps:$4 sm:$0xff]  }
 0x238   :  { %2082 = vmatprep.subr.bf16.mxu0 %v5624_v20  ;;  %v5664_v20 = vld [vmem:[#allocation4 + $0x360] ss:$8 sps:$4 sm:$0xff]  }
 0x239   :  { %v1100_v26 = vpop.f32.mrb[8].mxu0 }
 0x23a   :  { %v1101_v27 = vadd.f32 %v1100_v26, %v323_v22  ;;  %v1102_v28 = vpop.f32.mrb[9].mxu0  ;;  %v1142_v22 = vadd.f32 %v6484_v21, %v331_v16  ;;  %v5670_v26 = vld [vmem:[#allocation4 + $0x380] ss:$8 sps:$4 sm:$0xff]   ;;  %v5679_v21 = vld [vmem:[#allocation4 + $0x3b0] ss:$8 sps:$4 sm:$0xff]  }
 0x23b   :  { %v1103_v29 = vadd.f32 %v1102_v28, %v327_v25  ;;  %2083 = vmatpush1.bf16.msra.mxu0 %v5622_v24  ;;  %v1104_v30 = vpop.f32.mrb[10].mxu0  ;;  %v5667_v24 = vld [vmem:[#allocation4 + $0x370] ss:$8 sps:$4 sm:$0xff]   ;;  %v5672_v25 = vld [vmem:[#allocation4 + $0x384] ss:$8 sps:$4 sm:$0xff]  }
 0x23c   :  { %v4844_v32 = vmul.f32 -1.442695, %v1101_v27  ;;  %v1105_v18 = vpop.f32.mrb[11].mxu0  ;;  %2084 = vmatprep.subr.bf16.mxu0 %v5627_v23  ;;  %v4846_v23 = vmul.f32 -1.442695, %v1142_v22 }
 0x23d   :  { %v4845_v34 = vmul.f32 -1.442695, %v1103_v29  ;;  %v5675_v27 = vld [vmem:[#allocation4 + $0x394] ss:$8 sps:$4 sm:$0xff]   ;;  %v5673_v28 = vld [vmem:[#allocation4 + $0x390] ss:$8 sps:$4 sm:$0xff]  }
 0x23e   :  { %5944 = vpow2.f32 %v4844_v32  ;;  %v5676_v29 = vld [vmem:[#allocation4 + $0x3a0] ss:$8 sps:$4 sm:$0xff]   ;;  %v5681_v30 = vld [vmem:[#allocation4 + $0x3b4] ss:$8 sps:$4 sm:$0xff]   ;;  %v5684_v32 = vld [vmem:[#allocation4 + $0x3c4] ss:$8 sps:$4 sm:$0xff]  }
 0x23f   :  { %5946 = vpow2.f32 %v4845_v34  ;;  %2085 = vmatpush1.bf16.msra.mxu0 %v5625_v31  ;;  %v5687_v34 = vld [vmem:[#allocation4 + $0x3d4] ss:$8 sps:$4 sm:$0xff]  }
 0x240   :  { %2086 = vmatprep.subr.bf16.mxu0 %v5630_v33  ;;  %5948 = vrcp.f32 %v1179_v40  ;;  %v5682_v33 = vld [vmem:[#allocation4 + $0x3c0] ss:$8 sps:$4 sm:$0xff]  }
 0x243   :  { %2087 = vmatpush1.bf16.msra.mxu0 %v5628_v35  ;;  %v5685_v35 = vld [vmem:[#allocation4 + $0x3d0] ss:$8 sps:$4 sm:$0xff]  }
 0x244   :  { %2088 = vmatprep.subr.bf16.mxu0 %v5633_v36  ;;  %v5690_v36 = vld [vmem:[#allocation4 + $0x3e4] ss:$8 sps:$4 sm:$0xff]  }
 0x247   :  { %2089 = vmatpush1.bf16.msra.mxu0 %v5631_v38  ;;  %v5693_v38 = vld [vmem:[#allocation4 + $0x3f4] ss:$8 sps:$4 sm:$0xff]  }
 0x248   :  { %v5945_v46 = vpop.eup %5944  ;;  %2090 = vmatprep.subr.bf16.mxu0 %v5636_v39  ;;  %v5691_v39 = vld [vmem:[#allocation4 + $0x3f0] ss:$8 sps:$4 sm:$0xff]  }
 0x249   :  { %v5947_v48 = vpop.eup %5946  ;;  %v1176_v49 = vadd.f32 1.0, %v5945_v46  ;;  %v5694_v46 = vld [vmem:[#allocation6 + $0x40] sm:$0xff]  }
 0x24a   :  { %v1177_v50 = vadd.f32 1.0, %v5947_v48  ;;  %v5949_v56 = vpop.eup %5948  ;;  %5282 = vmatprep.subr.bf16.mxu1 %v5694_v46  ;;  %v5696_v48 = vld [vmem:[#allocation6 + $0x48] sm:$0xff]  }
 0x24b   :  { %5950 = vrcp.f32 %v1176_v49  ;;  %2091 = vmatpush1.bf16.msra.mxu0 %v5634_v41  ;;  %v1203_v62 = vpack.c.bf16 %v5949_v56, %v5949_v56  ;;  %v5697_v49 = vld [vmem:[#allocation6 + $0x8] sm:$0xff]  }
 0x24c   :  { %5952 = vrcp.f32 %v1177_v50  ;;  %2092 = vmatprep.subr.bf16.mxu0 %v5639_v47  ;;  %v5695_v47 = vld [vmem:[#allocation6] sm:$0xff]   ;;  %v5698_v50 = vld [vmem:[#allocation6 + $0x50] sm:$0xff]   ;;  %v5704_v56 = vld [vmem:[#allocation6 + $0x68] sm:$0xff]  }
 0x24d   :  { %5954 = vpow2.f32 %v4846_v23  ;;  %5283 = vmatpush3.bf16.msra.mxu1 %v5695_v47  ;;  %v5712_v23 = vld [vmem:[#allocation7 + $0x4] ss:$8 sps:$4 sm:$0xff]  }
 0x24e   :  { %5284 = vmatprep.subr.bf16.mxu1 %v5696_v48 }
 0x24f   :  { %2093 = vmatpush1.bf16.msra.mxu0 %v5637_v51  ;;  %v5699_v51 = vld [vmem:[#allocation6 + $0x10] sm:$0xff]  }
 0x250   :  { %2094 = vmatprep.subr.bf16.mxu0 %v5642_v52  ;;  %v5700_v52 = vld [vmem:[#allocation6 + $0x58] sm:$0xff]  }
 0x251   :  { %5285 = vmatpush3.bf16.msra.mxu1 %v5697_v49 }
 0x252   :  { %5286 = vmatprep.subr.bf16.mxu1 %v5698_v50 }
 0x253   :  { %2095 = vmatpush1.bf16.msra.mxu0 %v5640_v53  ;;  %v5701_v53 = vld [vmem:[#allocation6 + $0x18] sm:$0xff]  }
 0x254   :  { %2096 = vmatprep.subr.bf16.mxu0 %v5645_v54  ;;  %v5702_v54 = vld [vmem:[#allocation6 + $0x60] sm:$0xff]  }
 0x255   :  { %v5951_v58 = vpop.eup %5950  ;;  %5287 = vmatpush3.bf16.msra.mxu1 %v5699_v51 }
 0x256   :  { %v5953_v59 = vpop.eup %5952  ;;  %v1200_v63 = vpack.c.bf16 %v5951_v58, %v5951_v58  ;;  %5288 = vmatprep.subr.bf16.mxu1 %v5700_v52  ;;  %v5706_v58 = vld [vmem:[#allocation6 + $0x70] sm:$0xff]  }
 0x257   :  { %2097 = vmatpush1.bf16.msra.mxu0 %v5643_v55  ;;  %v1201_v60 = vpack.c.bf16 %v5953_v59, %v5953_v59  ;;  %v5955_v31 = vpop.eup %5954  ;;  %v5703_v55 = vld [vmem:[#allocation6 + $0x20] sm:$0xff]   ;;  %v5707_v59 = vld [vmem:[#allocation6 + $0x30] sm:$0xff]  }
 0x258   :  { %2107 = vmatprep.subr.bf16.mxu0 %v5648_v57  ;;  %v1178_v18 = vadd.f32 1.0, %v5955_v31  ;;  %v5705_v57 = vld [vmem:[#allocation6 + $0x28] sm:$0xff]  }
 0x259   :  { %2098 = vmatprep.mubr.bf16.mxu0 %v1201_v60  ;;  %5289 = vmatpush3.bf16.msra.mxu1 %v5701_v53  ;;  %v5708_v60 = vld [vmem:[#allocation6 + $0x78] sm:$0xff]   ;;  %v5724_v31 = vld [vmem:[#allocation7 + $0x44] ss:$8 sps:$4 sm:$0xff]  }
 0x25a   :  { %2099 = vmatmul.mubr.bf16.vlgmr.msra.gmra.mrb[12].mxu0 %v1200_v63  ;;  %5956 = vrcp.f32 %v1178_v18  ;;  %5290 = vmatprep.subr.bf16.mxu1 %v5702_v54  ;;  %v5727_v18 = vld [vmem:[#allocation7 + $0x54] ss:$8 sps:$4 sm:$0xff]  }
 0x25b   :  { %2108 = vmatpush1.bf16.msra.mxu0 %v5646_v61  ;;  %2139 = vmatprep.mubr.bf16.mxu0 %v1203_v62  ;;  %v5709_v61 = vld [vmem:[#allocation6 + $0x38] sm:$0xff]   ;;  %v1332_v62 = vld [vmem:[%s6660_s25] sm:$0x3] }
 0x25c   :  { %2109 = vmatprep.subr.bf16.mxu0 %v5651_v0  ;;  %v1337_v63 = vrot.slane %v1332_v62, %v6465_v43  ;;  %v1341_v0 = vrot.slane %v1332_v62, %v6473_v45  ;;  %v2516_v62 = vld [vmem:[#allocation9 + $0x40] sm:$0xff] }
 0x25d   :  { %5291 = vmatpush3.bf16.msra.mxu1 %v5703_v55 }
 0x25e   :  { %5292 = vmatprep.subr.bf16.mxu1 %v5704_v56  ;;  %v2508_v56 = vld [vmem:[#allocation9] sm:$0xff] }
 0x25f   :  { %2110 = vmatpush1.bf16.msra.mxu0 %v5649_v1 }
 0x260   :  { %2111 = vmatprep.subr.bf16.mxu0 %v5654_v2 }
 0x261   :  { %5293 = vmatpush3.bf16.msra.mxu1 %v5705_v57  ;;  %v2512_v57 = vld [vmem:[#allocation9 + $0x20] sm:$0xff] }
 0x262   :  { %5294 = vmatprep.subr.bf16.mxu1 %v5706_v58  ;;  %v2511_v58 = vld [vmem:[#allocation9 + $0x18] sm:$0xff] }
 0x263   :  { %2112 = vmatpush1.bf16.msra.mxu0 %v5652_v3 }
 0x264   :  { %2113 = vmatprep.subr.bf16.mxu0 %v5657_v4  ;;  %v5957_v40 = vpop.eup %5956 }
 0x265   :  { %v1202_v41 = vpack.c.bf16 %v5957_v40, %v5957_v40  ;;  %5295 = vmatpush3.bf16.msra.mxu1 %v5707_v59  ;;  %v4978_v40 = vld [vmem:[%s6627_s6] ss:$0 sm:$0xff]  ;;  %v5014_v59 = vcombine.low %v2508_v56, %v2512_v57 }
 0x266   :  { %5296 = vmatprep.subr.bf16.mxu1 %v5708_v60  ;;  %v5015_v60 = vcombine.high %v2508_v56, %v2512_v57  ;;  %v2564_v56 = vld [vmem:[#allocation9 + $0x1c0] sm:$0xff] }
 0x267   :  { %2114 = vmatpush1.bf16.msra.mxu0 %v5655_v5  ;;  %v2568_v57 = vld [vmem:[#allocation9 + $0x1e0] sm:$0xff] }
 0x268   :  { %2115 = vmatprep.subr.bf16.mxu0 %v5660_v7 }
 0x269   :  { %5297 = vmatpush3.bf16.msra.mxu1 %v5709_v61  ;;  %v2515_v61 = vld [vmem:[#allocation9 + $0x38] sm:$0xff] }
 0x26a   :  { %2453 = vmatprep.subr.bf16.mxu1 %v5712_v23  ;;  %v2539_v23 = vld [vmem:[#allocation9 + $0xf8] sm:$0xff] }
 0x26b   :  { %2116 = vmatpush1.bf16.msra.mxu0 %v5658_v8 }
 0x26c   :  { %2117 = vmatprep.subr.bf16.mxu0 %v5663_v9 }
 0x26f   :  { %2118 = vmatpush1.bf16.msra.mxu0 %v5661_v11 }
 0x270   :  { %2119 = vmatprep.subr.bf16.mxu0 %v5666_v13 }
 0x273   :  { %2120 = vmatpush1.bf16.msra.mxu0 %v5664_v20 }
 0x274   :  { %2121 = vmatprep.subr.bf16.mxu0 %v5669_v12 }
 0x277   :  { %2122 = vmatpush1.bf16.msra.mxu0 %v5667_v24 }
 0x278   :  { %2123 = vmatprep.subr.bf16.mxu0 %v5672_v25 }
 0x27b   :  { %2124 = vmatpush1.bf16.msra.mxu0 %v5670_v26  ;;  %v5710_v26 = vld [vmem:[#allocation7] ss:$8 sps:$4 sm:$0xff]  }
 0x27c   :  { %2125 = vmatprep.subr.bf16.mxu0 %v5675_v27  ;;  %v5715_v27 = vld [vmem:[#allocation7 + $0x14] ss:$8 sps:$4 sm:$0xff]  }
 0x27f   :  { %2126 = vmatpush1.bf16.msra.mxu0 %v5673_v28  ;;  %v5713_v28 = vld [vmem:[#allocation7 + $0x10] ss:$8 sps:$4 sm:$0xff]  }
 0x280   :  { %2127 = vmatprep.subr.bf16.mxu0 %v5678_v44  ;;  %v5718_v44 = vld [vmem:[#allocation7 + $0x24] ss:$8 sps:$4 sm:$0xff]  }
 0x283   :  { %2128 = vmatpush1.bf16.msra.mxu0 %v5676_v29  ;;  %v5716_v29 = vld [vmem:[#allocation7 + $0x20] ss:$8 sps:$4 sm:$0xff]  }
 0x284   :  { %2129 = vmatprep.subr.bf16.mxu0 %v5681_v30  ;;  %v5721_v30 = vld [vmem:[#allocation7 + $0x34] ss:$8 sps:$4 sm:$0xff]  }
 0x287   :  { %2130 = vmatpush1.bf16.msra.mxu0 %v5679_v21  ;;  %v5719_v21 = vld [vmem:[#allocation7 + $0x30] ss:$8 sps:$4 sm:$0xff]  }
 0x288   :  { %2131 = vmatprep.subr.bf16.mxu0 %v5684_v32  ;;  %v5722_v32 = vld [vmem:[#allocation7 + $0x40] ss:$8 sps:$4 sm:$0xff]  }
 0x28b   :  { %2132 = vmatpush1.bf16.msra.mxu0 %v5682_v33  ;;  %v5725_v33 = vld [vmem:[#allocation7 + $0x50] ss:$8 sps:$4 sm:$0xff]  }
 0x28c   :  { %2133 = vmatprep.subr.bf16.mxu0 %v5687_v34  ;;  %v5730_v34 = vld [vmem:[#allocation7 + $0x64] ss:$8 sps:$4 sm:$0xff]  }
 0x28f   :  { %2134 = vmatpush1.bf16.msra.mxu0 %v5685_v35  ;;  %v5728_v35 = vld [vmem:[#allocation7 + $0x60] ss:$8 sps:$4 sm:$0xff]  }
 0x290   :  { %2135 = vmatprep.subr.bf16.mxu0 %v5690_v36  ;;  %v5733_v36 = vld [vmem:[#allocation7 + $0x74] ss:$8 sps:$4 sm:$0xff]  }
 0x293   :  { %2136 = vmatpush1.bf16.msra.mxu0 %v5688_v37  ;;  %v5731_v37 = vld [vmem:[#allocation7 + $0x70] ss:$8 sps:$4 sm:$0xff]  }
 0x294   :  { %2137 = vmatprep.subr.bf16.mxu0 %v5693_v38  ;;  %v6218_v38 = vmov 0  }
 0x297   :  { %2138 = vmatpush1.bf16.msra.mxu0 %v5691_v39 }
 0x29a   :  { %2140 = vmatmul.mubr.bf16.vlgmr.msra.gmra.mrb[12].mxu0 %v1202_v41 }
 0x36d   :  { %v2141_v1 = vpop.f32.mrb[12].mxu0 }
 0x36e   :  { %v5456_v2 = vadd.f32 %v2141_v1, %v1337_v63  ;;  %v2143_v3 = vpop.f32.mrb[13].mxu0  ;;  %v2520_v63 = vld [vmem:[#allocation9 + $0x60] sm:$0xff]  ;;  %v5021_v1 = vcombine.high %v2511_v58, %v2515_v61 }
 0x36f   :  { %v5457_v4 = vadd.f32 %v2143_v3, %v1341_v0  ;;  %v2145_v5 = vpop.f32.mrb[14].mxu0  ;;  %v5020_v0 = vcombine.low %v2511_v58, %v2515_v61  ;;  %v2519_v3 = vld [vmem:[#allocation9 + $0x58] sm:$0xff] }
 0x370   :  { %v4976_v7 = vmul.f32 -1.442695, %v5456_v2  ;;  %v2146_v8 = vpop.f32.mrb[15].mxu0  ;;  %v5023_v2 = vcombine.high %v2516_v62, %v2520_v63  ;;  %v2524_v5 = vld [vmem:[#allocation9 + $0x80] sm:$0xff]  ;;  %3441 = vmatprep.subr.bf16.mxu0 %v5021_v1  ;;  %v2567_v58 = vld [vmem:[#allocation9 + $0x1d8] sm:$0xff] }
 0x371   :  { %v4977_v9 = vmul.f32 -1.442695, %v5457_v4  ;;  %v2523_v4 = vld [vmem:[#allocation9 + $0x78] sm:$0xff]  ;;  %v2528_v8 = vld [vmem:[#allocation9 + $0xa0] sm:$0xff]  ;;  %3442 = vmatpush1.bf16.msra.mxu0 %v5020_v0  ;;  %v5070_v0 = vcombine.low %v2564_v56, %v2568_v57 }
 0x372   :  { %5958 = vpow2.f32 %v4976_v7  ;;  %v5029_v7 = vcombine.high %v2519_v3, %v2523_v4 }
 0x373   :  { %5960 = vpow2.f32 %v4977_v9  ;;  %v2527_v9 = vld [vmem:[#allocation9 + $0x98] sm:$0xff] }
 0x374   :  { %3443 = vmatprep.subr.bf16.mxu0 %v5029_v7  ;;  %v2579_v7 = vld [vmem:[#allocation9 + $0x238] sm:$0xff] }
 0x37c   :  { %v5959_v11 = vpop.eup %5958 }
 0x37d   :  { %v5961_v13 = vpop.eup %5960  ;;  %v2154_v16 = vadd.f32 1.0, %v5959_v11  ;;  %v2531_v11 = vld [vmem:[#allocation9 + $0xb8] sm:$0xff] }
 0x37e   :  { %v2155_v20 = vadd.f32 1.0, %v5961_v13  ;;  %v5022_v13 = vcombine.low %v2516_v62, %v2520_v63  ;;  %v5071_v62 = vcombine.high %v2564_v56, %v2568_v57  ;;  %v2619_v56 = vld [vmem:[#allocation9 + $0x378] sm:$0xff] }
 0x37f   :  { %5962 = vrcp.f32 %v2154_v16  ;;  %v5028_v16 = vcombine.low %v2519_v3, %v2523_v4  ;;  %v2576_v3 = vld [vmem:[#allocation9 + $0x220] sm:$0xff]  ;;  %v2575_v4 = vld [vmem:[#allocation9 + $0x218] sm:$0xff] }
 0x380   :  { %5964 = vrcp.f32 %v2155_v20  ;;  %v5031_v20 = vcombine.high %v2524_v5, %v2528_v8 }
 0x381   :  { %3444 = vmatpush1.bf16.msra.mxu0 %v5028_v16  ;;  %v2584_v16 = vld [vmem:[#allocation9 + $0x260] sm:$0xff] }
 0x389   :  { %v5963_v12 = vpop.eup %5962 }
 0x38a   :  { %v5965_v22 = vpop.eup %5964  ;;  %v2160_v25 = vpack.c.bf16 %v5963_v12, %v5963_v12  ;;  %v5037_v12 = vcombine.high %v2527_v9, %v2531_v11 }
 0x38b   :  { %v2161_v24 = vpack.c.bf16 %v5965_v22, %v5965_v22  ;;  %v2532_v22 = vld [vmem:[#allocation9 + $0xc0] sm:$0xff] }
 0x38c   :  { %3445 = vmatprep.subr.bf16.mxu0 %v5037_v12 }
 0x38d   :  { %2329 = vmatprep.mubr.bf16.mxu1 %v2161_v24  ;;  %v2536_v24 = vld [vmem:[#allocation9 + $0xe0] sm:$0xff] }
 0x38e   :  { %2330 = vmatmul.mubr.bf16.vlgmr.msra.gmra.mrb[4].mxu1 %v2160_v25  ;;  %v2535_v25 = vld [vmem:[#allocation9 + $0xd8] sm:$0xff] }
 0x38f   :  { %2454 = vmatpush1.bf16.msra.mxu1 %v5710_v26  ;;  %2485 = vmatprep.mubr.bf16.mxu1 %v6218_v38  ;;  %v5030_v26 = vcombine.low %v2524_v5, %v2528_v8  ;;  %v2555_v38 = vld [vmem:[#allocation9 + $0x178] sm:$0xff] }
 0x390   :  { %2455 = vmatprep.subr.bf16.mxu1 %v5715_v27  ;;  %v5036_v27 = vcombine.low %v2527_v9, %v2531_v11  ;;  %v5084_v9 = vcombine.low %v2575_v4, %v2579_v7  ;;  %v5085_v11 = vcombine.high %v2575_v4, %v2579_v7  ;;  %v2635_v7 = vld [vmem:[#allocation9 + $0x3f8] sm:$0xff] }
 0x392   :  { %3446 = vmatpush1.bf16.msra.mxu0 %v5036_v27  ;;  %v2592_v27 = vld [vmem:[#allocation9 + $0x2a0] sm:$0xff] }
 0x393   :  { %2456 = vmatpush1.bf16.msra.mxu1 %v5713_v28  ;;  %v5039_v28 = vcombine.high %v2532_v22, %v2536_v24 }
 0x394   :  { %2457 = vmatprep.subr.bf16.mxu1 %v5718_v44  ;;  %v5045_v44 = vcombine.high %v2535_v25, %v2539_v23 }
 0x396   :  { %3447 = vmatprep.subr.bf16.mxu0 %v5045_v44 }
 0x397   :  { %2458 = vmatpush1.bf16.msra.mxu1 %v5716_v29  ;;  %v2540_v29 = vld [vmem:[#allocation9 + $0x100] sm:$0xff] }
 0x398   :  { %2459 = vmatprep.subr.bf16.mxu1 %v5721_v30  ;;  %v2544_v30 = vld [vmem:[#allocation9 + $0x120] sm:$0xff] }
 0x39b   :  { %2460 = vmatpush1.bf16.msra.mxu1 %v5719_v21  ;;  %v2543_v21 = vld [vmem:[#allocation9 + $0x118] sm:$0xff] }
 0x39c   :  { %2461 = vmatprep.subr.bf16.mxu1 %v5724_v31  ;;  %v2547_v31 = vld [vmem:[#allocation9 + $0x138] sm:$0xff] }
 0x39f   :  { %2462 = vmatpush1.bf16.msra.mxu1 %v5722_v32  ;;  %v5038_v32 = vcombine.low %v2532_v22, %v2536_v24  ;;  %v2587_v22 = vld [vmem:[#allocation9 + $0x278] sm:$0xff] }
 0x3a0   :  { %2463 = vmatprep.subr.bf16.mxu1 %v5727_v18  ;;  %v5044_v18 = vcombine.low %v2535_v25, %v2539_v23 }
 0x3a2   :  { %3448 = vmatpush1.bf16.msra.mxu0 %v5044_v18  ;;  %v2600_v18 = vld [vmem:[#allocation9 + $0x2e0] sm:$0xff] }
 0x3a3   :  { %2464 = vmatpush1.bf16.msra.mxu1 %v5725_v33  ;;  %v5047_v33 = vcombine.high %v2540_v29, %v2544_v30 }
 0x3a4   :  { %2465 = vmatprep.subr.bf16.mxu1 %v5730_v34  ;;  %v5053_v34 = vcombine.high %v2543_v21, %v2547_v31 }
 0x3a6   :  { %3449 = vmatprep.subr.bf16.mxu0 %v5053_v34 }
 0x3a7   :  { %2466 = vmatpush1.bf16.msra.mxu1 %v5728_v35  ;;  %v2548_v35 = vld [vmem:[#allocation9 + $0x140] sm:$0xff] }
 0x3a8   :  { %2467 = vmatprep.subr.bf16.mxu1 %v5733_v36  ;;  %v2552_v36 = vld [vmem:[#allocation9 + $0x160] sm:$0xff] }
 0x3ab   :  { %2468 = vmatpush1.bf16.msra.mxu1 %v5731_v37  ;;  %v2551_v37 = vld [vmem:[#allocation9 + $0x158] sm:$0xff] }
 0x3ac   :  { %3318 = vmatprep.subr.bf16.mxu1 %v5015_v60 }
 0x461   :  { %v5298_v39 = vpop.f32.mrb[4].mxu1 }
 0x462   :  { %v5299_v41 = vpop.f32.mrb[5].mxu1 }
 0x463   :  { %v5300_v46 = vadd.f32 %v5299_v41, %v5298_v39  ;;  %v5301_v47 = vpop.f32.mrb[6].mxu1  ;;  %v5046_v39 = vcombine.low %v2540_v29, %v2544_v30  ;;  %v5055_v41 = vcombine.high %v2548_v35, %v2552_v36  ;;  %v2595_v29 = vld [vmem:[#allocation9 + $0x2b8] sm:$0xff] }
 0x464   :  { %v5302_v48 = vpop.f32.mrb[7].mxu1  ;;  %v2556_v47 = vld [vmem:[#allocation9 + $0x180] sm:$0xff] }
 0x465   :  { %v2332_v49 = vadd.f32 %v5300_v46, %v4978_v40  ;;  %v5052_v40 = vcombine.low %v2543_v21, %v2547_v31  ;;  %v5061_v46 = vcombine.high %v2551_v37, %v2555_v38  ;;  %v2560_v48 = vld [vmem:[#allocation9 + $0x1a0] sm:$0xff] }
 0x466   :  { %v5062_v60 = vcombine.low %v2556_v47, %v2560_v48 }
 0x467   :  { %v4995_v50 = vmul.f32 -1.442695, %v2332_v49  ;;  %v2559_v49 = vld [vmem:[#allocation9 + $0x198] sm:$0xff]  ;;  %3450 = vmatpush1.bf16.msra.mxu0 %v5052_v40  ;;  %v2608_v40 = vld [vmem:[#allocation9 + $0x320] sm:$0xff] }
 0x468   :  { %3451 = vmatprep.subr.bf16.mxu0 %v5061_v46 }
 0x469   :  { %5966 = vpow2.f32 %v4995_v50  ;;  %v2563_v50 = vld [vmem:[#allocation9 + $0x1b8] sm:$0xff] }
 0x46a   :  { %v5068_v61 = vcombine.low %v2559_v49, %v2563_v50 }
 0x473   :  { %v5967_v51 = vpop.eup %5966 }
 0x474   :  { %v2340_v52 = vadd.f32 1.0, %v5967_v51  ;;  %v5054_v51 = vcombine.low %v2548_v35, %v2552_v36  ;;  %v2603_v35 = vld [vmem:[#allocation9 + $0x2f8] sm:$0xff] }
 0x476   :  { %5968 = vrcp.f32 %v2340_v52  ;;  %v5060_v52 = vcombine.low %v2551_v37, %v2555_v38 }
 0x478   :  { %3452 = vmatpush1.bf16.msra.mxu0 %v5060_v52  ;;  %v2616_v52 = vld [vmem:[#allocation9 + $0x360] sm:$0xff] }
 0x480   :  { %v6517_v53 = vpop.eup %5968 }
 0x481   :  { %2343 = vst [vmem:[%s6638_s17] sm:$0xff] %v6517_v53  ;;  %v2344_v54 = vpack.c.bf16 %v6517_v53, %v6517_v53  ;;  %v4496_v55 = vmul.f32 %v6517_v53, %v6517_v53 }
 0x483   :  { %2486 = vmatmul.mubr.bf16.vlgmr.msra.gmra.mrb[8].mxu1 %v2344_v54  ;;  %4497 = vadd.xlane.f32.xlu0 %v4496_v55  ;;  %v5063_v54 = vcombine.high %v2556_v47, %v2560_v48  ;;  %v5069_v55 = vcombine.high %v2559_v49, %v2563_v50  ;;  %v2611_v47 = vld [vmem:[#allocation9 + $0x338] sm:$0xff] }
 0x484   :  { %3319 = vmatpush1.bf16.msra.mxu1 %v5014_v59  ;;  %v2571_v59 = vld [vmem:[#allocation9 + $0x1f8] sm:$0xff] }
 0x485   :  { %3320 = vmatprep.subr.bf16.mxu1 %v5023_v2  ;;  %3453 = vmatprep.subr.bf16.mxu0 %v5069_v55  ;;  %v5077_v63 = vcombine.high %v2567_v58, %v2571_v59  ;;  %v5076_v1 = vcombine.low %v2567_v58, %v2571_v59  ;;  %v2572_v2 = vld [vmem:[#allocation9 + $0x200] sm:$0xff] }
 0x486   :  { %3454 = vmatpush1.bf16.msra.mxu0 %v5068_v61  ;;  %v5079_v5 = vcombine.high %v2572_v2, %v2576_v3  ;;  %v5078_v8 = vcombine.low %v2572_v2, %v2576_v3  ;;  %v2624_v61 = vld [vmem:[#allocation9 + $0x3a0] sm:$0xff] }
 0x487   :  { %3455 = vmatprep.subr.bf16.mxu0 %v5077_v63  ;;  %v2632_v2 = vld [vmem:[#allocation9 + $0x3e0] sm:$0xff] }
 0x488   :  { %3321 = vmatpush1.bf16.msra.mxu1 %v5022_v13  ;;  %v2580_v13 = vld [vmem:[#allocation9 + $0x240] sm:$0xff] }
 0x489   :  { %3322 = vmatprep.subr.bf16.mxu1 %v5031_v20  ;;  %v2583_v20 = vld [vmem:[#allocation9 + $0x258] sm:$0xff]  ;;  %v5087_v12 = vcombine.high %v2580_v13, %v2584_v16  ;;  %v5086_v24 = vcombine.low %v2580_v13, %v2584_v16 }
 0x48a   :  { %3456 = vmatpush1.bf16.msra.mxu0 %v5076_v1  ;;  %v5092_v25 = vcombine.low %v2583_v20, %v2587_v22  ;;  %v5093_v23 = vcombine.high %v2583_v20, %v2587_v22  ;;  %v2628_v1 = vld [vmem:[#allocation9 + $0x3c0] sm:$0xff]  ;;  %v2509_v20 = vld [vmem:[#allocation9 + $0x8] sm:$0xff] }
 0x48b   :  { %3457 = vmatprep.subr.bf16.mxu0 %v5085_v11  ;;  %v5134_v13 = vcombine.low %v2628_v1, %v2632_v2 }
 0x48c   :  { %3323 = vmatpush1.bf16.msra.mxu1 %v5030_v26  ;;  %v2588_v26 = vld [vmem:[#allocation9 + $0x280] sm:$0xff] }
 0x48d   :  { %3324 = vmatprep.subr.bf16.mxu1 %v5039_v28  ;;  %v2591_v28 = vld [vmem:[#allocation9 + $0x298] sm:$0xff]  ;;  %v5095_v44 = vcombine.high %v2588_v26, %v2592_v27  ;;  %v5094_v30 = vcombine.low %v2588_v26, %v2592_v27 }
 0x48e   :  { %3458 = vmatpush1.bf16.msra.mxu0 %v5084_v9  ;;  %v5100_v21 = vcombine.low %v2591_v28, %v2595_v29  ;;  %v5101_v31 = vcombine.high %v2591_v28, %v2595_v29  ;;  %v5135_v9 = vcombine.high %v2628_v1, %v2632_v2 }
 0x48f   :  { %3459 = vmatprep.subr.bf16.mxu0 %v5093_v23  ;;  %v2361_v23 = vld [vmem:[%s6629_s8] sm:$0x3] }
 0x490   :  { %3325 = vmatpush1.bf16.msra.mxu1 %v5038_v32  ;;  %v2596_v32 = vld [vmem:[#allocation9 + $0x2c0] sm:$0xff]  ;;  %v2366_v26 = vrot.slane %v2361_v23, %v6465_v43  ;;  %v2370_v27 = vrot.slane %v2361_v23, %v6473_v45 }
 0x491   :  { %3326 = vmatprep.subr.bf16.mxu1 %v5047_v33  ;;  %v2599_v33 = vld [vmem:[#allocation9 + $0x2d8] sm:$0xff]  ;;  %v5103_v34 = vcombine.high %v2596_v32, %v2600_v18  ;;  %v5102_v36 = vcombine.low %v2596_v32, %v2600_v18 }
 0x492   :  { %3460 = vmatpush1.bf16.msra.mxu0 %v5092_v25  ;;  %v5108_v37 = vcombine.low %v2599_v33, %v2603_v35  ;;  %v5109_v38 = vcombine.high %v2599_v33, %v2603_v35  ;;  %v6219_v25 = vmov 0.0|0.0  }
 0x493   :  { %3461 = vmatprep.subr.bf16.mxu0 %v5101_v31 }
 0x494   :  { %3327 = vmatpush1.bf16.msra.mxu1 %v5046_v39  ;;  %v2604_v39 = vld [vmem:[#allocation9 + $0x300] sm:$0xff] }
 0x495   :  { %3328 = vmatprep.subr.bf16.mxu1 %v5055_v41  ;;  %v2607_v41 = vld [vmem:[#allocation9 + $0x318] sm:$0xff]  ;;  %v5111_v46 = vcombine.high %v2604_v39, %v2608_v40  ;;  %v5110_v48 = vcombine.low %v2604_v39, %v2608_v40  ;;  %v2517_v40 = vld [vmem:[#allocation9 + $0x48] sm:$0xff] }
 0x496   :  { %3462 = vmatpush1.bf16.msra.mxu0 %v5100_v21  ;;  %v5116_v49 = vcombine.low %v2607_v41, %v2611_v47  ;;  %v5117_v50 = vcombine.high %v2607_v41, %v2611_v47  ;;  %v2521_v41 = vld [vmem:[#allocation9 + $0x68] sm:$0xff] }
 0x497   :  { %3463 = vmatprep.subr.bf16.mxu0 %v5109_v38  ;;  %v4500_v38 = vld [vmem:[#allocation12 + $0x8] sm:$0xff] }
 0x498   :  { %3329 = vmatpush1.bf16.msra.mxu1 %v5054_v51  ;;  %v2612_v51 = vld [vmem:[#allocation9 + $0x340] sm:$0xff] }
 0x499   :  { %3330 = vmatprep.subr.bf16.mxu1 %v5063_v54  ;;  %v2615_v54 = vld [vmem:[#allocation9 + $0x358] sm:$0xff]  ;;  %v5119_v55 = vcombine.high %v2612_v51, %v2616_v52  ;;  %v5118_v57 = vcombine.low %v2612_v51, %v2616_v52  ;;  %v4501_v51 = vld [vmem:[#allocation12 + $0x10] sm:$0xff] }
 0x49a   :  { %3464 = vmatpush1.bf16.msra.mxu0 %v5108_v37  ;;  %v5124_v58 = vcombine.low %v2615_v54, %v2619_v56  ;;  %v5125_v59 = vcombine.high %v2615_v54, %v2619_v56  ;;  %v4499_v37 = vld [vmem:[#allocation12] sm:$0xff]  ;;  %v4502_v52 = vld [vmem:[#allocation12 + $0x18] sm:$0xff]  ;;  %v2525_v54 = vld [vmem:[#allocation9 + $0x88] sm:$0xff]  ;;  %v5024_v56 = vcombine.low %v2517_v40, %v2521_v41 }
 0x49b   :  { %3465 = vmatprep.subr.bf16.mxu0 %v5117_v50  ;;  %v5025_v50 = vcombine.high %v2517_v40, %v2521_v41  ;;  %v2577_v40 = vld [vmem:[#allocation9 + $0x228] sm:$0xff] }
 0x49c   :  { %3331 = vmatpush1.bf16.msra.mxu1 %v5062_v60  ;;  %v2620_v60 = vld [vmem:[#allocation9 + $0x380] sm:$0xff] }
 0x49d   :  { %3332 = vmatprep.subr.bf16.mxu1 %v5071_v62  ;;  %v2623_v62 = vld [vmem:[#allocation9 + $0x398] sm:$0xff]  ;;  %v5127_v63 = vcombine.high %v2620_v60, %v2624_v61  ;;  %v5126_v3 = vcombine.low %v2620_v60, %v2624_v61  ;;  %v4504_v60 = vld [vmem:[#allocation12 + $0x28] sm:$0xff] }
 0x49e   :  { %3466 = vmatpush1.bf16.msra.mxu0 %v5116_v49  ;;  %v2533_v61 = vld [vmem:[#allocation9 + $0xc8] sm:$0xff] }
 0x49f   :  { %3467 = vmatprep.subr.bf16.mxu0 %v5125_v59  ;;  %v4503_v59 = vld [vmem:[#allocation12 + $0x20] sm:$0xff] }
 0x4a0   :  { %3333 = vmatpush1.bf16.msra.mxu1 %v5070_v0  ;;  %v2627_v0 = vld [vmem:[#allocation9 + $0x3b8] sm:$0xff]  ;;  %v5415_v1 = vpack.c.bf16 %v4504_v60, %v4503_v59  ;;  %v2597_v59 = vld [vmem:[#allocation9 + $0x2c8] sm:$0xff] }
 0x4a1   :  { %3334 = vmatprep.subr.bf16.mxu1 %v5079_v5  ;;  %v5133_v4 = vcombine.high %v2623_v62, %v2627_v0  ;;  %v2631_v5 = vld [vmem:[#allocation9 + $0x3d8] sm:$0xff]  ;;  %v2601_v60 = vld [vmem:[#allocation9 + $0x2e8] sm:$0xff] }
 0x4a2   :  { %3468 = vmatpush1.bf16.msra.mxu0 %v5124_v58  ;;  %v5141_v11 = vcombine.high %v2631_v5, %v2635_v7  ;;  %v5140_v16 = vcombine.low %v2631_v5, %v2635_v7  ;;  %v2541_v5 = vld [vmem:[#allocation9 + $0x108] sm:$0xff] }
 0x4a3   :  { %3469 = vmatprep.subr.bf16.mxu0 %v5133_v4  ;;  %v4506_v4 = vld [vmem:[#allocation12 + $0x38] sm:$0xff]  ;;  %v2545_v7 = vld [vmem:[#allocation9 + $0x128] sm:$0xff] }
 0x4a4   :  { %3335 = vmatpush1.bf16.msra.mxu1 %v5078_v8  ;;  %v5132_v8 = vcombine.low %v2623_v62, %v2627_v0  ;;  %v2537_v62 = vld [vmem:[#allocation9 + $0xe8] sm:$0xff] }
 0x4a5   :  { %3336 = vmatprep.subr.bf16.mxu1 %v5087_v12  ;;  %v2513_v12 = vld [vmem:[#allocation9 + $0x28] sm:$0xff]  ;;  %v5041_v2 = vcombine.high %v2533_v61, %v2537_v62 }
 0x4a6   :  { %3470 = vmatpush1.bf16.msra.mxu0 %v5132_v8  ;;  %v5017_v22 = vcombine.high %v2509_v20, %v2513_v12  ;;  %v5040_v8 = vcombine.low %v2533_v61, %v2537_v62  ;;  %v5105_v62 = vcombine.high %v2597_v59, %v2601_v60 }
 0x4a7   :  { %3471 = vmatprep.subr.bf16.mxu0 %v5141_v11  ;;  %v5049_v11 = vcombine.high %v2541_v5, %v2545_v7 }
 0x4a8   :  { %3337 = vmatpush1.bf16.msra.mxu1 %v5086_v24  ;;  %v5016_v24 = vcombine.low %v2509_v20, %v2513_v12  ;;  %v2549_v20 = vld [vmem:[#allocation9 + $0x148] sm:$0xff] }
 0x4a9   :  { %3338 = vmatprep.subr.bf16.mxu1 %v5095_v44  ;;  %v2553_v12 = vld [vmem:[#allocation9 + $0x168] sm:$0xff] }
 0x4aa   :  { %3472 = vmatpush1.bf16.msra.mxu0 %v5140_v16  ;;  %v4508_v16 = vld [vmem:[#allocation12 + $0x48] sm:$0xff]  ;;  %v5057_v23 = vcombine.high %v2549_v20, %v2553_v12 }
 0x4ab   :  { %5408 = vmatprep.subr.bf16.mxu0 %v6219_v25 }
 0x4ac   :  { %3339 = vmatpush1.bf16.msra.mxu1 %v5094_v30 }
 0x4ad   :  { %3340 = vmatprep.subr.bf16.mxu1 %v5103_v34 }
 0x4b0   :  { %3341 = vmatpush1.bf16.msra.mxu1 %v5102_v36 }
 0x4b1   :  { %3342 = vmatprep.subr.bf16.mxu1 %v5111_v46 }
 0x4b4   :  { %3343 = vmatpush1.bf16.msra.mxu1 %v5110_v48  ;;  %v5409_v48 = vpack.c.bf16 %v4500_v38, %v4499_v37  ;;  %v4513_v37 = vld [vmem:[#allocation12 + $0x70] sm:$0xff]  ;;  %v4514_v38 = vld [vmem:[#allocation12 + $0x78] sm:$0xff] }
 0x4b5   :  { %3344 = vmatprep.subr.bf16.mxu1 %v5119_v55  ;;  %v2529_v55 = vld [vmem:[#allocation9 + $0xa8] sm:$0xff] }
 0x4b6   :  { %v5033_v58 = vcombine.high %v2525_v54, %v2529_v55  ;;  %v5032_v0 = vcombine.low %v2525_v54, %v2529_v55  ;;  %v2589_v55 = vld [vmem:[#allocation9 + $0x288] sm:$0xff] }
 0x4b8   :  { %3345 = vmatpush1.bf16.msra.mxu1 %v5118_v57  ;;  %v5412_v57 = vpack.c.bf16 %v4502_v52, %v4501_v51  ;;  %v2585_v51 = vld [vmem:[#allocation9 + $0x268] sm:$0xff] }
 0x4b9   :  { %3346 = vmatprep.subr.bf16.mxu1 %v5127_v63  ;;  %v6221_v63 = vmov 0.0  }
 0x4bc   :  { %3347 = vmatpush1.bf16.msra.mxu1 %v5126_v3  ;;  %v4505_v3 = vld [vmem:[#allocation12 + $0x30] sm:$0xff] }
 0x4bd   :  { %3348 = vmatprep.subr.bf16.mxu1 %v5135_v9  ;;  %v5418_v9 = vpack.c.bf16 %v4506_v4, %v4505_v3  ;;  %v2617_v4 = vld [vmem:[#allocation9 + $0x368] sm:$0xff] }
 0x4c0   :  { %3349 = vmatpush1.bf16.msra.mxu1 %v5134_v13  ;;  %v4507_v13 = vld [vmem:[#allocation12 + $0x40] sm:$0xff] }
 0x4c1   :  { %3359 = vmatprep.subr.bf16.mxu1 %v5017_v22  ;;  %v5048_v22 = vcombine.low %v2541_v5, %v2545_v7  ;;  %v2621_v7 = vld [vmem:[#allocation9 + $0x388] sm:$0xff] }
 0x556   :  { %v2487_v28 = vpop.f32.mrb[8].mxu1 }
 0x557   :  { %v2488_v44 = vadd.f32 %v2487_v28, %v2366_v26  ;;  %v2489_v29 = vpop.f32.mrb[9].mxu1  ;;  %v4509_v26 = vld [vmem:[#allocation12 + $0x50] sm:$0xff]  ;;  %v2557_v28 = vld [vmem:[#allocation9 + $0x188] sm:$0xff] }
 0x558   :  { %v2490_v30 = vadd.f32 %v2489_v29, %v2370_v27  ;;  %v2491_v21 = vpop.f32.mrb[10].mxu1  ;;  %v4510_v27 = vld [vmem:[#allocation12 + $0x58] sm:$0xff]  ;;  %v5056_v29 = vcombine.low %v2549_v20, %v2553_v12 }
 0x559   :  { %v5012_v31 = vmul.f32 -1.442695, %v2488_v44  ;;  %v2492_v32 = vpop.f32.mrb[11].mxu1  ;;  %v2561_v44 = vld [vmem:[#allocation9 + $0x1a8] sm:$0xff] }
 0x55a   :  { %v5013_v18 = vmul.f32 -1.442695, %v2490_v30  ;;  %v5424_v30 = vpack.c.bf16 %v4510_v27, %v4509_v26  ;;  %v5065_v21 = vcombine.high %v2557_v28, %v2561_v44  ;;  %v4512_v32 = vld [vmem:[#allocation12 + $0x68] sm:$0xff]  ;;  %v2518_v27 = vld [vmem:[#allocation9 + $0x50] sm:$0xff] }
 0x55b   :  { %5970 = vpow2.f32 %v5012_v31  ;;  %v4511_v31 = vld [vmem:[#allocation12 + $0x60] sm:$0xff] }
 0x55c   :  { %5972 = vpow2.f32 %v5013_v18  ;;  %v2565_v18 = vld [vmem:[#allocation9 + $0x1c8] sm:$0xff] }
 0x565   :  { %v5971_v33 = vpop.eup %5970 }
 0x566   :  { %v5973_v34 = vpop.eup %5972  ;;  %v2500_v35 = vadd.f32 1.0, %v5971_v33  ;;  %v2569_v33 = vld [vmem:[#allocation9 + $0x1e8] sm:$0xff] }
 0x567   :  { %v2501_v36 = vadd.f32 1.0, %v5973_v34  ;;  %v5064_v34 = vcombine.low %v2557_v28, %v2561_v44  ;;  %v5072_v41 = vcombine.low %v2565_v18, %v2569_v33  ;;  %v2522_v28 = vld [vmem:[#allocation9 + $0x70] sm:$0xff] }
 0x568   :  { %5974 = vrcp.f32 %v2500_v35  ;;  %v5427_v35 = vpack.c.bf16 %v4512_v32, %v4511_v31  ;;  %v5026_v31 = vcombine.low %v2518_v27, %v2522_v28 }
 0x569   :  { %5976 = vrcp.f32 %v2501_v36  ;;  %v5073_v36 = vcombine.high %v2565_v18, %v2569_v33  ;;  %v2534_v18 = vld [vmem:[#allocation9 + $0xd0] sm:$0xff] }
 0x56a   :  { %v2538_v33 = vld [vmem:[#allocation9 + $0xf0] sm:$0xff] }
 0x572   :  { %v5975_v39 = vpop.eup %5974 }
 0x573   :  { %v5977_v46 = vpop.eup %5976  ;;  %v6535_v49 = vpack.c.bf16 %v5975_v39, %v5975_v39  ;;  %v2573_v39 = vld [vmem:[#allocation9 + $0x208] sm:$0xff] }
 0x574   :  { %v6533_v47 = vpack.c.bf16 %v5977_v46, %v5977_v46  ;;  %v5430_v46 = vpack.c.bf16 %v4514_v38, %v4513_v37  ;;  %v5080_v52 = vcombine.low %v2573_v39, %v2577_v40  ;;  %v2546_v37 = vld [vmem:[#allocation9 + $0x130] sm:$0xff]  ;;  %v5042_v38 = vcombine.low %v2534_v18, %v2538_v33 }
 0x576   :  { %3350 = vmatprep.mubr.bf16.mxu1 %v6533_v47  ;;  %3473 = vmatprep.mubr.bf16.mxu0 %v6533_v47 }
 0x577   :  { %3351 = vmatmul.mubr.bf16.vlgmr.msra.gmra.mrb[12].mxu1 %v6535_v49  ;;  %3474 = vmatmul.mubr.bf16.vlgmr.msra.gmra.mrb[16].mxu0 %v6535_v49 }
 0x578   :  { %3360 = vmatpush1.bf16.msra.mxu1 %v5016_v24  ;;  %5410 = vmatpush3.bf16.msra.mxu0 %v5409_v48  ;;  %v5421_v24 = vpack.c.bf16 %v4508_v16, %v4507_v13  ;;  %v5081_v48 = vcombine.high %v2573_v39, %v2577_v40  ;;  %v2629_v13 = vld [vmem:[#allocation9 + $0x3c8] sm:$0xff]  ;;  %v2550_v40 = vld [vmem:[#allocation9 + $0x150] sm:$0xff] }
 0x579   :  { %3391 = vmatprep.mubr.bf16.mxu1 %v6533_v47  ;;  %3361 = vmatprep.subr.bf16.mxu1 %v5025_v50  ;;  %v2581_v50 = vld [vmem:[#allocation9 + $0x248] sm:$0xff] }
 0x57a   :  { %5411 = vmatprep.subr.bf16.mxu0 %v6219_v25  ;;  %5370 = vmatprep.mubr.msk.f32.mxu0 %vm6220_vm0, %v6221_v63  ;;  %v5089_v54 = vcombine.high %v2581_v50, %v2585_v51  ;;  %v2633_v16 = vld [vmem:[#allocation9 + $0x3e8] sm:$0xff] }
 0x57b   :  { %v5137_v12 = vcombine.high %v2629_v13, %v2633_v16 }
 0x57c   :  { %3362 = vmatpush1.bf16.msra.mxu1 %v5024_v56  ;;  %5413 = vmatpush3.bf16.msra.mxu0 %v5412_v57  ;;  %v2593_v56 = vld [vmem:[#allocation9 + $0x2a8] sm:$0xff]  ;;  %v5088_v57 = vcombine.low %v2581_v50, %v2585_v51  ;;  %v2562_v50 = vld [vmem:[#allocation9 + $0x1b0] sm:$0xff] }
 0x57d   :  { %3363 = vmatprep.subr.bf16.mxu1 %v5033_v58  ;;  %5414 = vmatprep.subr.bf16.mxu0 %v6219_v25  ;;  %v5097_v58 = vcombine.high %v2589_v55, %v2593_v56  ;;  %v5096_v61 = vcombine.low %v2589_v55, %v2593_v56  ;;  %v2570_v55 = vld [vmem:[#allocation9 + $0x1f0] sm:$0xff] }
 0x580   :  { %3364 = vmatpush1.bf16.msra.mxu1 %v5032_v0  ;;  %5416 = vmatpush3.bf16.msra.mxu0 %v5415_v1  ;;  %v2605_v0 = vld [vmem:[#allocation9 + $0x308] sm:$0xff] }
 0x581   :  { %3365 = vmatprep.subr.bf16.mxu1 %v5041_v2  ;;  %5417 = vmatprep.subr.bf16.mxu0 %v6219_v25  ;;  %v2609_v1 = vld [vmem:[#allocation9 + $0x328] sm:$0xff]  ;;  %v5104_v2 = vcombine.low %v2597_v59, %v2601_v60  ;;  %v2578_v59 = vld [vmem:[#allocation9 + $0x230] sm:$0xff] }
 0x582   :  { %v5113_v3 = vcombine.high %v2605_v0, %v2609_v1  ;;  %v5112_v5 = vcombine.low %v2605_v0, %v2609_v1  ;;  %v2586_v0 = vld [vmem:[#allocation9 + $0x270] sm:$0xff]  ;;  %v4597_v1 = vld [vmem:[#allocation13] sm:$0xff] }
 0x584   :  { %3366 = vmatpush1.bf16.msra.mxu1 %v5040_v8  ;;  %5419 = vmatpush3.bf16.msra.mxu0 %v5418_v9  ;;  %v2625_v8 = vld [vmem:[#allocation9 + $0x3a8] sm:$0xff] }
 0x585   :  { %3367 = vmatprep.subr.bf16.mxu1 %v5049_v11  ;;  %5420 = vmatprep.subr.bf16.mxu0 %v6219_v25  ;;  %v5129_v11 = vcombine.high %v2621_v7, %v2625_v8  ;;  %v5128_v20 = vcombine.low %v2621_v7, %v2625_v8  ;;  %v4599_v7 = vld [vmem:[#allocation13 + $0x10] sm:$0xff]  ;;  %v4600_v8 = vld [vmem:[#allocation13 + $0x18] sm:$0xff] }
 0x588   :  { %3368 = vmatpush1.bf16.msra.mxu1 %v5048_v22  ;;  %5422 = vmatpush3.bf16.msra.mxu0 %v5421_v24  ;;  %v2510_v22 = vld [vmem:[#allocation9 + $0x10] sm:$0xff] }
 0x589   :  { %3369 = vmatprep.subr.bf16.mxu1 %v5057_v23  ;;  %5423 = vmatprep.subr.bf16.mxu0 %v6219_v25  ;;  %v2514_v24 = vld [vmem:[#allocation9 + $0x30] sm:$0xff]  ;;  %v5136_v23 = vcombine.low %v2629_v13, %v2633_v16 }
 0x58a   :  { %v5019_v26 = vcombine.high %v2510_v22, %v2514_v24  ;;  %v5018_v44 = vcombine.low %v2510_v22, %v2514_v24  ;;  %v2598_v16 = vld [vmem:[#allocation9 + $0x2d0] sm:$0xff]  ;;  %v4602_v22 = vld [vmem:[#allocation13 + $0x28] sm:$0xff] }
 0x58c   :  { %3370 = vmatpush1.bf16.msra.mxu1 %v5056_v29  ;;  %5425 = vmatpush3.bf16.msra.mxu0 %v5424_v30  ;;  %v5027_v29 = vcombine.high %v2518_v27, %v2522_v28  ;;  %v2526_v30 = vld [vmem:[#allocation9 + $0x90] sm:$0xff] }
 0x58d   :  { %3371 = vmatprep.subr.bf16.mxu1 %v5065_v21  ;;  %5426 = vmatprep.subr.bf16.mxu0 %v6219_v25  ;;  %v2530_v21 = vld [vmem:[#allocation9 + $0xb0] sm:$0xff] }
 0x58e   :  { %v5035_v32 = vcombine.high %v2526_v30, %v2530_v21  ;;  %v2606_v27 = vld [vmem:[#allocation9 + $0x310] sm:$0xff] }
 0x58f   :  { %v2610_v28 = vld [vmem:[#allocation9 + $0x330] sm:$0xff] }
 0x590   :  { %3372 = vmatpush1.bf16.msra.mxu1 %v5064_v34  ;;  %5428 = vmatpush3.bf16.msra.mxu0 %v5427_v35  ;;  %v5034_v34 = vcombine.low %v2526_v30, %v2530_v21  ;;  %v5043_v35 = vcombine.high %v2534_v18, %v2538_v33  ;;  %v5115_v18 = vcombine.high %v2606_v27, %v2610_v28  ;;  %v2614_v33 = vld [vmem:[#allocation9 + $0x350] sm:$0xff] }
 0x591   :  { %3373 = vmatprep.subr.bf16.mxu1 %v5073_v36  ;;  %5429 = vmatprep.subr.bf16.mxu0 %v6219_v25  ;;  %v2542_v36 = vld [vmem:[#allocation9 + $0x110] sm:$0xff] }
 0x592   :  { %v5051_v39 = vcombine.high %v2542_v36, %v2546_v37 }
 0x594   :  { %3374 = vmatpush1.bf16.msra.mxu1 %v5072_v41  ;;  %5431 = vmatpush3.bf16.msra.mxu0 %v5430_v46  ;;  %v2554_v41 = vld [vmem:[#allocation9 + $0x170] sm:$0xff]  ;;  %v5050_v46 = vcombine.low %v2542_v36, %v2546_v37  ;;  %v4608_v37 = vld [vmem:[#allocation13 + $0x58] sm:$0xff] }
 0x595   :  { %3375 = vmatprep.subr.bf16.mxu1 %v5081_v48  ;;  %5432 = vmatprep.subr.bf16.mxu0 %v6219_v25  ;;  %v2558_v48 = vld [vmem:[#allocation9 + $0x190] sm:$0xff]  ;;  %v5058_v51 = vcombine.low %v2550_v40, %v2554_v41 }
 0x596   :  { %v5066_v56 = vcombine.low %v2558_v48, %v2562_v50  ;;  %v4607_v36 = vld [vmem:[#allocation13 + $0x50] sm:$0xff] }
 0x597   :  { %5371 = vmatmul.mubr.f32.vlgmr.msra.gmra.mrb[20].mxu0 %v6517_v53  ;;  %v2613_v53 = vld [vmem:[#allocation9 + $0x348] sm:$0xff] }
 0x598   :  { %3376 = vmatpush1.bf16.msra.mxu1 %v5080_v52  ;;  %5405 = vmatprep.mubr.msk.f32.mxu0 %vm6220_vm0, %v6221_v63  ;;  %v5121_v63 = vcombine.high %v2613_v53, %v2617_v4  ;;  %v5120_v9 = vcombine.low %v2613_v53, %v2617_v4  ;;  %v5067_v52 = vcombine.high %v2558_v48, %v2562_v50  ;;  %v2630_v50 = vld [vmem:[#allocation9 + $0x3d0] sm:$0xff] }
 0x599   :  { %3377 = vmatprep.subr.bf16.mxu1 %v5089_v54  ;;  %v2566_v54 = vld [vmem:[#allocation9 + $0x1d0] sm:$0xff] }
 0x59a   :  { %v5074_v60 = vcombine.low %v2566_v54, %v2570_v55 }
 0x59c   :  { %3378 = vmatpush1.bf16.msra.mxu1 %v5088_v57  ;;  %v5075_v57 = vcombine.high %v2566_v54, %v2570_v55  ;;  %v4610_v54 = vld [vmem:[#allocation13 + $0x68] sm:$0xff] }
 0x59d   :  { %3379 = vmatprep.subr.bf16.mxu1 %v5097_v58  ;;  %v2574_v58 = vld [vmem:[#allocation9 + $0x210] sm:$0xff] }
 0x59e   :  { %v5082_v53 = vcombine.low %v2574_v58, %v2578_v59 }
 0x5a0   :  { %3380 = vmatpush1.bf16.msra.mxu1 %v5096_v61  ;;  %v5083_v61 = vcombine.high %v2574_v58, %v2578_v59  ;;  %v4611_v58 = vld [vmem:[#allocation13 + $0x70] sm:$0xff]  ;;  %v4612_v59 = vld [vmem:[#allocation13 + $0x78] sm:$0xff] }
 0x5a1   :  { %3381 = vmatprep.subr.bf16.mxu1 %v5105_v62  ;;  %v2582_v62 = vld [vmem:[#allocation9 + $0x250] sm:$0xff] }
 0x5a2   :  { %v5091_v4 = vcombine.high %v2582_v62, %v2586_v0 }
 0x5a4   :  { %3382 = vmatpush1.bf16.msra.mxu1 %v5104_v2  ;;  %v4598_v2 = vld [vmem:[#allocation13 + $0x8] sm:$0xff] }
 0x5a5   :  { %3383 = vmatprep.subr.bf16.mxu1 %v5113_v3  ;;  %v5433_v3 = vpack.c.bf16 %v4598_v2, %v4597_v1  ;;  %v5739_v1 = vld [vmem:[#allocation10 + $0x14] ss:$8 sps:$4 sm:$0xff]   ;;  %v5737_v2 = vld [vmem:[#allocation10 + $0x10] ss:$8 sps:$4 sm:$0xff]  }
 0x5a7   :  { %5434 = vmatpush3.bf16.msra.mxu0 %v5433_v3  ;;  %v5742_v3 = vld [vmem:[#allocation10 + $0x24] ss:$8 sps:$4 sm:$0xff]  }
 0x5a8   :  { %3384 = vmatpush1.bf16.msra.mxu1 %v5112_v5  ;;  %v2590_v5 = vld [vmem:[#allocation9 + $0x290] sm:$0xff]  ;;  %5435 = vmatprep.subr.bf16.mxu0 %v6219_v25 }
 0x5a9   :  { %3385 = vmatprep.subr.bf16.mxu1 %v5121_v63  ;;  %v2594_v63 = vld [vmem:[#allocation9 + $0x2b0] sm:$0xff] }
 0x5aa   :  { %v5099_v13 = vcombine.high %v2590_v5, %v2594_v63 }
 0x5ac   :  { %3386 = vmatpush1.bf16.msra.mxu1 %v5120_v9  ;;  %v5436_v9 = vpack.c.bf16 %v4600_v8, %v4599_v7  ;;  %v5751_v7 = vld [vmem:[#allocation10 + $0x54] ss:$8 sps:$4 sm:$0xff]   ;;  %v5749_v8 = vld [vmem:[#allocation10 + $0x50] ss:$8 sps:$4 sm:$0xff]  }
 0x5ad   :  { %3387 = vmatprep.subr.bf16.mxu1 %v5129_v11  ;;  %v5090_v11 = vcombine.low %v2582_v62, %v2586_v0  ;;  %v5736_v62 = vld [vmem:[#allocation10 + $0x4] ss:$8 sps:$4 sm:$0xff]   ;;  %v5734_v0 = vld [vmem:[#allocation10] ss:$8 sps:$4 sm:$0xff]  }
 0x5ae   :  { %5437 = vmatpush3.bf16.msra.mxu0 %v5436_v9  ;;  %v5752_v9 = vld [vmem:[#allocation10 + $0x60] ss:$8 sps:$4 sm:$0xff]  }
 0x5af   :  { %5438 = vmatprep.subr.bf16.mxu0 %v6219_v25 }
 0x5b0   :  { %3388 = vmatpush1.bf16.msra.mxu1 %v5128_v20  ;;  %v2602_v20 = vld [vmem:[#allocation9 + $0x2f0] sm:$0xff] }
 0x5b1   :  { %3389 = vmatprep.subr.bf16.mxu1 %v5137_v12  ;;  %v4601_v12 = vld [vmem:[#allocation13 + $0x20] sm:$0xff]  ;;  %v5106_v21 = vcombine.low %v2598_v16, %v2602_v20 }
 0x5b2   :  { %v5439_v24 = vpack.c.bf16 %v4602_v22, %v4601_v12  ;;  %v5763_v12 = vld [vmem:[#allocation10 + $0x94] ss:$8 sps:$4 sm:$0xff]   ;;  %v5761_v22 = vld [vmem:[#allocation10 + $0x90] ss:$8 sps:$4 sm:$0xff]  }
 0x5b4   :  { %3390 = vmatpush1.bf16.msra.mxu1 %v5136_v23  ;;  %v5098_v23 = vcombine.low %v2590_v5, %v2594_v63  ;;  %5440 = vmatpush3.bf16.msra.mxu0 %v5439_v24  ;;  %v5748_v5 = vld [vmem:[#allocation10 + $0x44] ss:$8 sps:$4 sm:$0xff]   ;;  %v5746_v63 = vld [vmem:[#allocation10 + $0x40] ss:$8 sps:$4 sm:$0xff]  }
 0x5b5   :  { %3400 = vmatprep.subr.bf16.mxu1 %v5019_v26  ;;  %v5107_v26 = vcombine.high %v2598_v16, %v2602_v20  ;;  %5441 = vmatprep.subr.bf16.mxu0 %v6219_v25  ;;  %v5760_v16 = vld [vmem:[#allocation10 + $0x84] ss:$8 sps:$4 sm:$0xff]   ;;  %v5758_v20 = vld [vmem:[#allocation10 + $0x80] ss:$8 sps:$4 sm:$0xff]  }
 0x5b6   :  { %v5766_v24 = vld [vmem:[#allocation10 + $0xa4] ss:$8 sps:$4 sm:$0xff]  }
 0x5b7   :  { %3392 = vmatmul.mubr.bf16.vlgmr.msra.gmra.mrb[16].mxu1 %v6535_v49 }
 0x5b8   :  { %3401 = vmatpush1.bf16.msra.mxu1 %v5018_v44  ;;  %3432 = vmatprep.mubr.bf16.mxu1 %v6533_v47  ;;  %v5059_v47 = vcombine.high %v2550_v40, %v2554_v41  ;;  %v4603_v44 = vld [vmem:[#allocation13 + $0x30] sm:$0xff]  ;;  %v5448_v40 = vpack.c.bf16 %v4608_v37, %v4607_v36 }
 0x5b9   :  { %3402 = vmatprep.subr.bf16.mxu1 %v5027_v29  ;;  %v4604_v29 = vld [vmem:[#allocation13 + $0x38] sm:$0xff]  ;;  %v2622_v41 = vld [vmem:[#allocation9 + $0x390] sm:$0xff] }
 0x5ba   :  { %v5442_v30 = vpack.c.bf16 %v4604_v29, %v4603_v44  ;;  %v5770_v44 = vld [vmem:[#allocation10 + $0xc0] ss:$8 sps:$4 sm:$0xff]   ;;  %v5775_v29 = vld [vmem:[#allocation10 + $0xd4] ss:$8 sps:$4 sm:$0xff]  }
 0x5bc   :  { %3403 = vmatpush1.bf16.msra.mxu1 %v5026_v31  ;;  %v4605_v31 = vld [vmem:[#allocation13 + $0x40] sm:$0xff]  ;;  %5443 = vmatpush3.bf16.msra.mxu0 %v5442_v30  ;;  %v5773_v30 = vld [vmem:[#allocation10 + $0xd0] ss:$8 sps:$4 sm:$0xff]  }
 0x5bd   :  { %3404 = vmatprep.subr.bf16.mxu1 %v5035_v32  ;;  %v4606_v32 = vld [vmem:[#allocation13 + $0x48] sm:$0xff]  ;;  %5444 = vmatprep.subr.bf16.mxu0 %v6219_v25 }
 0x5c0   :  { %3405 = vmatpush1.bf16.msra.mxu1 %v5034_v34  ;;  %v5445_v34 = vpack.c.bf16 %v4606_v32, %v4605_v31  ;;  %v5776_v31 = vld [vmem:[#allocation10 + $0xe0] ss:$8 sps:$4 sm:$0xff]   ;;  %v5781_v32 = vld [vmem:[#allocation10 + $0xf4] ss:$8 sps:$4 sm:$0xff]  }
 0x5c1   :  { %3406 = vmatprep.subr.bf16.mxu1 %v5043_v35  ;;  %v2618_v35 = vld [vmem:[#allocation9 + $0x370] sm:$0xff] }
 0x5c2   :  { %5446 = vmatpush3.bf16.msra.mxu0 %v5445_v34  ;;  %v6568_v34 = vld [vmem:[%s6631_s10] sm:$0xff] }
 0x5c3   :  { %5447 = vmatprep.subr.bf16.mxu0 %v6219_v25  ;;  %v2645_v36 = vrot.slane %v6568_v34, %v6473_v45 }
 0x5c4   :  { %3407 = vmatpush1.bf16.msra.mxu1 %v5042_v38  ;;  %v5114_v38 = vcombine.low %v2606_v27, %v2610_v28  ;;  %v5767_v27 = vld [vmem:[#allocation10 + $0xb0] ss:$8 sps:$4 sm:$0xff]   ;;  %v5772_v28 = vld [vmem:[#allocation10 + $0xc4] ss:$8 sps:$4 sm:$0xff]  }
 0x5c5   :  { %3408 = vmatprep.subr.bf16.mxu1 %v5051_v39  ;;  %v5123_v39 = vcombine.high %v2614_v33, %v2618_v35 }
 0x5c6   :  { %5449 = vmatpush3.bf16.msra.mxu0 %v5448_v40 }
 0x5c7   :  { %5450 = vmatprep.subr.bf16.mxu0 %v6219_v25 }
 0x5c8   :  { %3409 = vmatpush1.bf16.msra.mxu1 %v5050_v46  ;;  %v2626_v46 = vld [vmem:[#allocation9 + $0x3b0] sm:$0xff] }
 0x5c9   :  { %3410 = vmatprep.subr.bf16.mxu1 %v5059_v47  ;;  %v5122_v47 = vcombine.low %v2614_v33, %v2618_v35  ;;  %v5131_v48 = vcombine.high %v2622_v41, %v2626_v46  ;;  %v5784_v33 = vld [vmem:[#allocation10 + $0x104] ss:$8 sps:$4 sm:$0xff]   ;;  %v2641_v35 = vrot.slane %v6568_v34, %v6465_v43 }
 0x5cc   :  { %3411 = vmatpush1.bf16.msra.mxu1 %v5058_v51  ;;  %v2634_v51 = vld [vmem:[#allocation9 + $0x3f0] sm:$0xff] }
 0x5cd   :  { %3412 = vmatprep.subr.bf16.mxu1 %v5067_v52  ;;  %v4609_v52 = vld [vmem:[#allocation13 + $0x60] sm:$0xff] }
 0x5ce   :  { %v5451_v55 = vpack.c.bf16 %v4610_v54, %v4609_v52 }
 0x5d0   :  { %3413 = vmatpush1.bf16.msra.mxu1 %v5066_v56  ;;  %v5130_v56 = vcombine.low %v2622_v41, %v2626_v46  ;;  %5452 = vmatpush3.bf16.msra.mxu0 %v5451_v55 }
 0x5d1   :  { %3414 = vmatprep.subr.bf16.mxu1 %v5075_v57  ;;  %v5139_v57 = vcombine.high %v2630_v50, %v2634_v51  ;;  %5453 = vmatprep.subr.bf16.mxu0 %v6219_v25  ;;  %v5740_v25 = vld [vmem:[#allocation10 + $0x20] ss:$8 sps:$4 sm:$0xff]  }
 0x5d4   :  { %3415 = vmatpush1.bf16.msra.mxu1 %v5074_v60  ;;  %v5454_v60 = vpack.c.bf16 %v4612_v59, %v4611_v58 }
 0x5d5   :  { %3416 = vmatprep.subr.bf16.mxu1 %v5083_v61  ;;  %v5138_v61 = vcombine.low %v2630_v50, %v2634_v51 }
 0x5d6   :  { %5455 = vmatpush3.bf16.msra.mxu0 %v5454_v60 }
 0x5d8   :  { %3417 = vmatpush1.bf16.msra.mxu1 %v5082_v53  ;;  %v5745_v53 = vld [vmem:[#allocation10 + $0x34] ss:$8 sps:$4 sm:$0xff]  }
 0x5d9   :  { %3418 = vmatprep.subr.bf16.mxu1 %v5091_v4  ;;  %v5743_v4 = vld [vmem:[#allocation10 + $0x30] ss:$8 sps:$4 sm:$0xff]  }
 0x5dc   :  { %3419 = vmatpush1.bf16.msra.mxu1 %v5090_v11  ;;  %v5757_v11 = vld [vmem:[#allocation10 + $0x74] ss:$8 sps:$4 sm:$0xff]  }
 0x5dd   :  { %3420 = vmatprep.subr.bf16.mxu1 %v5099_v13  ;;  %v5755_v13 = vld [vmem:[#allocation10 + $0x70] ss:$8 sps:$4 sm:$0xff]  }
 0x5e0   :  { %3421 = vmatpush1.bf16.msra.mxu1 %v5098_v23  ;;  %v5764_v23 = vld [vmem:[#allocation10 + $0xa0] ss:$8 sps:$4 sm:$0xff]  }
 0x5e1   :  { %3422 = vmatprep.subr.bf16.mxu1 %v5107_v26  ;;  %v5769_v26 = vld [vmem:[#allocation10 + $0xb4] ss:$8 sps:$4 sm:$0xff]  }
 0x5e4   :  { %3423 = vmatpush1.bf16.msra.mxu1 %v5106_v21  ;;  %v5778_v21 = vld [vmem:[#allocation10 + $0xe4] ss:$8 sps:$4 sm:$0xff]  }
 0x5e5   :  { %3424 = vmatprep.subr.bf16.mxu1 %v5115_v18  ;;  %v5779_v18 = vld [vmem:[#allocation10 + $0xf0] ss:$8 sps:$4 sm:$0xff]  }
 0x5e8   :  { %3425 = vmatpush1.bf16.msra.mxu1 %v5114_v38 }
 0x5e9   :  { %3426 = vmatprep.subr.bf16.mxu1 %v5123_v39 }
 0x5ec   :  { %3427 = vmatpush1.bf16.msra.mxu1 %v5122_v47 }
 0x5ed   :  { %3428 = vmatprep.subr.bf16.mxu1 %v5131_v48 }
 0x5f0   :  { %3429 = vmatpush1.bf16.msra.mxu1 %v5130_v56 }
 0x5f1   :  { %3430 = vmatprep.subr.bf16.mxu1 %v5139_v57 }
 0x5f4   :  { %3431 = vmatpush1.bf16.msra.mxu1 %v5138_v61 }
 0x5f5   :  { %4318 = vmatprep.subr.bf16.mxu1 %v5736_v62  ;;  %v5782_v62 = vld [vmem:[#allocation10 + $0x100] ss:$8 sps:$4 sm:$0xff]  }
 0x5f7   :  { %3433 = vmatmul.mubr.bf16.vlgmr.msra.gmra.mrb[20].mxu1 %v6535_v49  ;;  %v5754_v49 = vld [vmem:[#allocation10 + $0x64] ss:$8 sps:$4 sm:$0xff]  }
 0x5f8   :  { %4319 = vmatpush1.bf16.msra.mxu1 %v5734_v0 }
 0x5f9   :  { %4320 = vmatprep.subr.bf16.mxu1 %v5739_v1 }
 0x5fc   :  { %4321 = vmatpush1.bf16.msra.mxu1 %v5737_v2  ;;  %v5787_v2 = vld [vmem:[#allocation10 + $0x114] ss:$8 sps:$4 sm:$0xff]  }
 0x5fd   :  { %4322 = vmatprep.subr.bf16.mxu1 %v5742_v3 }
 0x600   :  { %4323 = vmatpush1.bf16.msra.mxu1 %v5740_v25 }
 0x601   :  { %4324 = vmatprep.subr.bf16.mxu1 %v5745_v53  ;;  %v4498_v53 = vpop.xlane.xlu0 %4497 }
 0x604   :  { %4325 = vmatpush1.bf16.msra.mxu1 %v5743_v4  ;;  %v5280_v4 = vld [vmem:[%s6635_s14] ss:$0 sm:$0xff] }
 0x605   :  { %4326 = vmatprep.subr.bf16.mxu1 %v5748_v5 }
 0x608   :  { %4327 = vmatpush1.bf16.msra.mxu1 %v5746_v63  ;;  %v5785_v63 = vld [vmem:[#allocation10 + $0x110] ss:$8 sps:$4 sm:$0xff]  }
 0x609   :  { %4328 = vmatprep.subr.bf16.mxu1 %v5751_v7  ;;  %v5790_v7 = vld [vmem:[#allocation10 + $0x124] ss:$8 sps:$4 sm:$0xff]  }
 0x60c   :  { %4329 = vmatpush1.bf16.msra.mxu1 %v5749_v8 }
 0x60d   :  { %4330 = vmatprep.subr.bf16.mxu1 %v5754_v49 }
 0x610   :  { %4331 = vmatpush1.bf16.msra.mxu1 %v5752_v9  ;;  %v5788_v9 = vld [vmem:[#allocation10 + $0x120] ss:$8 sps:$4 sm:$0xff]  }
 0x611   :  { %4332 = vmatprep.subr.bf16.mxu1 %v5757_v11  ;;  %v5793_v11 = vld [vmem:[#allocation10 + $0x134] ss:$8 sps:$4 sm:$0xff]  }
 0x614   :  { %4333 = vmatpush1.bf16.msra.mxu1 %v5755_v13  ;;  %v5791_v13 = vld [vmem:[#allocation10 + $0x130] ss:$8 sps:$4 sm:$0xff]  }
 0x615   :  { %4334 = vmatprep.subr.bf16.mxu1 %v5760_v16  ;;  %v5796_v16 = vld [vmem:[#allocation10 + $0x144] ss:$8 sps:$4 sm:$0xff]  }
 0x618   :  { %4335 = vmatpush1.bf16.msra.mxu1 %v5758_v20  ;;  %v5794_v20 = vld [vmem:[#allocation10 + $0x140] ss:$8 sps:$4 sm:$0xff]  }
 0x619   :  { %4336 = vmatprep.subr.bf16.mxu1 %v5763_v12  ;;  %v5799_v12 = vld [vmem:[#allocation10 + $0x154] ss:$8 sps:$4 sm:$0xff]  }
 0x61c   :  { %4337 = vmatpush1.bf16.msra.mxu1 %v5761_v22  ;;  %v5797_v22 = vld [vmem:[#allocation10 + $0x150] ss:$8 sps:$4 sm:$0xff]  }
 0x61d   :  { %4338 = vmatprep.subr.bf16.mxu1 %v5766_v24  ;;  %v5802_v24 = vld [vmem:[#allocation10 + $0x164] ss:$8 sps:$4 sm:$0xff]  }
 0x620   :  { %4339 = vmatpush1.bf16.msra.mxu1 %v5764_v23  ;;  %v5800_v23 = vld [vmem:[#allocation10 + $0x160] ss:$8 sps:$4 sm:$0xff]  }
 0x621   :  { %4340 = vmatprep.subr.bf16.mxu1 %v5769_v26  ;;  %v5805_v26 = vld [vmem:[#allocation10 + $0x174] ss:$8 sps:$4 sm:$0xff]  }
 0x624   :  { %4341 = vmatpush1.bf16.msra.mxu1 %v5767_v27  ;;  %v5803_v27 = vld [vmem:[#allocation10 + $0x170] ss:$8 sps:$4 sm:$0xff]  }
 0x625   :  { %4342 = vmatprep.subr.bf16.mxu1 %v5772_v28  ;;  %v5808_v28 = vld [vmem:[#allocation10 + $0x184] ss:$8 sps:$4 sm:$0xff]  }
 0x628   :  { %4343 = vmatpush1.bf16.msra.mxu1 %v5770_v44  ;;  %v2649_v44 = vrot.slane %v6568_v34, %v314_v15  ;;  %v5814_v15 = vld [vmem:[#allocation10 + $0x1a4] ss:$8 sps:$4 sm:$0xff]  }
 0x629   :  { %4344 = vmatprep.subr.bf16.mxu1 %v5775_v29  ;;  %v2653_v29 = vrot.slane %v6568_v34, %v318_v17  ;;  %v5812_v17 = vld [vmem:[#allocation10 + $0x1a0] ss:$8 sps:$4 sm:$0xff]  }
 0x62c   :  { %4345 = vmatpush1.bf16.msra.mxu1 %v5773_v30  ;;  %v5806_v30 = vld [vmem:[#allocation10 + $0x180] ss:$8 sps:$4 sm:$0xff]  }
 0x62d   :  { %4346 = vmatprep.subr.bf16.mxu1 %v5778_v21 }
 0x630   :  { %4347 = vmatpush1.bf16.msra.mxu1 %v5776_v31  ;;  %v5811_v31 = vld [vmem:[#allocation10 + $0x194] ss:$8 sps:$4 sm:$0xff]  }
 0x631   :  { %4348 = vmatprep.subr.bf16.mxu1 %v5781_v32 }
 0x634   :  { %4349 = vmatpush1.bf16.msra.mxu1 %v5779_v18 }
 0x635   :  { %4359 = vmatprep.subr.bf16.mxu1 %v5784_v33 }
 0x64a   :  { %v3352_v37 = vpop.f32.mrb[12].mxu1  ;;  %v6574_v38 = vpop.f32.mrb[16].mxu0 }
 0x64b   :  { %v3353_v39 = vadd.f32 %v3352_v37, %v2641_v35  ;;  %v3354_v40 = vpop.f32.mrb[13].mxu1  ;;  %v6576_v41 = vpop.f32.mrb[17].mxu0 }
 0x64c   :  { %v3355_v46 = vadd.f32 %v3354_v40, %v2645_v36  ;;  %v3356_v47 = vpop.f32.mrb[14].mxu1  ;;  %v3479_v48 = vpop.f32.mrb[18].mxu0 }
 0x64d   :  { %v5142_v50 = vmul.f32 -1.442695, %v3353_v39  ;;  %v3357_v51 = vpop.f32.mrb[15].mxu1  ;;  %v3480_v52 = vpop.f32.mrb[19].mxu0  ;;  %v5809_v39 = vld [vmem:[#allocation10 + $0x190] ss:$8 sps:$4 sm:$0xff]  }
 0x64e   :  { %v5143_v54 = vmul.f32 -1.442695, %v3355_v46  ;;  %v5817_v46 = vld [vmem:[#allocation10 + $0x1b4] ss:$8 sps:$4 sm:$0xff]   ;;  %v5815_v47 = vld [vmem:[#allocation10 + $0x1b0] ss:$8 sps:$4 sm:$0xff]  }
 0x64f   :  { %5978 = vpow2.f32 %v5142_v50  ;;  %v5820_v48 = vld [vmem:[#allocation10 + $0x1c4] ss:$8 sps:$4 sm:$0xff]   ;;  %v5818_v51 = vld [vmem:[#allocation10 + $0x1c0] ss:$8 sps:$4 sm:$0xff]  }
 0x650   :  { %5980 = vpow2.f32 %v5143_v54 }
 0x659   :  { %v5979_v55 = vpop.eup %5978 }
 0x65a   :  { %v3506_v56 = vadd.f32 1.0, %v5979_v55  ;;  %v5981_v57 = vpop.eup %5980  ;;  %v5823_v55 = vld [vmem:[#allocation10 + $0x1d4] ss:$8 sps:$4 sm:$0xff]  }
 0x65b   :  { %v3507_v58 = vadd.f32 1.0, %v5981_v57  ;;  %v5821_v57 = vld [vmem:[#allocation10 + $0x1d0] ss:$8 sps:$4 sm:$0xff]  }
 0x65c   :  { %5982 = vrcp.f32 %v3506_v56 }
 0x65d   :  { %5984 = vrcp.f32 %v3507_v58  ;;  %v5826_v58 = vld [vmem:[#allocation10 + $0x1e4] ss:$8 sps:$4 sm:$0xff]  }
 0x666   :  { %v5983_v59 = vpop.eup %5982 }
 0x667   :  { %v5985_v60 = vpop.eup %5984  ;;  %v3530_v1 = vpack.c.bf16 %v5983_v59, %v5983_v59  ;;  %v5824_v59 = vld [vmem:[#allocation10 + $0x1e0] ss:$8 sps:$4 sm:$0xff]  }
 0x668   :  { %v3531_v61 = vpack.c.bf16 %v5985_v60, %v5985_v60  ;;  %v5829_v60 = vld [vmem:[#allocation10 + $0x1f4] ss:$8 sps:$4 sm:$0xff]  }
 0x66a   :  { %v4581_v0 = vpop.f32.mrb[20].mxu0  ;;  %4350 = vmatprep.mubr.bf16.mxu1 %v3531_v61  ;;  %v5827_v61 = vld [vmem:[#allocation10 + $0x1f0] ss:$8 sps:$4 sm:$0xff]  }
 0x66b   :  { %v4585_v3 = vmul.f32 2.0, %v4581_v0  ;;  %v5372_v25 = vpop.f32.mrb[21].mxu0  ;;  %4351 = vmatmul.mubr.bf16.vlgmr.msra.gmra.mrb[24].mxu1 %v3530_v1  ;;  %v5832_v0 = vld [vmem:[#allocation10 + $0x204] ss:$8 sps:$4 sm:$0xff]  }
 0x66c   :  { %4360 = vmatpush1.bf16.msra.mxu1 %v5782_v62 }
 0x66d   :  { %v4586_v5 = vsub.f32 %v4498_v53, %v4585_v3  ;;  %4361 = vmatprep.subr.bf16.mxu1 %v5787_v2  ;;  %v5830_v3 = vld [vmem:[#allocation10 + $0x200] ss:$8 sps:$4 sm:$0xff]   ;;  %v5835_v53 = vld [vmem:[#allocation10 + $0x214] ss:$8 sps:$4 sm:$0xff]  }
 0x66f   :  { %v4594_v8 = vadd.f32 %v5280_v4, %v4586_v5  ;;  %v5833_v4 = vld [vmem:[#allocation10 + $0x210] ss:$8 sps:$4 sm:$0xff]   ;;  %v5838_v5 = vld [vmem:[#allocation10 + $0x224] ss:$8 sps:$4 sm:$0xff]  }
 0x670   :  { %4362 = vmatpush1.bf16.msra.mxu1 %v5785_v63  ;;  %v5836_v63 = vld [vmem:[#allocation10 + $0x220] ss:$8 sps:$4 sm:$0xff]  }
 0x671   :  { %v4595_v49 = vmax.f32 %v4594_v8, 0.0  ;;  %4363 = vmatprep.subr.bf16.mxu1 %v5790_v7  ;;  %v5841_v7 = vld [vmem:[#allocation10 + $0x234] ss:$8 sps:$4 sm:$0xff]   ;;  %v5839_v8 = vld [vmem:[#allocation10 + $0x230] ss:$8 sps:$4 sm:$0xff]  }
 0x673   :  { %4596 = vst [vmem:[%s6640_s19] sm:$0xff] %v4595_v49  ;;  %5406 = vmatmul.mubr.f32.vlgmr.msra.gmra.mrb[22].mxu0 %v4595_v49  ;;  %v5844_v49 = vld [vmem:[#allocation10 + $0x244] ss:$8 sps:$4 sm:$0xff]  }
 0x674   :  { %4364 = vmatpush1.bf16.msra.mxu1 %v5788_v9  ;;  %v5842_v9 = vld [vmem:[#allocation10 + $0x240] ss:$8 sps:$4 sm:$0xff]  }
 0x675   :  { %4365 = vmatprep.subr.bf16.mxu1 %v5793_v11  ;;  %v5847_v11 = vld [vmem:[#allocation10 + $0x254] ss:$8 sps:$4 sm:$0xff]  }
 0x678   :  { %4366 = vmatpush1.bf16.msra.mxu1 %v5791_v13  ;;  %v5845_v13 = vld [vmem:[#allocation10 + $0x250] ss:$8 sps:$4 sm:$0xff]  }
 0x679   :  { %4367 = vmatprep.subr.bf16.mxu1 %v5796_v16  ;;  %v5850_v16 = vld [vmem:[#allocation10 + $0x264] ss:$8 sps:$4 sm:$0xff]  }
 0x67c   :  { %4368 = vmatpush1.bf16.msra.mxu1 %v5794_v20  ;;  %v2669_v20 = vrot.slane %v6568_v34, %v334_v6  ;;  %v5854_v6 = vld [vmem:[#allocation10 + $0x280] ss:$8 sps:$4 sm:$0xff]  }
 0x67d   :  { %4369 = vmatprep.subr.bf16.mxu1 %v5799_v12  ;;  %v5848_v12 = vld [vmem:[#allocation10 + $0x260] ss:$8 sps:$4 sm:$0xff]  }
 0x680   :  { %4370 = vmatpush1.bf16.msra.mxu1 %v5797_v22  ;;  %v5853_v22 = vld [vmem:[#allocation10 + $0x274] ss:$8 sps:$4 sm:$0xff]  }
 0x681   :  { %4371 = vmatprep.subr.bf16.mxu1 %v5802_v24  ;;  %v3478_v24 = vadd.f32 %v6576_v41, %v2669_v20  ;;  %v5896_v20 = vld [vmem:[#allocation10 + $0x360] ss:$8 sps:$4 sm:$0xff]  }
 0x684   :  { %4372 = vmatpush1.bf16.msra.mxu1 %v5800_v23  ;;  %v5851_v23 = vld [vmem:[#allocation10 + $0x270] ss:$8 sps:$4 sm:$0xff]  }
 0x685   :  { %4373 = vmatprep.subr.bf16.mxu1 %v5805_v26  ;;  %v5856_v26 = vld [vmem:[#allocation10 + $0x284] ss:$8 sps:$4 sm:$0xff]  }
 0x688   :  { %4374 = vmatpush1.bf16.msra.mxu1 %v5803_v27  ;;  %v2657_v27 = vrot.slane %v6568_v34, %v322_v14 }
 0x689   :  { %4375 = vmatprep.subr.bf16.mxu1 %v5808_v28  ;;  %v2661_v28 = vrot.slane %v6568_v34, %v326_v19  ;;  %v5860_v19 = vld [vmem:[#allocation10 + $0x2a0] ss:$8 sps:$4 sm:$0xff]  }
 0x68a   :  { %v3393_v21 = vpop.f32.mrb[16].mxu1 }
 0x68b   :  { %v3394_v32 = vadd.f32 %v3393_v21, %v2649_v44  ;;  %v3395_v18 = vpop.f32.mrb[17].mxu1  ;;  %v5149_v44 = vmul.f32 -1.442695, %v3478_v24  ;;  %v5899_v24 = vld [vmem:[#allocation10 + $0x370] ss:$8 sps:$4 sm:$0xff]  }
 0x68c   :  { %v3396_v33 = vadd.f32 %v3395_v18, %v2653_v29  ;;  %v3397_v35 = vpop.f32.mrb[18].mxu1  ;;  %4376 = vmatpush1.bf16.msra.mxu1 %v5806_v30  ;;  %v5859_v30 = vld [vmem:[#allocation10 + $0x294] ss:$8 sps:$4 sm:$0xff]  }
 0x68d   :  { %v5144_v36 = vmul.f32 -1.442695, %v3394_v32  ;;  %v3398_v37 = vpop.f32.mrb[19].mxu1  ;;  %4377 = vmatprep.subr.bf16.mxu1 %v5811_v31  ;;  %v5857_v35 = vld [vmem:[#allocation10 + $0x290] ss:$8 sps:$4 sm:$0xff]  }
 0x68e   :  { %v5145_v40 = vmul.f32 -1.442695, %v3396_v33  ;;  %v5865_v37 = vld [vmem:[#allocation10 + $0x2b4] ss:$8 sps:$4 sm:$0xff]  }
 0x68f   :  { %5986 = vpow2.f32 %v5144_v36  ;;  %v5862_v36 = vld [vmem:[#allocation10 + $0x2a4] ss:$8 sps:$4 sm:$0xff]  }
 0x690   :  { %5988 = vpow2.f32 %v5145_v40  ;;  %4378 = vmatpush1.bf16.msra.mxu1 %v5809_v39  ;;  %v5863_v39 = vld [vmem:[#allocation10 + $0x2b0] ss:$8 sps:$4 sm:$0xff]   ;;  %v5868_v40 = vld [vmem:[#allocation10 + $0x2c4] ss:$8 sps:$4 sm:$0xff]  }
 0x691   :  { %4379 = vmatprep.subr.bf16.mxu1 %v5814_v15 }
 0x694   :  { %4380 = vmatpush1.bf16.msra.mxu1 %v5812_v17 }
 0x695   :  { %4381 = vmatprep.subr.bf16.mxu1 %v5817_v46  ;;  %v5866_v46 = vld [vmem:[#allocation10 + $0x2c0] ss:$8 sps:$4 sm:$0xff]  }
 0x698   :  { %4382 = vmatpush1.bf16.msra.mxu1 %v5815_v47 }
 0x699   :  { %v5987_v50 = vpop.eup %5986  ;;  %4383 = vmatprep.subr.bf16.mxu1 %v5820_v48 }
 0x69a   :  { %v5989_v52 = vpop.eup %5988  ;;  %v3508_v54 = vadd.f32 1.0, %v5987_v50 }
 0x69b   :  { %v3509_v56 = vadd.f32 1.0, %v5989_v52 }
 0x69c   :  { %5990 = vrcp.f32 %v3508_v54  ;;  %4384 = vmatpush1.bf16.msra.mxu1 %v5818_v51  ;;  %v5871_v51 = vld [vmem:[#allocation10 + $0x2d4] ss:$8 sps:$4 sm:$0xff]   ;;  %v5869_v54 = vld [vmem:[#allocation10 + $0x2d0] ss:$8 sps:$4 sm:$0xff]  }
 0x69d   :  { %5992 = vrcp.f32 %v3509_v56  ;;  %4385 = vmatprep.subr.bf16.mxu1 %v5823_v55  ;;  %v5874_v55 = vld [vmem:[#allocation10 + $0x2e4] ss:$8 sps:$4 sm:$0xff]   ;;  %v5872_v56 = vld [vmem:[#allocation10 + $0x2e0] ss:$8 sps:$4 sm:$0xff]  }
 0x69e   :  { %5994 = vpow2.f32 %v5149_v44  ;;  %v5913_v44 = vld [vmem:[#allocation10 + $0x3b4] ss:$8 sps:$4 sm:$0xff]  }
 0x6a0   :  { %4386 = vmatpush1.bf16.msra.mxu1 %v5821_v57  ;;  %v5877_v57 = vld [vmem:[#allocation10 + $0x2f4] ss:$8 sps:$4 sm:$0xff]  }
 0x6a1   :  { %4387 = vmatprep.subr.bf16.mxu1 %v5826_v58  ;;  %v5875_v58 = vld [vmem:[#allocation10 + $0x2f0] ss:$8 sps:$4 sm:$0xff]  }
 0x6a4   :  { %4388 = vmatpush1.bf16.msra.mxu1 %v5824_v59 }
 0x6a5   :  { %4389 = vmatprep.subr.bf16.mxu1 %v5829_v60  ;;  %v5880_v60 = vld [vmem:[#allocation10 + $0x304] ss:$8 sps:$4 sm:$0xff]  }
 0x6a6   :  { %v5991_v62 = vpop.eup %5990 }
 0x6a7   :  { %v5993_v1 = vpop.eup %5992  ;;  %v3532_v25 = vpack.c.bf16 %v5991_v62, %v5991_v62 }
 0x6a8   :  { %v3533_v2 = vpack.c.bf16 %v5993_v1, %v5993_v1  ;;  %4390 = vmatpush1.bf16.msra.mxu1 %v5827_v61  ;;  %v5995_v15 = vpop.eup %5994  ;;  %v5878_v1 = vld [vmem:[#allocation10 + $0x300] ss:$8 sps:$4 sm:$0xff]  }
 0x6a9   :  { %4400 = vmatprep.subr.bf16.mxu1 %v5832_v0  ;;  %v3513_v48 = vadd.f32 1.0, %v5995_v15  ;;  %v3666_v15 = vld [vmem:[%s6661_s15] sm:$0x3] }
 0x6aa   :  { %4391 = vmatprep.mubr.bf16.mxu1 %v3533_v2 }
 0x6ab   :  { %4392 = vmatmul.mubr.bf16.vlgmr.msra.gmra.mrb[24].mxu1 %v3532_v25 }
 0x6ac   :  { %4401 = vmatpush1.bf16.msra.mxu1 %v5830_v3  ;;  %v5883_v3 = vld [vmem:[#allocation10 + $0x314] ss:$8 sps:$4 sm:$0xff]  }
 0x6ad   :  { %4402 = vmatprep.subr.bf16.mxu1 %v5835_v53  ;;  %v5881_v53 = vld [vmem:[#allocation10 + $0x310] ss:$8 sps:$4 sm:$0xff]  }
 0x6b0   :  { %4403 = vmatpush1.bf16.msra.mxu1 %v5833_v4  ;;  %v5886_v4 = vld [vmem:[#allocation10 + $0x324] ss:$8 sps:$4 sm:$0xff]  }
 0x6b1   :  { %4404 = vmatprep.subr.bf16.mxu1 %v5838_v5  ;;  %v5884_v5 = vld [vmem:[#allocation10 + $0x320] ss:$8 sps:$4 sm:$0xff]  }
 0x6b4   :  { %4405 = vmatpush1.bf16.msra.mxu1 %v5836_v63  ;;  %v5889_v63 = vld [vmem:[#allocation10 + $0x334] ss:$8 sps:$4 sm:$0xff]  }
 0x6b5   :  { %4406 = vmatprep.subr.bf16.mxu1 %v5841_v7  ;;  %v5887_v7 = vld [vmem:[#allocation10 + $0x330] ss:$8 sps:$4 sm:$0xff]  }
 0x6b8   :  { %4407 = vmatpush1.bf16.msra.mxu1 %v5839_v8  ;;  %v5892_v8 = vld [vmem:[#allocation10 + $0x344] ss:$8 sps:$4 sm:$0xff]  }
 0x6b9   :  { %4408 = vmatprep.subr.bf16.mxu1 %v5844_v49  ;;  %v5890_v49 = vld [vmem:[#allocation10 + $0x340] ss:$8 sps:$4 sm:$0xff]  }
 0x6bc   :  { %4409 = vmatpush1.bf16.msra.mxu1 %v5842_v9  ;;  %v5895_v9 = vld [vmem:[#allocation10 + $0x354] ss:$8 sps:$4 sm:$0xff]  }
 0x6bd   :  { %4410 = vmatprep.subr.bf16.mxu1 %v5847_v11  ;;  %v5893_v11 = vld [vmem:[#allocation10 + $0x350] ss:$8 sps:$4 sm:$0xff]  }
 0x6c0   :  { %4411 = vmatpush1.bf16.msra.mxu1 %v5845_v13  ;;  %v5898_v13 = vld [vmem:[#allocation10 + $0x364] ss:$8 sps:$4 sm:$0xff]  }
 0x6c1   :  { %4412 = vmatprep.subr.bf16.mxu1 %v5850_v16  ;;  %v2665_v16 = vrot.slane %v6568_v34, %v330_v10  ;;  %v5910_v10 = vld [vmem:[#allocation10 + $0x3a4] ss:$8 sps:$4 sm:$0xff]   ;;  %v5908_v34 = vld [vmem:[#allocation10 + $0x3a0] ss:$8 sps:$4 sm:$0xff]  }
 0x6c4   :  { %4413 = vmatpush1.bf16.msra.mxu1 %v5848_v12  ;;  %v5901_v12 = vld [vmem:[#allocation10 + $0x374] ss:$8 sps:$4 sm:$0xff]  }
 0x6c5   :  { %4414 = vmatprep.subr.bf16.mxu1 %v5853_v22  ;;  %v3476_v22 = vadd.f32 %v6574_v38, %v2665_v16  ;;  %v5911_v38 = vld [vmem:[#allocation10 + $0x3b0] ss:$8 sps:$4 sm:$0xff]  }
 0x6c8   :  { %4415 = vmatpush1.bf16.msra.mxu1 %v5851_v23  ;;  %v5904_v23 = vld [vmem:[#allocation10 + $0x384] ss:$8 sps:$4 sm:$0xff]  }
 0x6c9   :  { %4416 = vmatprep.subr.bf16.mxu1 %v5856_v26  ;;  %v5148_v26 = vmul.f32 -1.442695, %v3476_v22 }
 0x6ca   :  { %v3434_v29 = vpop.f32.mrb[20].mxu1 }
 0x6cb   :  { %v3435_v21 = vadd.f32 %v3434_v29, %v2657_v27  ;;  %v3436_v41 = vpop.f32.mrb[21].mxu1  ;;  %v5902_v27 = vld [vmem:[#allocation10 + $0x380] ss:$8 sps:$4 sm:$0xff]   ;;  %v5916_v29 = vld [vmem:[#allocation10 + $0x3c4] ss:$8 sps:$4 sm:$0xff]  }
 0x6cc   :  { %v3437_v31 = vadd.f32 %v3436_v41, %v2661_v28  ;;  %v3438_v32 = vpop.f32.mrb[22].mxu1  ;;  %4417 = vmatpush1.bf16.msra.mxu1 %v5854_v6  ;;  %v5907_v28 = vld [vmem:[#allocation10 + $0x394] ss:$8 sps:$4 sm:$0xff]  }
 0x6cd   :  { %v5146_v18 = vmul.f32 -1.442695, %v3435_v21  ;;  %v3439_v33 = vpop.f32.mrb[23].mxu1  ;;  %4418 = vmatprep.subr.bf16.mxu1 %v5859_v30  ;;  %v5914_v21 = vld [vmem:[#allocation10 + $0x3c0] ss:$8 sps:$4 sm:$0xff]  }
 0x6ce   :  { %v5147_v14 = vmul.f32 -1.442695, %v3437_v31  ;;  %v5919_v41 = vld [vmem:[#allocation10 + $0x3d4] ss:$8 sps:$4 sm:$0xff]   ;;  %v5917_v31 = vld [vmem:[#allocation10 + $0x3d0] ss:$8 sps:$4 sm:$0xff]  }
 0x6cf   :  { %5996 = vpow2.f32 %v5146_v18  ;;  %v5922_v32 = vld [vmem:[#allocation10 + $0x3e4] ss:$8 sps:$4 sm:$0xff]   ;;  %v5920_v18 = vld [vmem:[#allocation10 + $0x3e0] ss:$8 sps:$4 sm:$0xff]   ;;  %v5925_v33 = vld [vmem:[#allocation10 + $0x3f4] ss:$8 sps:$4 sm:$0xff]  }
 0x6d0   :  { %5998 = vpow2.f32 %v5147_v14  ;;  %4419 = vmatpush1.bf16.msra.mxu1 %v5857_v35  ;;  %v5923_v35 = vld [vmem:[#allocation10 + $0x3f0] ss:$8 sps:$4 sm:$0xff]  }
 0x6d1   :  { %4420 = vmatprep.subr.bf16.mxu1 %v5862_v36 }
 0x6d4   :  { %4421 = vmatpush1.bf16.msra.mxu1 %v5860_v19  ;;  %v5281_v19 = vld [vmem:[%s6637_s16] ss:$0 sm:$0xff] }
 0x6d5   :  { %4422 = vmatprep.subr.bf16.mxu1 %v5865_v37 }
 0x6d8   :  { %4423 = vmatpush1.bf16.msra.mxu1 %v5863_v39 }
 0x6d9   :  { %v5997_v17 = vpop.eup %5996  ;;  %4424 = vmatprep.subr.bf16.mxu1 %v5868_v40 }
 0x6da   :  { %v5999_v47 = vpop.eup %5998  ;;  %v3510_v50 = vadd.f32 1.0, %v5997_v17  ;;  %v3671_v17 = vrot.slane %v3666_v15, %v6465_v43 }
 0x6db   :  { %v3511_v52 = vadd.f32 1.0, %v5999_v47 }
 0x6dc   :  { %6000 = vrcp.f32 %v3510_v50  ;;  %4425 = vmatpush1.bf16.msra.mxu1 %v5866_v46  ;;  %v3675_v46 = vrot.slane %v3666_v15, %v6473_v45 }
 0x6dd   :  { %6002 = vrcp.f32 %v3511_v52  ;;  %4426 = vmatprep.subr.bf16.mxu1 %v5871_v51 }
 0x6de   :  { %6004 = vrcp.f32 %v3513_v48 }
 0x6df   :  { %6006 = vpow2.f32 %v5148_v26 }
 0x6e0   :  { %4427 = vmatpush1.bf16.msra.mxu1 %v5869_v54 }
 0x6e1   :  { %4428 = vmatprep.subr.bf16.mxu1 %v5874_v55 }
 0x6e4   :  { %4429 = vmatpush1.bf16.msra.mxu1 %v5872_v56 }
 0x6e5   :  { %4430 = vmatprep.subr.bf16.mxu1 %v5877_v57 }
 0x6e6   :  { %v6001_v59 = vpop.eup %6000 }
 0x6e7   :  { %v6003_v61 = vpop.eup %6002  ;;  %v3534_v2 = vpack.c.bf16 %v6001_v59, %v6001_v59 }
 0x6e8   :  { %v6005_v62 = vpop.eup %6004  ;;  %v3535_v0 = vpack.c.bf16 %v6003_v61, %v6003_v61  ;;  %4431 = vmatpush1.bf16.msra.mxu1 %v5875_v58 }
 0x6e9   :  { %4441 = vmatprep.subr.bf16.mxu1 %v5880_v60  ;;  %v3537_v25 = vpack.c.bf16 %v6005_v62, %v6005_v62  ;;  %v6007_v6 = vpop.eup %6006 }
 0x6ea   :  { %4432 = vmatprep.mubr.bf16.mxu1 %v3535_v0  ;;  %v3512_v30 = vadd.f32 1.0, %v6007_v6 }
 0x6eb   :  { %4433 = vmatmul.mubr.bf16.vlgmr.msra.gmra.mrb[24].mxu1 %v3534_v2 }
 0x6ec   :  { %4442 = vmatpush1.bf16.msra.mxu1 %v5878_v1  ;;  %4473 = vmatprep.mubr.bf16.mxu1 %v3537_v25  ;;  %6008 = vrcp.f32 %v3512_v30 }
 0x6ed   :  { %4443 = vmatprep.subr.bf16.mxu1 %v5883_v3 }
 0x6f0   :  { %4444 = vmatpush1.bf16.msra.mxu1 %v5881_v53 }
 0x6f1   :  { %4445 = vmatprep.subr.bf16.mxu1 %v5886_v4 }
 0x6f4   :  { %4446 = vmatpush1.bf16.msra.mxu1 %v5884_v5 }
 0x6f5   :  { %4447 = vmatprep.subr.bf16.mxu1 %v5889_v63 }
 0x6f6   :  { %v6009_v14 = vpop.eup %6008 }
 0x6f7   :  { %v3536_v36 = vpack.c.bf16 %v6009_v14, %v6009_v14 }
 0x6f8   :  { %4448 = vmatpush1.bf16.msra.mxu1 %v5887_v7 }
 0x6f9   :  { %4449 = vmatprep.subr.bf16.mxu1 %v5892_v8 }
 0x6fc   :  { %4450 = vmatpush1.bf16.msra.mxu1 %v5890_v49 }
 0x6fd   :  { %4451 = vmatprep.subr.bf16.mxu1 %v5895_v9 }
 0x700   :  { %4452 = vmatpush1.bf16.msra.mxu1 %v5893_v11 }
 0x701   :  { %4453 = vmatprep.subr.bf16.mxu1 %v5898_v13 }
 0x704   :  { %4454 = vmatpush1.bf16.msra.mxu1 %v5896_v20 }
 0x705   :  { %4455 = vmatprep.subr.bf16.mxu1 %v5901_v12 }
 0x708   :  { %4456 = vmatpush1.bf16.msra.mxu1 %v5899_v24 }
 0x709   :  { %4457 = vmatprep.subr.bf16.mxu1 %v5904_v23 }
 0x70c   :  { %4458 = vmatpush1.bf16.msra.mxu1 %v5902_v27 }
 0x70d   :  { %4459 = vmatprep.subr.bf16.mxu1 %v5907_v28 }
 0x710   :  { %4460 = vmatpush1.bf16.msra.mxu1 %v5905_v42 }
 0x711   :  { %4461 = vmatprep.subr.bf16.mxu1 %v5910_v10 }
 0x714   :  { %4462 = vmatpush1.bf16.msra.mxu1 %v5908_v34 }
 0x715   :  { %4463 = vmatprep.subr.bf16.mxu1 %v5913_v44 }
 0x718   :  { %4464 = vmatpush1.bf16.msra.mxu1 %v5911_v38 }
 0x719   :  { %4465 = vmatprep.subr.bf16.mxu1 %v5916_v29 }
 0x71c   :  { %4466 = vmatpush1.bf16.msra.mxu1 %v5914_v21 }
 0x71d   :  { %4467 = vmatprep.subr.bf16.mxu1 %v5919_v41 }
 0x720   :  { %4468 = vmatpush1.bf16.msra.mxu1 %v5917_v31 }
 0x721   :  { %4469 = vmatprep.subr.bf16.mxu1 %v5922_v32 }
 0x724   :  { %4470 = vmatpush1.bf16.msra.mxu1 %v5920_v18 }
 0x725   :  { %4471 = vmatprep.subr.bf16.mxu1 %v5925_v33 }
 0x728   :  { %4472 = vmatpush1.bf16.msra.mxu1 %v5923_v35 }
 0x72b   :  { %4474 = vmatmul.mubr.bf16.vlgmr.msra.gmra.mrb[24].mxu1 %v3536_v36 }
 0x746   :  { %v4686_v37 = vpop.f32.mrb[22].mxu0 }
 0x747   :  { %v4687_v39 = vadd.f32 %v5281_v19, %v4686_v37  ;;  %v5407_v40 = vpop.f32.mrb[23].mxu0 }
 0x749   :  { %4690 = vst [vmem:[%s6641_s20] sm:$0xff] %v4687_v39 }
 0x7fe   :  { %v4475_v47 = vpop.f32.mrb[24].mxu1 }
 0x7ff   :  { %v5458_v48 = vadd.f32 %v4475_v47, %v3671_v17  ;;  %v4477_v50 = vpop.f32.mrb[25].mxu1 }
 0x800   :  { %v5459_v51 = vadd.f32 %v4477_v50, %v3675_v46  ;;  %v4479_v52 = vpop.f32.mrb[26].mxu1 }
 0x801   :  { %v5278_v54 = vmul.f32 -1.442695, %v5458_v48  ;;  %v4480_v55 = vpop.f32.mrb[27].mxu1 }
 0x802   :  { %v5279_v56 = vmul.f32 -1.442695, %v5459_v51 }
 0x803   :  { %6010 = vpow2.f32 %v5278_v54 }
 0x804   :  { %6012 = vpow2.f32 %v5279_v56 }
 0x80d   :  { %v6011_v57 = vpop.eup %6010 }
 0x80e   :  { %v6013_v58 = vpop.eup %6012  ;;  %v4488_v59 = vadd.f32 1.0, %v6011_v57 }
 0x80f   :  { %v4489_v60 = vadd.f32 1.0, %v6013_v58 }
 0x810   :  { %6014 = vrcp.f32 %v4488_v59 }
 0x811   :  { %6016 = vrcp.f32 %v4489_v60 }
 0x81a   :  { %v6015_v61 = vpop.eup %6014 }
 0x81b   :  { %v6017_v43 = vpop.eup %6016  ;;  %4494 = vst [vmem:[%s6662_s30] sm:$0xff] %v6015_v61 }
 0x81c   :  { %4495 = vst [vmem:[%s6662_s30 + $0x8] sm:$0xff] %v6017_v43 }
 0x81d   :  { %4707 = vsyncpa [#allocation3], 1 }
 0x81e   :  { %4708 = vsyncpa [#allocation5], 1 }
 0x81f   :  { %4709 = vsyncpa [#allocation8], 1 }
 0x820   :  { %4710 = vsyncpa [#allocation11], 1 }
 0x821   :  { %4711 = vsyncpa [#allocation14], 1 }

</bundles_post_ra>
